<compile_context>
chip_gen: v5e
topology: v5e:2x2
jax: 0.10.0
libtpu: 0.0.40
codegen_flags: <defaults>
</compile_context>

<pallas_src>
import functools

import numpy as np
import jax
import jax.numpy as jnp
from jax import lax
from jax.experimental import pallas as pl
from jax.experimental.pallas import tpu as pltpu

NEG = -1e9  # same constant PyTorch uses in masked_fill


# ---------------------------------------------------------------------------
# Kernel 1: mnm() + all student-invariant softmax / sigmoid work (runs once)
# ---------------------------------------------------------------------------
def mnm_kernel(enlarge, C, P,
               exer_ref, conc_ref, pote_ref, adj_ref, adjt_ref, par_ref,
               rpack_ref, ectc_ref, wab_ref, gs_ref):
    f32 = jnp.float32
    ex = exer_ref[...]        # (E, h)
    co = conc_ref[...]        # (C, h)
    po = pote_ref[...]        # (P, h)
    adj = adj_ref[...]        # (E, C)
    adjt = adjt_ref[...]      # (C, E) == adj.T

    def rownorm(m):           # rsqrt -> EUP, broadcast mul -> VPU
        return m * lax.rsqrt(jnp.sum(m * m, axis=1, keepdims=True))

    exn, con, pon = rownorm(ex), rownorm(co), rownorm(po)

    def ncos(a, b):           # cosine sim of pre-normalized rows: one MXU dot
        return lax.dot_general(a, b, (((1,), (1,)), ((), ())),
                               preferred_element_type=f32) * enlarge

    etc = jnp.where(adj == 0.0, NEG, ncos(exn, con))      # (E, C) masked
    etp = ncos(exn, pon)                                  # (E, P)
    ctc = ncos(con, con)                                  # (C, C)
    etct = jnp.where(adjt == 0.0, NEG, ncos(con, exn))    # (C, E) == etc.T
    etpt = ncos(pon, exn)                                 # (P, E) == etp.T

    def colexp(x):  # exp shifted by per-column max (cancels in num/den ratios)
        return jnp.exp(x - jnp.max(x, axis=0, keepdims=True))

    out_dt = rpack_ref.dtype
    rpack_ref[:, 0:C] = colexp(etc).astype(out_dt)
    rpack_ref[:, C:C + P] = colexp(etp).astype(out_dt)
    rpack_ref[:, C + P:] = adj.astype(out_dt)
    ectc_ref[...] = colexp(ctc).astype(ectc_ref.dtype)

    par = par_ref[...]                                    # (3, E): lam/gue/sli
    lam = jax.nn.sigmoid(par[0:1, :])
    gue = jax.nn.sigmoid(par[1:2, :])
    sli = jax.nn.sigmoid(par[2:3, :])

    # Fold the lambda blend of Y_A / Y_B into the student-invariant weights.
    wab_ref[0:C, :] = (jax.nn.softmax(etct, axis=0) * (1.0 - lam)).astype(wab_ref.dtype)
    wab_ref[C:, :] = (jax.nn.softmax(etpt, axis=0) * lam).astype(wab_ref.dtype)

    # Y = (1-slide)*Y_ + guess*(1-Y_) = guess + (1-slide-guess)*Y_
    gs_ref[0:1, :] = gue
    gs_ref[1:2, :] = 1.0 - sli - gue


def run_mnm(exer_m, conc_m, pote_m, adj, par3, enlarge, mxu_dtype):
    E, h = exer_m.shape
    C = conc_m.shape[0]
    P = pote_m.shape[0]
    kernel = functools.partial(mnm_kernel, float(enlarge), C, P)
    # TODO(synk): at production E/C/P/h, tile this over (E, C|P, h) with an f32
    # VMEM accumulator ("parallel","parallel","arbitrary") instead of a single
    # whole-matrix block.
    return pl.pallas_call(
        kernel,
        grid=(1,),
        out_shape=(jax.ShapeDtypeStruct((E, 2 * C + P), mxu_dtype),  # rpack
                   jax.ShapeDtypeStruct((C, C), mxu_dtype),          # ectc
                   jax.ShapeDtypeStruct((C + P, E), mxu_dtype),      # wab
                   jax.ShapeDtypeStruct((2, E), jnp.float32)),       # gs
        in_specs=[pl.BlockSpec((E, h), lambda i: (0, 0)),
                  pl.BlockSpec((C, h), lambda i: (0, 0)),
                  pl.BlockSpec((P, h), lambda i: (0, 0)),
                  pl.BlockSpec((E, C), lambda i: (0, 0)),
                  pl.BlockSpec((C, E), lambda i: (0, 0)),
                  pl.BlockSpec((3, E), lambda i: (0, 0))],
        out_specs=(pl.BlockSpec((E, 2 * C + P), lambda i: (0, 0)),
                   pl.BlockSpec((C, C), lambda i: (0, 0)),
                   pl.BlockSpec((C + P, E), lambda i: (0, 0)),
                   pl.BlockSpec((2, E), lambda i: (0, 0))),
    )(exer_m, conc_m, pote_m, adj, adj.T, par3)


# ---------------------------------------------------------------------------
# Kernel 2: batched per-student compute (TN students per grid step)
# ---------------------------------------------------------------------------
def student_kernel(C, P, E, L,
                   idx_ref, xs_ref, vd_ref, rpack_ref, ectc_ref, wab_ref,
                   gs_ref, out_ref):
    f32 = jnp.float32
    mxu = rpack_ref.dtype
    idx = idx_ref[...]                    # (TN, L) int32 exercise ids
    xs = xs_ref[...]                      # (TN, L) score * valid
    vd = vd_ref[...]                      # (TN, L) validity {0,1}
    TN = idx.shape[0]

    # Per-student weighted exercise counts via one-hot compares (no gather, no
    # (N*L, C)/(N*L, P) HBM traffic):
    #   xcount[n,e] = sum_l xs[n,l]*[idx[n,l]==e],  count[n,e] = sum_l vd[n,l]*[...]
    e_row = lax.broadcasted_iota(jnp.int32, (TN, E), 1)
    xcount = jnp.zeros((TN, E), f32)
    count = jnp.zeros((TN, E), f32)
    for l in range(L):                    # L is small & static -> unrolled VPU ops
        hit = idx[:, l:l + 1] == e_row
        xcount = xcount + jnp.where(hit, xs[:, l:l + 1], 0.0)
        count = count + jnp.where(hit, vd[:, l:l + 1], 0.0)

    # One fused MXU matmul: [xcount ; count] @ [eetc | eetp | adj].
    lhs = jnp.concatenate([xcount, count], axis=0).astype(mxu)        # (2TN, E)
    o1 = jnp.dot(lhs, rpack_ref[...], preferred_element_type=f32)     # (2TN, 2C+P)
    num1, den1 = o1[:TN, 0:C], o1[TN:, 0:C]
    num2, den2 = o1[:TN, C:C + P], o1[TN:, C:C + P]
    covered = o1[TN:, C + P:]                                         # count @ adj

    val = num1 / jnp.maximum(den1, 1e-30)     # X_i @ softmax(W1_i, dim=0)
    b = num2 / jnp.maximum(den2, 1e-30)       # X_i @ softmax(D1_i, dim=0)
    m = (covered != 0.0).astype(f32)          # covered-concept mask (exact ints)

    # A_i = val @ softmax(conctoconc[covered], dim=0): one fused matmul; the
    # global colmax shift in ectc cancels in the num/den ratio.
    lhs_a = jnp.concatenate([val * m, m], axis=0).astype(mxu)         # (2TN, C)
    oa = jnp.dot(lhs_a, ectc_ref[...], preferred_element_type=f32)    # (2TN, C)
    a = oa[:TN] / jnp.maximum(oa[TN:], 1e-30)

    # Y_ = (1-lam)*Y_A + lam*Y_B as ONE matmul against the lambda-folded weights.
    ab = jnp.concatenate([a, b], axis=1).astype(mxu)                  # (TN, C+P)
    y_ = jnp.dot(ab, wab_ref[...], preferred_element_type=f32)        # (TN, E)
    y_ = jnp.clip(y_, 1e-8, 1.0 - 1e-8)
    gs = gs_ref[...]
    y = gs[0:1, :] + gs[1:2, :] * y_          # guess + (1-slide-guess)*Y_

    # Single lane-dense (TN, C+E) output slab: [A | Y].
    out_ref[:, 0:C] = a
    out_ref[:, C:] = y


def cicdm_forward(params, adj, exer_idx, scores, valid, enlarge,
                  student_tile=128, mxu_dtype=jnp.bfloat16):
    """CICDM_Net.forward for padded (N, L) exercise/score lists.

    Returns (A, Y) with shapes (N, C), (N, E). Padded slots (valid == 0) are
    mathematically excluded, matching the module's variable-length loops.
    """
    exer_m, conc_m, pote_m, lambd, guess, slide = params
    E, h = exer_m.shape
    C = conc_m.shape[0]
    P = pote_m.shape[0]
    N, L = exer_idx.shape
    f32 = jnp.float32

    par3 = jnp.concatenate([lambd, guess, slide], axis=0)             # (3, E)

    # Kernel 1: similarity matrices + all student-invariant softmax/sigmoid.
    rpack, ectc, wab, gs = run_mnm(exer_m, conc_m, pote_m, adj, par3,
                                   enlarge, mxu_dtype)

    # Student tiling: one big block when everything fits (v5e/v6e have a single
    # TensorCore, so multiple blocks only help v7x megacore); else student_tile.
    N8 = ((N + 7) // 8) * 8
    TN = N8 if N8 <= student_tile else int(student_tile)
    Np = ((N + TN - 1) // TN) * TN
    pad = Np - N

    idx = exer_idx.astype(jnp.int32)
    xs = (scores * valid).astype(f32)
    vd = valid.astype(f32)
    if pad:
        idx = jnp.pad(idx, ((0, pad), (0, 0)))
        xs = jnp.pad(xs, ((0, pad), (0, 0)))
        vd = jnp.pad(vd, ((0, pad), (0, 0)))

    kernel = functools.partial(student_kernel, C, P, E, L)
    # TODO(synk): for very large E, replace the in-kernel one-hot counts with a
    # PrefetchScalarGridSpec scalar-prefetched exer_idx + manual DMA row gather.
    # TODO(synk): on v7x mark the grid-invariant operands (rpack/ectc/wab/gs)
    # with pipeline_mode=pl.Buffered(1) once their production size matters.
    out = pl.pallas_call(
        kernel,
        grid=(Np // TN,),
        out_shape=jax.ShapeDtypeStruct((Np, C + E), f32),
        in_specs=[pl.BlockSpec((TN, L), lambda i: (i, 0)),
                  pl.BlockSpec((TN, L), lambda i: (i, 0)),
                  pl.BlockSpec((TN, L), lambda i: (i, 0)),
                  pl.BlockSpec((E, 2 * C + P), lambda i: (0, 0)),
                  pl.BlockSpec((C, C), lambda i: (0, 0)),
                  pl.BlockSpec((C + P, E), lambda i: (0, 0)),
                  pl.BlockSpec((2, E), lambda i: (0, 0))],
        out_specs=pl.BlockSpec((TN, C + E), lambda i: (i, 0)),
        compiler_params=pltpu.CompilerParams(
            dimension_semantics=("parallel",)),
    )(idx, xs, vd, rpack, ectc, wab, gs)

    return out[:N, :C], out[:N, C:]


# ---------------------------------------------------------------------------
# Pure-numpy reference mirroring the original PyTorch forward (variable-length
# lists, explicit row/column selection) — used only for verification.
# ---------------------------------------------------------------------------
def reference_forward(exer_m, conc_m, pote_m, lambd, guess, slide, adj,
                      exer_lists, score_lists, enlarge):
    f32 = np.float32

    def softmax(x, axis):
        x = x - x.max(axis=axis, keepdims=True)
        e = np.exp(x).astype(f32)
        return e / e.sum(axis=axis, keepdims=True)

    def cos_sim(m1, m2):
        up = (m1 @ m2.T).astype(f32)
        down = (np.sqrt((m1 ** 2).sum(1)).reshape(-1, 1)
                @ np.sqrt((m2 ** 2).sum(1)).reshape(1, -1)).astype(f32)
        return up / down * f32(enlarge)

    etc = cos_sim(exer_m, conc_m)
    etc = np.where(adj == 0, f32(NEG), etc)
    ctc = cos_sim(conc_m, conc_m)
    etp = cos_sim(exer_m, pote_m)

    N = len(exer_lists)
    C = conc_m.shape[0]
    P = pote_m.shape[0]
    A = np.zeros((N, C), dtype=f32)
    B = np.zeros((N, P), dtype=f32)
    for i in range(N):
        idx = exer_lists[i]
        X = np.asarray(score_lists[i], dtype=f32).reshape(1, -1)
        W1_ = etc[idx]
        adj_i = adj[idx]
        sel = adj_i.sum(0) != 0
        W1 = W1_[:, sel]
        val = X @ softmax(W1, 0)
        W2 = softmax(ctc[sel], 0)
        A[i] = (val @ W2)[0]
        D1 = softmax(etp[idx], 0)
        B[i] = (X @ D1)[0]

    sig = lambda z: (1.0 / (1.0 + np.exp(-z))).astype(f32)
    lam, gue, sli = sig(lambd), sig(guess), sig(slide)
    Y_A = A @ softmax(etc.T, 0)
    Y_B = B @ softmax(etp.T, 0)
    Y_ = (1 - lam) * Y_A + lam * Y_B
    Y_ = np.clip(Y_, 1e-8, 1 - 1e-8)
    Y = (1 - sli) * Y_ + gue * (1 - Y_)
    return A, Y


# ---------------------------------------------------------------------------
if __name__ == "__main__":
    concept_num, exercise_num, potential_num = 16, 32, 8
    h, enlarge_size = 16, 5.0
    N, L = 200, 8                 # students, max exercises per student (padded)

    key = jax.random.PRNGKey(0)
    k_ex, k_co, k_po, k_adj, k_idx, k_sc, k_len = jax.random.split(key, 7)

    exer_matrix = jax.random.normal(k_ex, (exercise_num, h), jnp.float32)
    conc_matrix = jax.random.normal(k_co, (concept_num, h), jnp.float32)
    pote_matrix = jax.random.normal(k_po, (potential_num, h), jnp.float32)
    lambd = jnp.full((1, exercise_num), -2.0, jnp.float32)
    guess = jnp.full((1, exercise_num), -2.0, jnp.float32)
    slide = jnp.full((1, exercise_num), -2.0, jnp.float32)

    # Exercise-concept adjacency (every exercise covers >= 1 concept).
    adj = jax.random.bernoulli(k_adj, 0.3, (exercise_num, concept_num))
    adj = adj.astype(jnp.float32)
    adj = adj.at[jnp.arange(exercise_num),
                 jnp.arange(exercise_num) % concept_num].set(1.0)

    # Variable-length exercise / score lists, padded to L with a valid mask.
    lengths = np.asarray(jax.random.randint(k_len, (N,), 1, L + 1))
    exer_idx = jax.random.randint(k_idx, (N, L), 0, exercise_num, jnp.int32)
    scores = jax.random.bernoulli(k_sc, 0.6, (N, L)).astype(jnp.float32)
    valid = jnp.asarray(
        (np.arange(L)[None, :] < lengths[:, None]).astype(np.float32))
    scores = scores * valid

    params = (exer_matrix, conc_matrix, pote_matrix, lambd, guess, slide)
    fwd = jax.jit(lambda p, a, e, s, v: cicdm_forward(
        p, a, e, s, v, enlarge_size))
    A, Y = fwd(params, adj, exer_idx, scores, valid)
    A = jax.block_until_ready(A)
    Y = jax.block_until_ready(Y)

    # Verify against a numpy reference mirroring the PyTorch loop exactly.
    exer_np = np.asarray(exer_idx)
    sc_np = np.asarray(scores)
    exer_lists = [list(exer_np[i, :lengths[i]]) for i in range(N)]
    score_lists = [list(sc_np[i, :lengths[i]]) for i in range(N)]
    A_ref, Y_ref = reference_forward(
        np.asarray(exer_matrix), np.asarray(conc_matrix),
        np.asarray(pote_matrix), np.asarray(lambd), np.asarray(guess),
        np.asarray(slide), np.asarray(adj), exer_lists, score_lists,
        enlarge_size)

    assert A.shape == (N, concept_num) and Y.shape == (N, exercise_num)
    # bf16 MXU operands (f32 accumulation) -> slightly looser tolerance.
    np.testing.assert_allclose(np.asarray(A), A_ref, rtol=2e-2, atol=2e-2)
    np.testing.assert_allclose(np.asarray(Y), Y_ref, rtol=2e-2, atol=2e-2)
    print("KERNEL_OK")
</pallas_src>

<mosaic_0001>
module attributes {stable_mosaic.version = 11 : i64} {
  func.func @mnm_kernel(%arg0: i32, %arg1: memref<32x16xf32, #tpu.memory_space<vmem>>, %arg2: memref<16x16xf32, #tpu.memory_space<vmem>>, %arg3: memref<8x16xf32, #tpu.memory_space<vmem>>, %arg4: memref<32x16xf32, #tpu.memory_space<vmem>>, %arg5: memref<16x32xf32, #tpu.memory_space<vmem>>, %arg6: memref<3x32xf32, #tpu.memory_space<vmem>>, %arg7: memref<32x40xbf16, #tpu.memory_space<vmem>>, %arg8: memref<16x16xbf16, #tpu.memory_space<vmem>>, %arg9: memref<24x32xbf16, #tpu.memory_space<vmem>>, %arg10: memref<2x32xf32, #tpu.memory_space<vmem>>) attributes {dimension_semantics = [#tpu.dimension_semantics<arbitrary>], iteration_bounds = array<i64: 1>, scalar_prefetch = 0 : i64, scratch_operands = 0 : i64, tpu.core_type = #tpu.core_type<tc>, window_params = [{pipeline_mode = #tpu.pipeline_mode<synchronous>, transform_indices = @transform_0, window_bounds = array<i64: 32, 16>}, {pipeline_mode = #tpu.pipeline_mode<synchronous>, transform_indices = @transform_1, window_bounds = array<i64: 16, 16>}, {pipeline_mode = #tpu.pipeline_mode<synchronous>, transform_indices = @transform_2, window_bounds = array<i64: 8, 16>}, {pipeline_mode = #tpu.pipeline_mode<synchronous>, transform_indices = @transform_3, window_bounds = array<i64: 32, 16>}, {pipeline_mode = #tpu.pipeline_mode<synchronous>, transform_indices = @transform_4, window_bounds = array<i64: 16, 32>}, {pipeline_mode = #tpu.pipeline_mode<synchronous>, transform_indices = @transform_5, window_bounds = array<i64: 3, 32>}, {pipeline_mode = #tpu.pipeline_mode<synchronous>, transform_indices = @transform_6, window_bounds = array<i64: 32, 40>}, {pipeline_mode = #tpu.pipeline_mode<synchronous>, transform_indices = @transform_7, window_bounds = array<i64: 16, 16>}, {pipeline_mode = #tpu.pipeline_mode<synchronous>, transform_indices = @transform_8, window_bounds = array<i64: 24, 32>}, {pipeline_mode = #tpu.pipeline_mode<synchronous>, transform_indices = @transform_9, window_bounds = array<i64: 2, 32>}]} {
    %c0 = arith.constant 0 : index
    %c0_0 = arith.constant 0 : index
    %0 = vector.load %arg1[%c0, %c0_0] : memref<32x16xf32, #tpu.memory_space<vmem>>, vector<32x16xf32>
    %c0_1 = arith.constant 0 : index
    %c0_2 = arith.constant 0 : index
    %1 = vector.load %arg2[%c0_1, %c0_2] : memref<16x16xf32, #tpu.memory_space<vmem>>, vector<16x16xf32>
    %c0_3 = arith.constant 0 : index
    %c0_4 = arith.constant 0 : index
    %2 = vector.load %arg3[%c0_3, %c0_4] : memref<8x16xf32, #tpu.memory_space<vmem>>, vector<8x16xf32>
    %c0_5 = arith.constant 0 : index
    %c0_6 = arith.constant 0 : index
    %3 = vector.load %arg4[%c0_5, %c0_6] : memref<32x16xf32, #tpu.memory_space<vmem>>, vector<32x16xf32>
    %c0_7 = arith.constant 0 : index
    %c0_8 = arith.constant 0 : index
    %4 = vector.load %arg5[%c0_7, %c0_8] : memref<16x32xf32, #tpu.memory_space<vmem>>, vector<16x32xf32>
    %5 = arith.mulf %0, %0 : vector<32x16xf32>
    %cst = arith.constant dense<0.000000e+00> : vector<32xf32>
    %6 = vector.multi_reduction <add>, %5, %cst [1] : vector<32x16xf32> to vector<32xf32>
    %7 = vector.shape_cast %6 : vector<32xf32> to vector<32x1xf32>
    %8 = math.rsqrt %7 : vector<32x1xf32>
    %9 = vector.broadcast %8 : vector<32x1xf32> to vector<32x16xf32>
    %10 = arith.mulf %0, %9 : vector<32x16xf32>
    %11 = arith.mulf %1, %1 : vector<16x16xf32>
    %cst_9 = arith.constant dense<0.000000e+00> : vector<16xf32>
    %12 = vector.multi_reduction <add>, %11, %cst_9 [1] : vector<16x16xf32> to vector<16xf32>
    %13 = vector.shape_cast %12 : vector<16xf32> to vector<16x1xf32>
    %14 = math.rsqrt %13 : vector<16x1xf32>
    %15 = vector.broadcast %14 : vector<16x1xf32> to vector<16x16xf32>
    %16 = arith.mulf %1, %15 : vector<16x16xf32>
    %17 = arith.mulf %2, %2 : vector<8x16xf32>
    %cst_10 = arith.constant dense<0.000000e+00> : vector<8xf32>
    %18 = vector.multi_reduction <add>, %17, %cst_10 [1] : vector<8x16xf32> to vector<8xf32>
    %19 = vector.shape_cast %18 : vector<8xf32> to vector<8x1xf32>
    %20 = math.rsqrt %19 : vector<8x1xf32>
    %21 = vector.broadcast %20 : vector<8x1xf32> to vector<8x16xf32>
    %22 = arith.mulf %2, %21 : vector<8x16xf32>
    %cst_11 = arith.constant 0.000000e+00 : f32
    %23 = vector.broadcast %cst_11 : f32 to vector<32x16xf32>
    %24 = arith.cmpf oeq, %3, %23 : vector<32x16xf32>
    %cst_12 = arith.constant dense<0.000000e+00> : vector<32x16xf32>
    %25 = tpu.matmul %10, %16, %cst_12 {dimension_numbers = #tpu.dot_dimension_numbers<[1], [1], [0], [0], [0, 0, 1, 0], [], []>} : vector<32x16xf32>, vector<16x16xf32>, vector<32x16xf32> -> vector<32x16xf32>
    %cst_13 = arith.constant 5.000000e+00 : f32
    %26 = vector.broadcast %cst_13 : f32 to vector<32x16xf32>
    %27 = arith.mulf %25, %26 : vector<32x16xf32>
    %cst_14 = arith.constant -1.000000e+09 : f32
    %28 = vector.broadcast %cst_14 : f32 to vector<32x16xf32>
    %29 = arith.select %24, %28, %27 : vector<32x16xi1>, vector<32x16xf32>
    %cst_15 = arith.constant dense<0.000000e+00> : vector<32x8xf32>
    %30 = tpu.matmul %10, %22, %cst_15 {dimension_numbers = #tpu.dot_dimension_numbers<[1], [1], [0], [0], [0, 0, 1, 0], [], []>} : vector<32x16xf32>, vector<8x16xf32>, vector<32x8xf32> -> vector<32x8xf32>
    %cst_16 = arith.constant 5.000000e+00 : f32
    %31 = vector.broadcast %cst_16 : f32 to vector<32x8xf32>
    %32 = arith.mulf %30, %31 : vector<32x8xf32>
    %cst_17 = arith.constant dense<0.000000e+00> : vector<16x16xf32>
    %33 = tpu.matmul %16, %16, %cst_17 {dimension_numbers = #tpu.dot_dimension_numbers<[1], [1], [0], [0], [0, 0, 1, 0], [], []>} : vector<16x16xf32>, vector<16x16xf32>, vector<16x16xf32> -> vector<16x16xf32>
    %cst_18 = arith.constant 5.000000e+00 : f32
    %34 = vector.broadcast %cst_18 : f32 to vector<16x16xf32>
    %35 = arith.mulf %33, %34 : vector<16x16xf32>
    %cst_19 = arith.constant 0.000000e+00 : f32
    %36 = vector.broadcast %cst_19 : f32 to vector<16x32xf32>
    %37 = arith.cmpf oeq, %4, %36 : vector<16x32xf32>
    %cst_20 = arith.constant dense<0.000000e+00> : vector<16x32xf32>
    %38 = tpu.matmul %16, %10, %cst_20 {dimension_numbers = #tpu.dot_dimension_numbers<[1], [1], [0], [0], [0, 0, 1, 0], [], []>} : vector<16x16xf32>, vector<32x16xf32>, vector<16x32xf32> -> vector<16x32xf32>
    %cst_21 = arith.constant 5.000000e+00 : f32
    %39 = vector.broadcast %cst_21 : f32 to vector<16x32xf32>
    %40 = arith.mulf %38, %39 : vector<16x32xf32>
    %cst_22 = arith.constant -1.000000e+09 : f32
    %41 = vector.broadcast %cst_22 : f32 to vector<16x32xf32>
    %42 = arith.select %37, %41, %40 : vector<16x32xi1>, vector<16x32xf32>
    %cst_23 = arith.constant dense<0.000000e+00> : vector<8x32xf32>
    %43 = tpu.matmul %22, %10, %cst_23 {dimension_numbers = #tpu.dot_dimension_numbers<[1], [1], [0], [0], [0, 0, 1, 0], [], []>} : vector<8x16xf32>, vector<32x16xf32>, vector<8x32xf32> -> vector<8x32xf32>
    %cst_24 = arith.constant 5.000000e+00 : f32
    %44 = vector.broadcast %cst_24 : f32 to vector<8x32xf32>
    %45 = arith.mulf %43, %44 : vector<8x32xf32>
    %cst_25 = arith.constant dense<0xFF800000> : vector<16xf32>
    %46 = vector.multi_reduction <maximumf>, %29, %cst_25 [0] : vector<32x16xf32> to vector<16xf32>
    %47 = vector.shape_cast %46 : vector<16xf32> to vector<1x16xf32>
    %48 = vector.broadcast %47 : vector<1x16xf32> to vector<32x16xf32>
    %49 = arith.subf %29, %48 : vector<32x16xf32>
    %50 = math.exp %49 : vector<32x16xf32>
    %51 = arith.truncf %50 : vector<32x16xf32> to vector<32x16xbf16>
    %c0_26 = arith.constant 0 : index
    %c0_27 = arith.constant 0 : index
    %52 = vector.load %arg7[%c0_26, %c0_27] : memref<32x40xbf16, #tpu.memory_space<vmem>>, vector<32x16xbf16>
    tpu.vector_store %arg7[%c0_26, %c0_27], %51 {strides = array<i32>} : memref<32x40xbf16, #tpu.memory_space<vmem>>, vector<32x16xbf16>,
    %cst_28 = arith.constant dense<0xFF800000> : vector<8xf32>
    %53 = vector.multi_reduction <maximumf>, %32, %cst_28 [0] : vector<32x8xf32> to vector<8xf32>
    %54 = vector.shape_cast %53 : vector<8xf32> to vector<1x8xf32>
    %55 = vector.broadcast %54 : vector<1x8xf32> to vector<32x8xf32>
    %56 = arith.subf %32, %55 : vector<32x8xf32>
    %57 = math.exp %56 : vector<32x8xf32>
    %58 = arith.truncf %57 : vector<32x8xf32> to vector<32x8xbf16>
    %c0_29 = arith.constant 0 : index
    %c16 = arith.constant 16 : index
    %59 = vector.load %arg7[%c0_29, %c16] : memref<32x40xbf16, #tpu.memory_space<vmem>>, vector<32x8xbf16>
    tpu.vector_store %arg7[%c0_29, %c16], %58 {strides = array<i32>} : memref<32x40xbf16, #tpu.memory_space<vmem>>, vector<32x8xbf16>,
    %60 = arith.truncf %3 : vector<32x16xf32> to vector<32x16xbf16>
    %c0_30 = arith.constant 0 : index
    %c24 = arith.constant 24 : index
    %61 = vector.load %arg7[%c0_30, %c24] : memref<32x40xbf16, #tpu.memory_space<vmem>>, vector<32x16xbf16>
    tpu.vector_store %arg7[%c0_30, %c24], %60 {strides = array<i32>} : memref<32x40xbf16, #tpu.memory_space<vmem>>, vector<32x16xbf16>,
    %cst_31 = arith.constant dense<0xFF800000> : vector<16xf32>
    %62 = vector.multi_reduction <maximumf>, %35, %cst_31 [0] : vector<16x16xf32> to vector<16xf32>
    %63 = vector.shape_cast %62 : vector<16xf32> to vector<1x16xf32>
    %64 = vector.broadcast %63 : vector<1x16xf32> to vector<16x16xf32>
    %65 = arith.subf %35, %64 : vector<16x16xf32>
    %66 = math.exp %65 : vector<16x16xf32>
    %67 = arith.truncf %66 : vector<16x16xf32> to vector<16x16xbf16>
    %c0_32 = arith.constant 0 : index
    %c0_33 = arith.constant 0 : index
    %68 = vector.load %arg8[%c0_32, %c0_33] : memref<16x16xbf16, #tpu.memory_space<vmem>>, vector<16x16xbf16>
    tpu.vector_store %arg8[%c0_32, %c0_33], %67 {strides = array<i32>} : memref<16x16xbf16, #tpu.memory_space<vmem>>, vector<16x16xbf16>,
    %c0_34 = arith.constant 0 : index
    %c0_35 = arith.constant 0 : index
    %69 = vector.load %arg6[%c0_34, %c0_35] : memref<3x32xf32, #tpu.memory_space<vmem>>, vector<3x32xf32>
    %70 = vector.extract_strided_slice %69 {offsets = [0, 0], sizes = [1, 32], strides = [1, 1]} : vector<3x32xf32> to vector<1x32xf32>
    %71 = arith.negf %70 : vector<1x32xf32>
    %72 = math.exp %71 : vector<1x32xf32>
    %cst_36 = arith.constant 1.000000e+00 : f32
    %73 = vector.broadcast %cst_36 : f32 to vector<1x32xf32>
    %74 = arith.addf %73, %72 : vector<1x32xf32>
    %75 = arith.divf %73, %74 : vector<1x32xf32>
    %76 = vector.extract_strided_slice %69 {offsets = [1, 0], sizes = [1, 32], strides = [1, 1]} : vector<3x32xf32> to vector<1x32xf32>
    %77 = arith.negf %76 : vector<1x32xf32>
    %78 = math.exp %77 : vector<1x32xf32>
    %cst_37 = arith.constant 1.000000e+00 : f32
    %79 = vector.broadcast %cst_37 : f32 to vector<1x32xf32>
    %80 = arith.addf %79, %78 : vector<1x32xf32>
    %81 = arith.divf %79, %80 : vector<1x32xf32>
    %82 = vector.extract_strided_slice %69 {offsets = [2, 0], sizes = [1, 32], strides = [1, 1]} : vector<3x32xf32> to vector<1x32xf32>
    %83 = arith.negf %82 : vector<1x32xf32>
    %84 = math.exp %83 : vector<1x32xf32>
    %cst_38 = arith.constant 1.000000e+00 : f32
    %85 = vector.broadcast %cst_38 : f32 to vector<1x32xf32>
    %86 = arith.addf %85, %84 : vector<1x32xf32>
    %87 = arith.divf %85, %86 : vector<1x32xf32>
    %cst_39 = arith.constant dense<0xFF800000> : vector<32xf32>
    %88 = vector.multi_reduction <maximumf>, %42, %cst_39 [0] : vector<16x32xf32> to vector<32xf32>
    %cst_40 = arith.constant 0xFF800000 : f32
    %89 = vector.broadcast %cst_40 : f32 to vector<32xf32>
    %90 = arith.maximumf %89, %88 : vector<32xf32>
    %91 = vector.shape_cast %90 : vector<32xf32> to vector<1x32xf32>
    %92 = vector.broadcast %91 : vector<1x32xf32> to vector<16x32xf32>
    %93 = arith.subf %42, %92 : vector<16x32xf32>
    %94 = math.exp %93 : vector<16x32xf32>
    %cst_41 = arith.constant dense<0.000000e+00> : vector<32xf32>
    %95 = vector.multi_reduction <add>, %94, %cst_41 [0] : vector<16x32xf32> to vector<32xf32>
    %96 = vector.shape_cast %95 : vector<32xf32> to vector<1x32xf32>
    %97 = vector.broadcast %96 : vector<1x32xf32> to vector<16x32xf32>
    %98 = arith.divf %94, %97 : vector<16x32xf32>
    %cst_42 = arith.constant 1.000000e+00 : f32
    %99 = vector.broadcast %cst_42 : f32 to vector<1x32xf32>
    %100 = arith.subf %99, %75 : vector<1x32xf32>
    %101 = vector.broadcast %100 : vector<1x32xf32> to vector<16x32xf32>
    %102 = arith.mulf %98, %101 : vector<16x32xf32>
    %103 = arith.truncf %102 : vector<16x32xf32> to vector<16x32xbf16>
    %c0_43 = arith.constant 0 : index
    %c0_44 = arith.constant 0 : index
    %104 = vector.load %arg9[%c0_43, %c0_44] : memref<24x32xbf16, #tpu.memory_space<vmem>>, vector<16x32xbf16>
    tpu.vector_store %arg9[%c0_43, %c0_44], %103 {strides = array<i32>} : memref<24x32xbf16, #tpu.memory_space<vmem>>, vector<16x32xbf16>,
    %cst_45 = arith.constant dense<0xFF800000> : vector<32xf32>
    %105 = vector.multi_reduction <maximumf>, %45, %cst_45 [0] : vector<8x32xf32> to vector<32xf32>
    %cst_46 = arith.constant 0xFF800000 : f32
    %106 = vector.broadcast %cst_46 : f32 to vector<32xf32>
    %107 = arith.maximumf %106, %105 : vector<32xf32>
    %108 = vector.shape_cast %107 : vector<32xf32> to vector<1x32xf32>
    %109 = vector.broadcast %108 : vector<1x32xf32> to vector<8x32xf32>
    %110 = arith.subf %45, %109 : vector<8x32xf32>
    %111 = math.exp %110 : vector<8x32xf32>
    %cst_47 = arith.constant dense<0.000000e+00> : vector<32xf32>
    %112 = vector.multi_reduction <add>, %111, %cst_47 [0] : vector<8x32xf32> to vector<32xf32>
    %113 = vector.shape_cast %112 : vector<32xf32> to vector<1x32xf32>
    %114 = vector.broadcast %113 : vector<1x32xf32> to vector<8x32xf32>
    %115 = arith.divf %111, %114 : vector<8x32xf32>
    %116 = vector.broadcast %75 : vector<1x32xf32> to vector<8x32xf32>
    %117 = arith.mulf %115, %116 : vector<8x32xf32>
    %118 = arith.truncf %117 : vector<8x32xf32> to vector<8x32xbf16>
    %c16_48 = arith.constant 16 : index
    %c0_49 = arith.constant 0 : index
    %119 = vector.load %arg9[%c16_48, %c0_49] : memref<24x32xbf16, #tpu.memory_space<vmem>>, vector<8x32xbf16>
    tpu.vector_store %arg9[%c16_48, %c0_49], %118 {strides = array<i32>} : memref<24x32xbf16, #tpu.memory_space<vmem>>, vector<8x32xbf16>,
    %c0_50 = arith.constant 0 : index
    %c0_51 = arith.constant 0 : index
    %120 = vector.load %arg10[%c0_50, %c0_51] : memref<2x32xf32, #tpu.memory_space<vmem>>, vector<1x32xf32>
    tpu.vector_store %arg10[%c0_50, %c0_51], %81 {strides = array<i32>} : memref<2x32xf32, #tpu.memory_space<vmem>>, vector<1x32xf32>,
    %cst_52 = arith.constant 1.000000e+00 : f32
    %121 = vector.broadcast %cst_52 : f32 to vector<1x32xf32>
    %122 = arith.subf %121, %87 : vector<1x32xf32>
    %123 = arith.subf %122, %81 : vector<1x32xf32>
    %c1 = arith.constant 1 : index
    %c0_53 = arith.constant 0 : index
    %124 = vector.load %arg10[%c1, %c0_53] : memref<2x32xf32, #tpu.memory_space<vmem>>, vector<1x32xf32>
    tpu.vector_store %arg10[%c1, %c0_53], %123 {strides = array<i32>} : memref<2x32xf32, #tpu.memory_space<vmem>>, vector<1x32xf32>,
    return
  }
  func.func @transform_0(%arg0: i32) -> (i32, i32) {
    %c0_i32 = arith.constant 0 : i32
    %c0_i32_0 = arith.constant 0 : i32
    %c0_i32_1 = arith.constant 0 : i32
    return %c0_i32, %c0_i32_0 : i32, i32
  }
  func.func @transform_1(%arg0: i32) -> (i32, i32) {
    %c0_i32 = arith.constant 0 : i32
    %c0_i32_0 = arith.constant 0 : i32
    %c0_i32_1 = arith.constant 0 : i32
    return %c0_i32, %c0_i32_0 : i32, i32
  }
  func.func @transform_2(%arg0: i32) -> (i32, i32) {
    %c0_i32 = arith.constant 0 : i32
    %c0_i32_0 = arith.constant 0 : i32
    %c0_i32_1 = arith.constant 0 : i32
    return %c0_i32, %c0_i32_0 : i32, i32
  }
  func.func @transform_3(%arg0: i32) -> (i32, i32) {
    %c0_i32 = arith.constant 0 : i32
    %c0_i32_0 = arith.constant 0 : i32
    %c0_i32_1 = arith.constant 0 : i32
    return %c0_i32, %c0_i32_0 : i32, i32
  }
  func.func @transform_4(%arg0: i32) -> (i32, i32) {
    %c0_i32 = arith.constant 0 : i32
    %c0_i32_0 = arith.constant 0 : i32
    %c0_i32_1 = arith.constant 0 : i32
    return %c0_i32, %c0_i32_0 : i32, i32
  }
  func.func @transform_5(%arg0: i32) -> (i32, i32) {
    %c0_i32 = arith.constant 0 : i32
    %c0_i32_0 = arith.constant 0 : i32
    %c0_i32_1 = arith.constant 0 : i32
    return %c0_i32, %c0_i32_0 : i32, i32
  }
  func.func @transform_6(%arg0: i32) -> (i32, i32) {
    %c0_i32 = arith.constant 0 : i32
    %c0_i32_0 = arith.constant 0 : i32
    %c0_i32_1 = arith.constant 0 : i32
    return %c0_i32, %c0_i32_0 : i32, i32
  }
  func.func @transform_7(%arg0: i32) -> (i32, i32) {
    %c0_i32 = arith.constant 0 : i32
    %c0_i32_0 = arith.constant 0 : i32
    %c0_i32_1 = arith.constant 0 : i32
    return %c0_i32, %c0_i32_0 : i32, i32
  }
  func.func @transform_8(%arg0: i32) -> (i32, i32) {
    %c0_i32 = arith.constant 0 : i32
    %c0_i32_0 = arith.constant 0 : i32
    %c0_i32_1 = arith.constant 0 : i32
    return %c0_i32, %c0_i32_0 : i32, i32
  }
  func.func @transform_9(%arg0: i32) -> (i32, i32) {
    %c0_i32 = arith.constant 0 : i32
    %c0_i32_0 = arith.constant 0 : i32
    %c0_i32_1 = arith.constant 0 : i32
    return %c0_i32, %c0_i32_0 : i32, i32
  }
}

module attributes {stable_mosaic.version = 11 : i64} {
  func.func @student_kernel(%arg0: i32, %arg1: memref<128x8xi32, #tpu.memory_space<vmem>>, %arg2: memref<128x8xf32, #tpu.memory_space<vmem>>, %arg3: memref<128x8xf32, #tpu.memory_space<vmem>>, %arg4: memref<32x40xbf16, #tpu.memory_space<vmem>>, %arg5: memref<16x16xbf16, #tpu.memory_space<vmem>>, %arg6: memref<24x32xbf16, #tpu.memory_space<vmem>>, %arg7: memref<2x32xf32, #tpu.memory_space<vmem>>, %arg8: memref<128x48xf32, #tpu.memory_space<vmem>>) attributes {dimension_semantics = [#tpu.dimension_semantics<parallel>], iteration_bounds = array<i64: 2>, scalar_prefetch = 0 : i64, scratch_operands = 0 : i64, tpu.core_type = #tpu.core_type<tc>, window_params = [{transform_indices = @transform_0, window_bounds = array<i64: 128, 8>}, {transform_indices = @transform_1, window_bounds = array<i64: 128, 8>}, {transform_indices = @transform_2, window_bounds = array<i64: 128, 8>}, {pipeline_mode = #tpu.pipeline_mode<synchronous>, transform_indices = @transform_3, window_bounds = array<i64: 32, 40>}, {pipeline_mode = #tpu.pipeline_mode<synchronous>, transform_indices = @transform_4, window_bounds = array<i64: 16, 16>}, {pipeline_mode = #tpu.pipeline_mode<synchronous>, transform_indices = @transform_5, window_bounds = array<i64: 24, 32>}, {pipeline_mode = #tpu.pipeline_mode<synchronous>, transform_indices = @transform_6, window_bounds = array<i64: 2, 32>}, {transform_indices = @transform_7, window_bounds = array<i64: 128, 48>}]} {
    %c0 = arith.constant 0 : index
    %c0_0 = arith.constant 0 : index
    %0 = vector.load %arg1[%c0, %c0_0] : memref<128x8xi32, #tpu.memory_space<vmem>>, vector<128x8xi32>
    %c0_1 = arith.constant 0 : index
    %c0_2 = arith.constant 0 : index
    %1 = vector.load %arg2[%c0_1, %c0_2] : memref<128x8xf32, #tpu.memory_space<vmem>>, vector<128x8xf32>
    %c0_3 = arith.constant 0 : index
    %c0_4 = arith.constant 0 : index
    %2 = vector.load %arg3[%c0_3, %c0_4] : memref<128x8xf32, #tpu.memory_space<vmem>>, vector<128x8xf32>
    %3 = tpu.iota {dimensions = array<i32: 1>} : vector<128x32xi32>
    %cst = arith.constant 0.000000e+00 : f32
    %4 = vector.broadcast %cst : f32 to vector<128x32xf32>
    %cst_5 = arith.constant 0.000000e+00 : f32
    %5 = vector.broadcast %cst_5 : f32 to vector<128x32xf32>
    %6 = vector.extract_strided_slice %0 {offsets = [0, 0], sizes = [128, 1], strides = [1, 1]} : vector<128x8xi32> to vector<128x1xi32>
    %7 = vector.broadcast %6 : vector<128x1xi32> to vector<128x32xi32>
    %8 = arith.cmpi eq, %7, %3 : vector<128x32xi32>
    %9 = vector.extract_strided_slice %1 {offsets = [0, 0], sizes = [128, 1], strides = [1, 1]} : vector<128x8xf32> to vector<128x1xf32>
    %cst_6 = arith.constant 0.000000e+00 : f32
    %10 = vector.shape_cast %9 : vector<128x1xf32> to vector<128x1xf32>
    %11 = vector.broadcast %10 : vector<128x1xf32> to vector<128x32xf32>
    %12 = vector.broadcast %cst_6 : f32 to vector<128x32xf32>
    %13 = arith.select %8, %11, %12 : vector<128x32xi1>, vector<128x32xf32>
    %14 = arith.addf %4, %13 : vector<128x32xf32>
    %15 = vector.extract_strided_slice %2 {offsets = [0, 0], sizes = [128, 1], strides = [1, 1]} : vector<128x8xf32> to vector<128x1xf32>
    %cst_7 = arith.constant 0.000000e+00 : f32
    %16 = vector.shape_cast %15 : vector<128x1xf32> to vector<128x1xf32>
    %17 = vector.broadcast %16 : vector<128x1xf32> to vector<128x32xf32>
    %18 = vector.broadcast %cst_7 : f32 to vector<128x32xf32>
    %19 = arith.select %8, %17, %18 : vector<128x32xi1>, vector<128x32xf32>
    %20 = arith.addf %5, %19 : vector<128x32xf32>
    %21 = vector.extract_strided_slice %0 {offsets = [0, 1], sizes = [128, 1], strides = [1, 1]} : vector<128x8xi32> to vector<128x1xi32>
    %22 = vector.broadcast %21 : vector<128x1xi32> to vector<128x32xi32>
    %23 = arith.cmpi eq, %22, %3 : vector<128x32xi32>
    %24 = vector.extract_strided_slice %1 {offsets = [0, 1], sizes = [128, 1], strides = [1, 1]} : vector<128x8xf32> to vector<128x1xf32>
    %cst_8 = arith.constant 0.000000e+00 : f32
    %25 = vector.shape_cast %24 : vector<128x1xf32> to vector<128x1xf32>
    %26 = vector.broadcast %25 : vector<128x1xf32> to vector<128x32xf32>
    %27 = vector.broadcast %cst_8 : f32 to vector<128x32xf32>
    %28 = arith.select %23, %26, %27 : vector<128x32xi1>, vector<128x32xf32>
    %29 = arith.addf %14, %28 : vector<128x32xf32>
    %30 = vector.extract_strided_slice %2 {offsets = [0, 1], sizes = [128, 1], strides = [1, 1]} : vector<128x8xf32> to vector<128x1xf32>
    %cst_9 = arith.constant 0.000000e+00 : f32
    %31 = vector.shape_cast %30 : vector<128x1xf32> to vector<128x1xf32>
    %32 = vector.broadcast %31 : vector<128x1xf32> to vector<128x32xf32>
    %33 = vector.broadcast %cst_9 : f32 to vector<128x32xf32>
    %34 = arith.select %23, %32, %33 : vector<128x32xi1>, vector<128x32xf32>
    %35 = arith.addf %20, %34 : vector<128x32xf32>
    %36 = vector.extract_strided_slice %0 {offsets = [0, 2], sizes = [128, 1], strides = [1, 1]} : vector<128x8xi32> to vector<128x1xi32>
    %37 = vector.broadcast %36 : vector<128x1xi32> to vector<128x32xi32>
    %38 = arith.cmpi eq, %37, %3 : vector<128x32xi32>
    %39 = vector.extract_strided_slice %1 {offsets = [0, 2], sizes = [128, 1], strides = [1, 1]} : vector<128x8xf32> to vector<128x1xf32>
    %cst_10 = arith.constant 0.000000e+00 : f32
    %40 = vector.shape_cast %39 : vector<128x1xf32> to vector<128x1xf32>
    %41 = vector.broadcast %40 : vector<128x1xf32> to vector<128x32xf32>
    %42 = vector.broadcast %cst_10 : f32 to vector<128x32xf32>
    %43 = arith.select %38, %41, %42 : vector<128x32xi1>, vector<128x32xf32>
    %44 = arith.addf %29, %43 : vector<128x32xf32>
    %45 = vector.extract_strided_slice %2 {offsets = [0, 2], sizes = [128, 1], strides = [1, 1]} : vector<128x8xf32> to vector<128x1xf32>
    %cst_11 = arith.constant 0.000000e+00 : f32
    %46 = vector.shape_cast %45 : vector<128x1xf32> to vector<128x1xf32>
    %47 = vector.broadcast %46 : vector<128x1xf32> to vector<128x32xf32>
    %48 = vector.broadcast %cst_11 : f32 to vector<128x32xf32>
    %49 = arith.select %38, %47, %48 : vector<128x32xi1>, vector<128x32xf32>
    %50 = arith.addf %35, %49 : vector<128x32xf32>
    %51 = vector.extract_strided_slice %0 {offsets = [0, 3], sizes = [128, 1], strides = [1, 1]} : vector<128x8xi32> to vector<128x1xi32>
    %52 = vector.broadcast %51 : vector<128x1xi32> to vector<128x32xi32>
    %53 = arith.cmpi eq, %52, %3 : vector<128x32xi32>
    %54 = vector.extract_strided_slice %1 {offsets = [0, 3], sizes = [128, 1], strides = [1, 1]} : vector<128x8xf32> to vector<128x1xf32>
    %cst_12 = arith.constant 0.000000e+00 : f32
    %55 = vector.shape_cast %54 : vector<128x1xf32> to vector<128x1xf32>
    %56 = vector.broadcast %55 : vector<128x1xf32> to vector<128x32xf32>
    %57 = vector.broadcast %cst_12 : f32 to vector<128x32xf32>
    %58 = arith.select %53, %56, %57 : vector<128x32xi1>, vector<128x32xf32>
    %59 = arith.addf %44, %58 : vector<128x32xf32>
    %60 = vector.extract_strided_slice %2 {offsets = [0, 3], sizes = [128, 1], strides = [1, 1]} : vector<128x8xf32> to vector<128x1xf32>
    %cst_13 = arith.constant 0.000000e+00 : f32
    %61 = vector.shape_cast %60 : vector<128x1xf32> to vector<128x1xf32>
    %62 = vector.broadcast %61 : vector<128x1xf32> to vector<128x32xf32>
    %63 = vector.broadcast %cst_13 : f32 to vector<128x32xf32>
    %64 = arith.select %53, %62, %63 : vector<128x32xi1>, vector<128x32xf32>
    %65 = arith.addf %50, %64 : vector<128x32xf32>
    %66 = vector.extract_strided_slice %0 {offsets = [0, 4], sizes = [128, 1], strides = [1, 1]} : vector<128x8xi32> to vector<128x1xi32>
    %67 = vector.broadcast %66 : vector<128x1xi32> to vector<128x32xi32>
    %68 = arith.cmpi eq, %67, %3 : vector<128x32xi32>
    %69 = vector.extract_strided_slice %1 {offsets = [0, 4], sizes = [128, 1], strides = [1, 1]} : vector<128x8xf32> to vector<128x1xf32>
    %cst_14 = arith.constant 0.000000e+00 : f32
    %70 = vector.shape_cast %69 : vector<128x1xf32> to vector<128x1xf32>
    %71 = vector.broadcast %70 : vector<128x1xf32> to vector<128x32xf32>
    %72 = vector.broadcast %cst_14 : f32 to vector<128x32xf32>
    %73 = arith.select %68, %71, %72 : vector<128x32xi1>, vector<128x32xf32>
    %74 = arith.addf %59, %73 : vector<128x32xf32>
    %75 = vector.extract_strided_slice %2 {offsets = [0, 4], sizes = [128, 1], strides = [1, 1]} : vector<128x8xf32> to vector<128x1xf32>
    %cst_15 = arith.constant 0.000000e+00 : f32
    %76 = vector.shape_cast %75 : vector<128x1xf32> to vector<128x1xf32>
    %77 = vector.broadcast %76 : vector<128x1xf32> to vector<128x32xf32>
    %78 = vector.broadcast %cst_15 : f32 to vector<128x32xf32>
    %79 = arith.select %68, %77, %78 : vector<128x32xi1>, vector<128x32xf32>
    %80 = arith.addf %65, %79 : vector<128x32xf32>
    %81 = vector.extract_strided_slice %0 {offsets = [0, 5], sizes = [128, 1], strides = [1, 1]} : vector<128x8xi32> to vector<128x1xi32>
    %82 = vector.broadcast %81 : vector<128x1xi32> to vector<128x32xi32>
    %83 = arith.cmpi eq, %82, %3 : vector<128x32xi32>
    %84 = vector.extract_strided_slice %1 {offsets = [0, 5], sizes = [128, 1], strides = [1, 1]} : vector<128x8xf32> to vector<128x1xf32>
    %cst_16 = arith.constant 0.000000e+00 : f32
    %85 = vector.shape_cast %84 : vector<128x1xf32> to vector<128x1xf32>
    %86 = vector.broadcast %85 : vector<128x1xf32> to vector<128x32xf32>
    %87 = vector.broadcast %cst_16 : f32 to vector<128x32xf32>
    %88 = arith.select %83, %86, %87 : vector<128x32xi1>, vector<128x32xf32>
    %89 = arith.addf %74, %88 : vector<128x32xf32>
    %90 = vector.extract_strided_slice %2 {offsets = [0, 5], sizes = [128, 1], strides = [1, 1]} : vector<128x8xf32> to vector<128x1xf32>
    %cst_17 = arith.constant 0.000000e+00 : f32
    %91 = vector.shape_cast %90 : vector<128x1xf32> to vector<128x1xf32>
    %92 = vector.broadcast %91 : vector<128x1xf32> to vector<128x32xf32>
    %93 = vector.broadcast %cst_17 : f32 to vector<128x32xf32>
    %94 = arith.select %83, %92, %93 : vector<128x32xi1>, vector<128x32xf32>
    %95 = arith.addf %80, %94 : vector<128x32xf32>
    %96 = vector.extract_strided_slice %0 {offsets = [0, 6], sizes = [128, 1], strides = [1, 1]} : vector<128x8xi32> to vector<128x1xi32>
    %97 = vector.broadcast %96 : vector<128x1xi32> to vector<128x32xi32>
    %98 = arith.cmpi eq, %97, %3 : vector<128x32xi32>
    %99 = vector.extract_strided_slice %1 {offsets = [0, 6], sizes = [128, 1], strides = [1, 1]} : vector<128x8xf32> to vector<128x1xf32>
    %cst_18 = arith.constant 0.000000e+00 : f32
    %100 = vector.shape_cast %99 : vector<128x1xf32> to vector<128x1xf32>
    %101 = vector.broadcast %100 : vector<128x1xf32> to vector<128x32xf32>
    %102 = vector.broadcast %cst_18 : f32 to vector<128x32xf32>
    %103 = arith.select %98, %101, %102 : vector<128x32xi1>, vector<128x32xf32>
    %104 = arith.addf %89, %103 : vector<128x32xf32>
    %105 = vector.extract_strided_slice %2 {offsets = [0, 6], sizes = [128, 1], strides = [1, 1]} : vector<128x8xf32> to vector<128x1xf32>
    %cst_19 = arith.constant 0.000000e+00 : f32
    %106 = vector.shape_cast %105 : vector<128x1xf32> to vector<128x1xf32>
    %107 = vector.broadcast %106 : vector<128x1xf32> to vector<128x32xf32>
    %108 = vector.broadcast %cst_19 : f32 to vector<128x32xf32>
    %109 = arith.select %98, %107, %108 : vector<128x32xi1>, vector<128x32xf32>
    %110 = arith.addf %95, %109 : vector<128x32xf32>
    %111 = vector.extract_strided_slice %0 {offsets = [0, 7], sizes = [128, 1], strides = [1, 1]} : vector<128x8xi32> to vector<128x1xi32>
    %112 = vector.broadcast %111 : vector<128x1xi32> to vector<128x32xi32>
    %113 = arith.cmpi eq, %112, %3 : vector<128x32xi32>
    %114 = vector.extract_strided_slice %1 {offsets = [0, 7], sizes = [128, 1], strides = [1, 1]} : vector<128x8xf32> to vector<128x1xf32>
    %cst_20 = arith.constant 0.000000e+00 : f32
    %115 = vector.shape_cast %114 : vector<128x1xf32> to vector<128x1xf32>
    %116 = vector.broadcast %115 : vector<128x1xf32> to vector<128x32xf32>
    %117 = vector.broadcast %cst_20 : f32 to vector<128x32xf32>
    %118 = arith.select %113, %116, %117 : vector<128x32xi1>, vector<128x32xf32>
    %119 = arith.addf %104, %118 : vector<128x32xf32>
    %120 = vector.extract_strided_slice %2 {offsets = [0, 7], sizes = [128, 1], strides = [1, 1]} : vector<128x8xf32> to vector<128x1xf32>
    %cst_21 = arith.constant 0.000000e+00 : f32
    %121 = vector.shape_cast %120 : vector<128x1xf32> to vector<128x1xf32>
    %122 = vector.broadcast %121 : vector<128x1xf32> to vector<128x32xf32>
    %123 = vector.broadcast %cst_21 : f32 to vector<128x32xf32>
    %124 = arith.select %113, %122, %123 : vector<128x32xi1>, vector<128x32xf32>
    %125 = arith.addf %110, %124 : vector<128x32xf32>
    %126 = tpu.concatenate %119, %125 in 0 : vector<128x32xf32>, vector<128x32xf32> -> vector<256x32xf32>
    %127 = arith.truncf %126 : vector<256x32xf32> to vector<256x32xbf16>
    %c0_22 = arith.constant 0 : index
    %c0_23 = arith.constant 0 : index
    %128 = vector.load %arg4[%c0_22, %c0_23] : memref<32x40xbf16, #tpu.memory_space<vmem>>, vector<32x40xbf16>
    %cst_24 = arith.constant dense<0.000000e+00> : vector<256x40xf32>
    %129 = tpu.matmul %127, %128, %cst_24 {dimension_numbers = #tpu.dot_dimension_numbers<[1], [0], [0], [1], [0, 0, 1, 1], [], []>} : vector<256x32xbf16>, vector<32x40xbf16>, vector<256x40xf32> -> vector<256x40xf32>
    %130 = vector.extract_strided_slice %129 {offsets = [0, 0], sizes = [128, 16], strides = [1, 1]} : vector<256x40xf32> to vector<128x16xf32>
    %131 = vector.extract_strided_slice %129 {offsets = [128, 0], sizes = [128, 16], strides = [1, 1]} : vector<256x40xf32> to vector<128x16xf32>
    %132 = vector.extract_strided_slice %129 {offsets = [0, 16], sizes = [128, 8], strides = [1, 1]} : vector<256x40xf32> to vector<128x8xf32>
    %133 = vector.extract_strided_slice %129 {offsets = [128, 16], sizes = [128, 8], strides = [1, 1]} : vector<256x40xf32> to vector<128x8xf32>
    %134 = vector.extract_strided_slice %129 {offsets = [128, 24], sizes = [128, 16], strides = [1, 1]} : vector<256x40xf32> to vector<128x16xf32>
    %cst_25 = arith.constant 1.000000e-30 : f32
    %135 = vector.broadcast %cst_25 : f32 to vector<128x16xf32>
    %136 = arith.maximumf %131, %135 : vector<128x16xf32>
    %137 = arith.divf %130, %136 : vector<128x16xf32>
    %cst_26 = arith.constant 1.000000e-30 : f32
    %138 = vector.broadcast %cst_26 : f32 to vector<128x8xf32>
    %139 = arith.maximumf %133, %138 : vector<128x8xf32>
    %140 = arith.divf %132, %139 : vector<128x8xf32>
    %cst_27 = arith.constant 0.000000e+00 : f32
    %141 = vector.broadcast %cst_27 : f32 to vector<128x16xf32>
    %142 = arith.cmpf one, %134, %141 : vector<128x16xf32>
    %143 = arith.extui %142 : vector<128x16xi1> to vector<128x16xi32>
    %144 = arith.sitofp %143 : vector<128x16xi32> to vector<128x16xf32>
    %145 = arith.mulf %137, %144 : vector<128x16xf32>
    %146 = tpu.concatenate %145, %144 in 0 : vector<128x16xf32>, vector<128x16xf32> -> vector<256x16xf32>
    %147 = arith.truncf %146 : vector<256x16xf32> to vector<256x16xbf16>
    %c0_28 = arith.constant 0 : index
    %c0_29 = arith.constant 0 : index
    %148 = vector.load %arg5[%c0_28, %c0_29] : memref<16x16xbf16, #tpu.memory_space<vmem>>, vector<16x16xbf16>
    %cst_30 = arith.constant dense<0.000000e+00> : vector<256x16xf32>
    %149 = tpu.matmul %147, %148, %cst_30 {dimension_numbers = #tpu.dot_dimension_numbers<[1], [0], [0], [1], [0, 0, 1, 1], [], []>} : vector<256x16xbf16>, vector<16x16xbf16>, vector<256x16xf32> -> vector<256x16xf32>
    %150 = vector.extract_strided_slice %149 {offsets = [0, 0], sizes = [128, 16], strides = [1, 1]} : vector<256x16xf32> to vector<128x16xf32>
    %151 = vector.extract_strided_slice %149 {offsets = [128, 0], sizes = [128, 16], strides = [1, 1]} : vector<256x16xf32> to vector<128x16xf32>
    %cst_31 = arith.constant 1.000000e-30 : f32
    %152 = vector.broadcast %cst_31 : f32 to vector<128x16xf32>
    %153 = arith.maximumf %151, %152 : vector<128x16xf32>
    %154 = arith.divf %150, %153 : vector<128x16xf32>
    %155 = tpu.concatenate %154, %140 in 1 : vector<128x16xf32>, vector<128x8xf32> -> vector<128x24xf32>
    %156 = arith.truncf %155 : vector<128x24xf32> to vector<128x24xbf16>
    %c0_32 = arith.constant 0 : index
    %c0_33 = arith.constant 0 : index
    %157 = vector.load %arg6[%c0_32, %c0_33] : memref<24x32xbf16, #tpu.memory_space<vmem>>, vector<24x32xbf16>
    %cst_34 = arith.constant dense<0.000000e+00> : vector<128x32xf32>
    %158 = tpu.matmul %156, %157, %cst_34 {dimension_numbers = #tpu.dot_dimension_numbers<[1], [0], [0], [1], [0, 0, 1, 1], [], []>} : vector<128x24xbf16>, vector<24x32xbf16>, vector<128x32xf32> -> vector<128x32xf32>
    %cst_35 = arith.constant 9.99999993E-9 : f32
    %cst_36 = arith.constant 1.000000e+00 : f32
    %159 = vector.broadcast %cst_35 : f32 to vector<128x32xf32>
    %160 = arith.maximumf %159, %158 : vector<128x32xf32>
    %161 = vector.broadcast %cst_36 : f32 to vector<128x32xf32>
    %162 = arith.minimumf %161, %160 : vector<128x32xf32>
    %c0_37 = arith.constant 0 : index
    %c0_38 = arith.constant 0 : index
    %163 = vector.load %arg7[%c0_37, %c0_38] : memref<2x32xf32, #tpu.memory_space<vmem>>, vector<2x32xf32>
    %164 = vector.extract_strided_slice %163 {offsets = [0, 0], sizes = [1, 32], strides = [1, 1]} : vector<2x32xf32> to vector<1x32xf32>
    %165 = vector.extract_strided_slice %163 {offsets = [1, 0], sizes = [1, 32], strides = [1, 1]} : vector<2x32xf32> to vector<1x32xf32>
    %166 = vector.broadcast %165 : vector<1x32xf32> to vector<128x32xf32>
    %167 = arith.mulf %166, %162 : vector<128x32xf32>
    %168 = vector.broadcast %164 : vector<1x32xf32> to vector<128x32xf32>
    %169 = arith.addf %168, %167 : vector<128x32xf32>
    %c0_39 = arith.constant 0 : index
    %c0_40 = arith.constant 0 : index
    %170 = vector.load %arg8[%c0_39, %c0_40] : memref<128x48xf32, #tpu.memory_space<vmem>>, vector<128x16xf32>
    tpu.vector_store %arg8[%c0_39, %c0_40], %154 {strides = array<i32>} : memref<128x48xf32, #tpu.memory_space<vmem>>, vector<128x16xf32>,
    %c0_41 = arith.constant 0 : index
    %c16 = arith.constant 16 : index
    %171 = vector.load %arg8[%c0_41, %c16] : memref<128x48xf32, #tpu.memory_space<vmem>>, vector<128x32xf32>
    tpu.vector_store %arg8[%c0_41, %c16], %169 {strides = array<i32>} : memref<128x48xf32, #tpu.memory_space<vmem>>, vector<128x32xf32>,
    return
  }
  func.func @transform_0(%arg0: i32) -> (i32, i32) {
    %c0_i32 = arith.constant 0 : i32
    %c0_i32_0 = arith.constant 0 : i32
    return %arg0, %c0_i32 : i32, i32
  }
  func.func @transform_1(%arg0: i32) -> (i32, i32) {
    %c0_i32 = arith.constant 0 : i32
    %c0_i32_0 = arith.constant 0 : i32
    return %arg0, %c0_i32 : i32, i32
  }
  func.func @transform_2(%arg0: i32) -> (i32, i32) {
    %c0_i32 = arith.constant 0 : i32
    %c0_i32_0 = arith.constant 0 : i32
    return %arg0, %c0_i32 : i32, i32
  }
  func.func @transform_3(%arg0: i32) -> (i32, i32) {
    %c0_i32 = arith.constant 0 : i32
    %c0_i32_0 = arith.constant 0 : i32
    %c0_i32_1 = arith.constant 0 : i32
    return %c0_i32, %c0_i32_0 : i32, i32
  }
  func.func @transform_4(%arg0: i32) -> (i32, i32) {
    %c0_i32 = arith.constant 0 : i32
    %c0_i32_0 = arith.constant 0 : i32
    %c0_i32_1 = arith.constant 0 : i32
    return %c0_i32, %c0_i32_0 : i32, i32
  }
  func.func @transform_5(%arg0: i32) -> (i32, i32) {
    %c0_i32 = arith.constant 0 : i32
    %c0_i32_0 = arith.constant 0 : i32
    %c0_i32_1 = arith.constant 0 : i32
    return %c0_i32, %c0_i32_0 : i32, i32
  }
  func.func @transform_6(%arg0: i32) -> (i32, i32) {
    %c0_i32 = arith.constant 0 : i32
    %c0_i32_0 = arith.constant 0 : i32
    %c0_i32_1 = arith.constant 0 : i32
    return %c0_i32, %c0_i32_0 : i32, i32
  }
  func.func @transform_7(%arg0: i32) -> (i32, i32) {
    %c0_i32 = arith.constant 0 : i32
    %c0_i32_0 = arith.constant 0 : i32
    return %arg0, %c0_i32 : i32, i32
  }
}

</mosaic_0001>

<bundles_post_ra>
// kernel: mul.1
= control target key start
LH: loop header
LB: loop body
LE: loop exit
PB: predicated region body
PF: predicated region fallthrough
CT: control target
= control target key end

     0   :  { %3 = vsyncpa [#allocation1], 0  ;;  %s62_s11 = smov [#allocation0]   ;;  %s93_s0 = inlined_call_operand.hbm [shape: f32[200,8], index: 0, kind: input, shape index: {}]   ;;  %s94_s1 = inlined_call_operand.vmem [shape: f32[200,8], index: 1, kind: input, shape index: {}]   ;;  %s95_s2 = inlined_call_operand.vmem [shape: f32[200,8], index: 2, kind: output, shape index: {}]  }
   0x1   :  { %s7_s0 = sshll.u32 %s93_s0, 4  ;;  %s9_s12 = sshll.u32 %s62_s11, 4  ;;  %s8_s0 = int_to_ptr.hbm [resolvable:$true] %s7_s0  ;;  %s10_s12 = int_to_ptr.vmem [resolvable:$true] %s9_s12 }
   0x2   :  { %12 = dma.hbm_to_vmem [thread:$0]  %s8_s0, 256, %s10_s12, [#allocation1]  }
   0x3   :  { %60 = dma.done.wait [#allocation1], 256  }
   0x4   :  { %61 = vsyncadd [#allocation1], 4294967040  ;;  %v15_v0 = vld [vmem:[#allocation0] sm:$0xff]  ;;  %v23_v2 = vld [vmem:[#allocation0 + $0x8] sm:$0xff] }
   0x5   :  { %v16_v1 = vld [vmem:[%s94_s1] sm:$0xff]  ;;  %v33_v4 = vld [vmem:[%s94_s1 + $0x8] sm:$0xff] }
   0x6   :  { %v19_v3 = vmul.f32 %v16_v1, %v15_v0  ;;  %v28_v5 = vmul.f32 %v33_v4, %v23_v2 }
   0x8   :  { %21 = vst [vmem:[%s95_s2] sm:$0xff] %v19_v3 }
   0x9   :  { %34 = vst [vmem:[%s95_s2 + $0x8] sm:$0xff] %v28_v5 }
   0xa   :  { %32 = vsyncpa [#allocation1], 1 }

// kernel: _lambda_.2
= control target key start
LH: loop header
LB: loop body
LE: loop exit
PB: predicated region body
PF: predicated region fallthrough
CT: control target
= control target key end

     0   :  { %vm44_vm0 = vcmask 130048   ;;  %s652_s24 = smov 24   ;;  %s1058_s2 = inlined_call_operand.vmem [shape: f32[8,16], index: 2, kind: input, shape index: {}]   ;;  %s1059_s1 = inlined_call_operand.vmem [shape: f32[16,16], index: 1, kind: input, shape index: {}]   ;;  %s1060_s0 = inlined_call_operand.vmem [shape: f32[32,16], index: 0, kind: input, shape index: {}]   ;;  %s1061_s3 = inlined_call_operand.vmem [shape: f32[32,16], index: 3, kind: input, shape index: {}]   ;;  %s1062_s4 = inlined_call_operand.vmem [shape: f32[16,32], index: 4, kind: input, shape index: {}]   ;;  %s1063_s5 = inlined_call_operand.vmem [shape: f32[3,32], index: 5, kind: input, shape index: {}]   ;;  %s1064_s7 = inlined_call_operand.vmem [shape: bf16[16,16], index: 7, kind: output, shape index: {1}]   ;;  %s1065_s9 = inlined_call_operand.vmem [shape: f32[2,32], index: 9, kind: output, shape index: {3}]   ;;  %s1066_s6 = inlined_call_operand.vmem [shape: bf16[32,40], index: 6, kind: output, shape index: {0}]   ;;  %s1067_s8 = inlined_call_operand.vmem [shape: bf16[24,32], index: 8, kind: output, shape index: {2}]  }
   0x1   :  { %v707_v0 = vld [vmem:[%s1058_s2] sm:$0xff]  ;;  %v712_v1 = vld [vmem:[%s1059_s1 + $0x8] sm:$0xff]  ;;  %v717_v2 = vld [vmem:[%s1060_s0 + $0x18] sm:$0xff] }
   0x2   :  { %v131_v3 = vmul.f32 %v707_v0, %v707_v0  ;;  %v102_v4 = vmul.f32 %v712_v1, %v712_v1  ;;  %v43_v5 = vmul.f32 %v717_v2, %v717_v2  ;;  %v728_v6 = vld [vmem:[%s1060_s0 + $0x8] sm:$0xff]  ;;  %v733_v7 = vld [vmem:[%s1060_s0] sm:$0xff]  ;;  %v741_v11 = vld [vmem:[%s1060_s0 + $0x10] sm:$0xff] }
   0x3   :  { %v41_v12 = vmul.f32 %v728_v6, %v728_v6  ;;  %v40_v13 = vmul.f32 %v733_v7, %v733_v7  ;;  %v42_v14 = vmul.f32 %v741_v11, %v741_v11  ;;  %v755_v18 = vld [vmem:[%s1059_s1] sm:$0xff] }
   0x4   :  { %v132_v8 = vsel %vm44_vm0, %v131_v3, 0.0  ;;  %v106_v9 = vsel %vm44_vm0, %v102_v4, 0.0  ;;  %v54_v10 = vsel %vm44_vm0, %v43_v5, 0.0  ;;  %v101_v19 = vmul.f32 %v755_v18, %v755_v18 }
   0x5   :  { %133 = vadd.xlane.f32.xlu0 %v132_v8  ;;  %107 = vadd.xlane.f32.xlu2 %v106_v9  ;;  %v48_v15 = vsel %vm44_vm0, %v41_v12, 0.0  ;;  %v45_v16 = vsel %vm44_vm0, %v40_v13, 0.0  ;;  %v51_v17 = vsel %vm44_vm0, %v42_v14, 0.0 }
   0x6   :  { %55 = vadd.xlane.f32.xlu1 %v54_v10  ;;  %v103_v20 = vsel %vm44_vm0, %v101_v19, 0.0 }
   0xd   :  { %49 = vadd.xlane.f32.xlu2 %v48_v15  ;;  %46 = vadd.xlane.f32.xlu0 %v45_v16 }
   0xe   :  { %52 = vadd.xlane.f32.xlu1 %v51_v17 }
  0x15   :  { %104 = vadd.xlane.f32.xlu0 %v103_v20 }
  0x78   :  { %v134_v21 = vpop.xlane.xlu0 %133  ;;  %v108_v22 = vpop.xlane.xlu2 %107 }
  0x79   :  { %604 = vrsqrt.f32 %v134_v21  ;;  %v56_v23 = vpop.xlane.xlu1 %55  ;;  %vm141_vm4 = vweird.f32 %v134_v21  ;;  %vm125_vm5 = vweird.f32 %v108_v22 }
  0x7a   :  { %606 = vrsqrt.f32 %v108_v22  ;;  %vm93_vm2 = vweird.f32 %v56_v23 }
  0x7b   :  { %608 = vrsqrt.f32 %v56_v23 }
  0x7f   :  { %v605_v24 = vpop.eup %604 }
  0x80   :  { %v607_v25 = vpop.eup %606  ;;  %v136_v26 = vmul.f32 %v605_v24, %v134_v21  ;;  %v760_v27 = vpop.xlane.xlu2 %49  ;;  %vm142_vm1 = vweird.f32 %v605_v24 }
  0x81   :  { %v762_v28 = vpop.xlane.xlu0 %46  ;;  %v609_v29 = vpop.eup %608  ;;  %v120_v30 = vmul.f32 %v607_v25, %v108_v22  ;;  %610 = vrsqrt.f32 %v760_v27  ;;  %vm126_vm6 = vweird.f32 %v607_v25  ;;  %vm768_vm7 = vmor %vm141_vm4, %vm142_vm1  ;;  %vm73_vm14 = vweird.f32 %v760_v27 }
  0x82   :  { %v53_v31 = vpop.xlane.xlu1 %52  ;;  %v137_v32 = vmul.f32 %v605_v24, %v136_v26  ;;  %v88_v33 = vmul.f32 %v609_v29, %v56_v23  ;;  %vm94_vm3 = vweird.f32 %v609_v29  ;;  %vm127_vm9 = vmor %vm125_vm5, %vm126_vm6  ;;  %vm63_vm1 = vweird.f32 %v762_v28 }
  0x83   :  { %612 = vrsqrt.f32 %v53_v31  ;;  %v121_v34 = vmul.f32 %v607_v25, %v120_v30  ;;  %vm775_vm8 = vmor %vm93_vm2, %vm94_vm3  ;;  %vm83_vm10 = vweird.f32 %v53_v31  ;;  %v38_v30 = vld [vmem:[%s1062_s4] sm:$0xff] }
  0x84   :  { %614 = vrsqrt.f32 %v762_v28  ;;  %v138_v35 = vmul.f32 0.5, %v137_v32  ;;  %v89_v36 = vmul.f32 %v609_v29, %v88_v33 }
  0x85   :  { %v122_v37 = vmul.f32 0.5, %v121_v34 }
  0x86   :  { %v139_v38 = vsub.f32 1.5, %v138_v35  ;;  %v90_v39 = vmul.f32 0.5, %v89_v36  ;;  %v39_v36 = vld [vmem:[%s1062_s4 + $0x8] sm:$0xff] }
  0x87   :  { %v766_v40 = vpop.eup %610  ;;  %v123_v41 = vsub.f32 1.5, %v122_v37 }
  0x88   :  { %v91_v44 = vsub.f32 1.5, %v90_v39  ;;  %v68_v45 = vmul.f32 %v766_v40, %v760_v27  ;;  %v140_v47 = vmul.f32 %v605_v24, %v139_v38  ;;  %vm74_vm15 = vweird.f32 %v766_v40 }
  0x89   :  { %v613_v42 = vpop.eup %612  ;;  %v105_v46 = vpop.xlane.xlu0 %104  ;;  %v124_v49 = vmul.f32 %v607_v25, %v123_v41  ;;  %vm75_vm4 = vmor %vm73_vm14, %vm74_vm15  ;;  %v445_v41 = vld [vmem:[%s1063_s5] sm:$0x7] }
  0x8a   :  { %v615_v48 = vpop.eup %614  ;;  %v78_v51 = vmul.f32 %v613_v42, %v53_v31  ;;  %616 = vrsqrt.f32 %v105_v46  ;;  %v92_v52 = vmul.f32 %v609_v29, %v91_v44  ;;  %v69_v53 = vmul.f32 %v766_v40, %v68_v45 }
  0x8b   :  { %v58_v54 = vmul.f32 %v615_v48, %v762_v28  ;;  %v128_v55 = vsel %vm127_vm9, %v607_v25, %v124_v49  ;;  %v144_v57 = vsel %vm768_vm7, %v605_v24, %v140_v47  ;;  %vm84_vm11 = vweird.f32 %v613_v42 }
  0x8c   :  { %v79_v56 = vmul.f32 %v613_v42, %v78_v51  ;;  %v96_v58 = vsel %vm775_vm8, %v609_v29, %v92_v52  ;;  %v70_v59 = vmul.f32 0.5, %v69_v53  ;;  %v130_v61 = vmul.f32 %v128_v55, %v712_v1  ;;  %vm793_vm12 = vmor %vm83_vm10, %vm84_vm11  ;;  %v833_v29 = vld [vmem:[%s1061_s3] sm:$0xff] }
  0x8d   :  { %v59_v60 = vmul.f32 %v615_v48, %v58_v54  ;;  %v145_v63 = vmul.f32 %v144_v57, %v707_v0  ;;  %v100_v3 = vmul.f32 %v96_v58, %v717_v2  ;;  %vm64_vm13 = vweird.f32 %v615_v48 }
  0x8e   :  { %v80_v62 = vmul.f32 0.5, %v79_v56  ;;  %v71_v4 = vsub.f32 1.5, %v70_v59  ;;  %575 = vmatpush.xpose.msk.msra.mxu0 %vm44_vm0, %v130_v61  ;;  %586 = vmatpush.xpose.msk.msra.mxu2 %vm44_vm0, %v130_v61  ;;  %vm65_vm2 = vmor %vm63_vm1, %vm64_vm13  ;;  %vm115_vm3 = vweird.f32 %v105_v46  ;;  %v401_v32 = vpack.c.bf16 %v833_v29, %v833_v29 }
  0x8f   :  { %v60_v5 = vmul.f32 0.5, %v59_v60  ;;  %581 = vmatpush.xpose.msk.msra.mxu1 %vm44_vm0, %v145_v63  ;;  %590 = vmatpush.xpose.msk.msra.mxu3 %vm44_vm0, %v100_v3  ;;  %vm266_vm7 = vcmp.eq.f32.partialorder %v38_v30, 0.0  ;;  %vm350_vm8 = vcmask 64512   ;;  %vm465_vm9 = vcmask 261120  }
  0x90   :  { %v617_v8 = vpop.eup %616  ;;  %v81_v9 = vsub.f32 1.5, %v80_v62  ;;  %v72_v12 = vmul.f32 %v766_v40, %v71_v4  ;;  %409 = vrot.lane.b32.xlu1 %v401_v32, %s652_s24  ;;  %vm267_vm10 = vcmp.eq.f32.partialorder %v39_v36, 0.0  ;;  %vm146_vm11 = vcmp.eq.f32.partialorder %v833_v29, 0.0  ;;  %v888_v4 = vld [vmem:[%s1061_s3 + $0x10] sm:$0xff] }
  0x91   :  { %v61_v0 = vsub.f32 1.5, %v60_v5  ;;  %v110_v2 = vmul.f32 %v617_v8, %v105_v46  ;;  %vm116_vm5 = vweird.f32 %v617_v8  ;;  %v601_v46 = vmul.f32 -1.442695, %v445_v41 }
  0x92   :  { %v82_v10 = vmul.f32 %v613_v42, %v81_v9  ;;  %v76_v20 = vsel %vm75_vm4, %v766_v40, %v72_v12  ;;  %vm117_vm6 = vmor %vm115_vm3, %vm116_vm5  ;;  %vm148_vm13 = vcmp.eq.f32.partialorder %v888_v4, 0.0  ;;  %vm551_vm4 = vcmask 254977  }
  0x93   :  { %v62_v13 = vmul.f32 %v615_v48, %v61_v0  ;;  %v111_v14 = vmul.f32 %v617_v8, %v110_v2  ;;  %v98_v24 = vmul.f32 %v76_v20, %v728_v6  ;;  %618 = vpow2.f32 %v601_v46  ;;  %v893_v2 = vld [vmem:[%s1061_s3 + $0x18] sm:$0xff] }
  0x94   :  { %v86_v15 = vsel %vm793_vm12, %v613_v42, %v82_v10  ;;  %vm149_vm14 = vcmp.eq.f32.partialorder %v893_v2, 0.0  ;;  %vm557_vm5 = vcmask 256002  }
  0x95   :  { %v66_v16 = vsel %vm65_vm2, %v615_v48, %v62_v13  ;;  %v112_v17 = vmul.f32 0.5, %v111_v14  ;;  %v99_v19 = vmul.f32 %v86_v15, %v741_v11 }
  0x96   :  { %v97_v21 = vmul.f32 %v66_v16, %v733_v7 }
  0x97   :  { %v113_v22 = vsub.f32 1.5, %v112_v17  ;;  %591 = vmatpush.xpose.msk.msra.mxu3 %vm44_vm0, %v99_v19 }
  0x98   :  { %582 = vmatmul.msk.f32.vlgmr.msra.gmra.mxu1 %vm44_vm0, %v97_v21 }
  0x99   :  { %v114_v23 = vmul.f32 %v617_v8, %v113_v22  ;;  %v619_v10 = vpop.eup %618 }
  0x9a   :  { %v898_v16 = vadd.f32 1.0, %v619_v10 }
  0x9b   :  { %v118_v25 = vsel %vm117_vm6, %v617_v8, %v114_v23  ;;  %592 = vmatpush.xpose.msk.msra.mxu3 %vm44_vm0, %v98_v24 }
  0x9c   :  { %v129_v26 = vmul.f32 %v118_v25, %v755_v18  ;;  %620 = vrcp.f32 %v898_v16  ;;  %vm455_vm15 = vweird.f32 %v898_v16 }
  0x9e   :  { %576 = vmatpush.xpose.msk.msra.mxu0 %vm44_vm0, %v129_v26  ;;  %587 = vmatpush.xpose.msk.msra.mxu2 %vm44_vm0, %v129_v26 }
  0x9f   :  { %593 = vmatpush.xpose.msk.msra.mxu3 %vm44_vm0, %v97_v21 }
  0xa0   :  { %583 = vmatmul.msk.f32.gmra.mxu1 %vm44_vm0, %v98_v24 }
  0xa1   :  { %577 = vmatmul.msk.f32.vlgmr.msra.gmra.mxu0 %vm44_vm0, %v97_v21  ;;  %588 = vmatmul.msk.f32.vlgmr.msra.gmra.mxu2 %vm44_vm0, %v129_v26 }
  0xa2   :  { %596 = vmatpush.xpose.msk.msrb.mxu2 %vm44_vm0, %v100_v3  ;;  %594 = vmatmul.msk.f32.vlgmr.msra.gmra.mxu3 %vm44_vm0, %v129_v26  ;;  %v923_v46 = vpop.eup %620 }
  0xa3   :  { %vm456_vm1 = vweird.f32 %v923_v46 }
  0xa4   :  { %vm948_vm2 = vmor %vm455_vm15, %vm456_vm1  ;;  %vm421_vm15 = vcmask 322752  }
  0xa6   :  { %597 = vmatpush.xpose.msk.msrb.mxu2 %vm44_vm0, %v99_v19 }
  0xa8   :  { %584 = vmatmul.msk.f32.gmra.mxu1 %vm44_vm0, %v99_v19 }
  0xa9   :  { %578 = vmatmul.msk.f32.gmra.mxu0 %vm44_vm0, %v98_v24  ;;  %589 = vmatmul.msk.f32.gmra.mxu2 %vm44_vm0, %v130_v61 }
  0xaa   :  { %598 = vmatpush.xpose.msk.msrb.mxu2 %vm44_vm0, %v98_v24  ;;  %595 = vmatmul.msk.f32.gmra.mxu3 %vm44_vm0, %v130_v61  ;;  %v882_v61 = vld [vmem:[%s1061_s3 + $0x8] sm:$0xff] }
  0xab   :  { %vm147_vm12 = vcmp.eq.f32.partialorder %v882_v61, 0.0 }
  0xae   :  { %599 = vmatpush.xpose.msk.msrb.mxu2 %vm44_vm0, %v97_v21 }
  0xb0   :  { %585 = vmatmul.msk.f32.gmra.mxu1 %vm44_vm0, %v100_v3 }
  0xb1   :  { %579 = vmatmul.msk.f32.gmra.mxu0 %vm44_vm0, %v99_v19  ;;  %600 = vmatmul.msk.f32.vlgmr.msrb.gmra.mxu2 %vm44_vm0, %v145_v63 }
  0xb9   :  { %580 = vmatmul.msk.f32.gmra.mxu0 %vm44_vm0, %v100_v3 }
 0x115   :  { %v225_v6 = vpop.f32.mrf.mxu1 }
 0x116   :  { %v848_v37 = vmul.f32 5.0, %v225_v6 }
 0x118   :  { %v351_v51 = vsel %vm350_vm8, %v848_v37, -inf }
 0x11d   :  { %v228_v7 = vpop.f32.mrf.mxu1 }
 0x11e   :  { %v185_v11 = vpop.f32.mrf.mxu0  ;;  %v843_v35 = vmul.f32 5.0, %v228_v7 }
 0x11f   :  { %v197_v5 = vmul.f32 5.0, %v185_v11 }
 0x120   :  { %v352_v47 = vsel %vm350_vm8, %v843_v35, -inf }
 0x121   :  { %v355_v58 = vmax.f32 %v351_v51, %v352_v47  ;;  %v906_v23 = vsel %vm146_vm11, -1e+09, %v197_v5 }
 0x122   :  { %v316_v32 = vsel %vm44_vm0, %v906_v23, -inf }
 0x124   :  { %v258_v18 = vpop.f32.mrf.mxu2 }
 0x125   :  { %v231_v27 = vpop.f32.mrf.mxu1  ;;  %v285_v28 = vpop.f32.mrf.mxu3  ;;  %v840_v34 = vmul.f32 5.0, %v258_v18 }
 0x126   :  { %v188_v31 = vpop.f32.mrf.mxu0  ;;  %v291_v33 = vmul.f32 5.0, %v285_v28  ;;  %v850_v38 = vmul.f32 5.0, %v231_v27 }
 0x127   :  { %v426_v42 = vsel %vm44_vm0, %v840_v34, -inf  ;;  %v198_v8 = vmul.f32 5.0, %v188_v31 }
 0x128   :  { %v852_v39 = vsel %vm266_vm7, -1e+09, %v291_v33  ;;  %v353_v54 = vsel %vm350_vm8, %v850_v38, -inf }
 0x129   :  { %v466_v52 = vsel %vm465_vm9, %v852_v39, -inf  ;;  %v908_v24 = vsel %vm147_vm12, -1e+09, %v198_v8 }
 0x12a   :  { %v317_v28 = vsel %vm44_vm0, %v908_v24, -inf }
 0x12b   :  { %v320_v47 = vmax.f32 %v316_v32, %v317_v28 }
 0x12c   :  { %v261_v40 = vpop.f32.mrf.mxu2 }
 0x12d   :  { %v234_v43 = vpop.f32.mrf.mxu1  ;;  %v859_v44 = vmul.f32 5.0, %v261_v40  ;;  %v288_v45 = vpop.f32.mrf.mxu3 }
 0x12e   :  { %v863_v48 = vmul.f32 5.0, %v234_v43  ;;  %v292_v49 = vmul.f32 5.0, %v288_v45  ;;  %v191_v50 = vpop.f32.mrf.mxu0 }
 0x12f   :  { %v427_v53 = vsel %vm44_vm0, %v859_v44, -inf  ;;  %v199_v13 = vmul.f32 5.0, %v191_v50 }
 0x130   :  { %v354_v55 = vsel %vm350_vm8, %v863_v48, -inf  ;;  %v428_v56 = vmax.f32 %v426_v42, %v427_v53  ;;  %v875_v57 = vsel %vm267_vm10, -1e+09, %v292_v49 }
 0x131   :  { %v356_v59 = vmax.f32 %v353_v54, %v354_v55  ;;  %v467_v60 = vsel %vm465_vm9, %v875_v57, -inf  ;;  %v911_v7 = vsel %vm148_vm13, -1e+09, %v199_v13  ;;  %v459_v13 = vand.u32 2147483647, %v898_v16 }
 0x132   :  { %v429_v62 = vrot.slane %v428_v56, 4  ;;  %v468_v63 = vmax.f32 %v466_v52, %v467_v60  ;;  %v318_v36 = vsel %vm44_vm0, %v911_v7, -inf  ;;  %v451_v52 = vmul.f32 %v923_v46, %v898_v16 }
 0x133   :  { %v357_v3 = vmax.f32 %v355_v58, %v356_v59  ;;  %vm960_vm3 = vcmp.eq.f32.partialorder %v459_v13, 8.507059e+37 }
 0x134   :  { %v430_v9 = vmax.f32 %v428_v56, %v429_v62  ;;  %v469_v1 = vrot.slane %v468_v63, 4  ;;  %v312_v0 = vpop.f32.mrf.mxu2  ;;  %v452_v59 = vsub.f32 1.0, %v451_v52 }
 0x135   :  { %v358_v12 = vrot.slane %v357_v3, 4  ;;  %v896_v14 = vmul.f32 5.0, %v312_v0 }
 0x136   :  { %v431_v15 = vrot.slane %v430_v9, 2  ;;  %v470_v17 = vmax.f32 %v468_v63, %v469_v1  ;;  %v194_v19 = vpop.f32.mrf.mxu0  ;;  %v453_v10 = vmul.f32 %v923_v46, %v452_v59 }
 0x137   :  { %v359_v20 = vmax.f32 %v357_v3, %v358_v12  ;;  %v515_v21 = vsel %vm465_vm9, %v896_v14, -inf  ;;  %v200_v22 = vmul.f32 5.0, %v194_v19 }
 0x138   :  { %v432_v25 = vmax.f32 %v430_v9, %v431_v15  ;;  %v471_v6 = vrot.slane %v470_v17, 2  ;;  %v516_v11 = vrot.slane %v515_v21, 4 }
 0x139   :  { %v360_v26 = vrot.slane %v359_v20, 2  ;;  %v913_v27 = vsel %vm149_vm14, -1e+09, %v200_v22  ;;  %v461_v22 = vand.u32 2147483648, %v898_v16  ;;  %vm512_vm14 = vcmask 257024  }
 0x13a   :  { %v433_v18 = vrot.slane %v432_v25, 1  ;;  %v472_v29 = vmax.f32 %v470_v17, %v471_v6  ;;  %v517_v31 = vmax.f32 %v515_v21, %v516_v11  ;;  %v319_v40 = vsel %vm44_vm0, %v913_v27, -inf }
 0x13b   :  { %v361_v30 = vmax.f32 %v359_v20, %v360_v26  ;;  %v321_v45 = vmax.f32 %v318_v36, %v319_v40  ;;  %vm345_vm0 = vcmask 125952   ;;  %v462_v16 = vor.u32 1.1754944e-38, %v461_v22 }
 0x13c   :  { %v434_v33 = vmax.f32 %v432_v25, %v433_v18  ;;  %v473_v42 = vrot.slane %v472_v29, 1  ;;  %v518_v43 = vrot.slane %v517_v31, 2 }
 0x13d   :  { %v362_v41 = vrot.slane %v361_v30, 1  ;;  %v322_v58 = vmax.f32 %v320_v47, %v321_v45 }
 0x13e   :  { %v435_v49 = vsub.f32 %v840_v34, %v434_v33  ;;  %v436_v50 = vsub.f32 %v859_v44, %v434_v33  ;;  %v474_v53 = vmax.f32 %v472_v29, %v473_v42  ;;  %v519_v56 = vmax.f32 %v517_v31, %v518_v43 }
 0x13f   :  { %v363_v51 = vmax.f32 %v361_v30, %v362_v41  ;;  %v323_v3 = vrot.slane %v322_v58, 4 }
 0x140   :  { %v437_v54 = vmul.f32 1.442695, %v435_v49  ;;  %v439_v55 = vmul.f32 1.442695, %v436_v50  ;;  %v475_v60 = vsub.f32 %v852_v39, %v474_v53  ;;  %v476_v62 = vsub.f32 %v875_v57, %v474_v53 }
 0x141   :  { %v520_v63 = vrot.slane %v519_v56, 1  ;;  %v366_v34 = vsub.f32 %v850_v38, %v363_v51  ;;  %v324_v9 = vmax.f32 %v322_v58, %v323_v3  ;;  %v367_v0 = vsub.f32 %v863_v48, %v363_v51 }
 0x142   :  { %622 = vpow2.f32 %v437_v54  ;;  %v477_v44 = vmul.f32 1.442695, %v475_v60  ;;  %v479_v5 = vmul.f32 1.442695, %v476_v62  ;;  %v365_v39 = vsub.f32 %v843_v35, %v363_v51 }
 0x143   :  { %624 = vpow2.f32 %v439_v55  ;;  %v521_v8 = vmax.f32 %v519_v56, %v520_v63  ;;  %v372_v1 = vmul.f32 1.442695, %v366_v34  ;;  %v364_v57 = vsub.f32 %v848_v37, %v363_v51 }
 0x144   :  { %626 = vpow2.f32 %v477_v44  ;;  %v325_v12 = vrot.slane %v324_v9, 2  ;;  %v370_v15 = vmul.f32 1.442695, %v365_v39  ;;  %v374_v21 = vmul.f32 1.442695, %v367_v0 }
 0x145   :  { %v522_v38 = vsub.f32 %v896_v14, %v521_v8  ;;  %628 = vpow2.f32 %v479_v5  ;;  %v368_v17 = vmul.f32 1.442695, %v364_v57  ;;  %v454_v14 = vadd.f32 %v923_v46, %v453_v10 }
 0x146   :  { %v326_v20 = vmax.f32 %v324_v9, %v325_v12  ;;  %630 = vpow2.f32 %v372_v1  ;;  %v402_v60 = vpack.c.bf16 %v882_v61, %v882_v61  ;;  %v404_v57 = vpack.c.bf16 %v893_v2, %v893_v2 }
 0x147   :  { %v523_v48 = vmul.f32 1.442695, %v522_v38  ;;  %632 = vpow2.f32 %v370_v15  ;;  %v458_v32 = vsel %vm948_vm2, %v923_v46, %v454_v14  ;;  %v403_v2 = vpack.c.bf16 %v888_v4, %v888_v4 }
 0x148   :  { %v623_v19 = vpop.eup %622  ;;  %v327_v26 = vrot.slane %v326_v20, 1 }
 0x149   :  { %v625_v35 = vpop.eup %624  ;;  %v441_v37 = vpack.c.bf16 %v623_v19, %v623_v19  ;;  %634 = vpow2.f32 %v523_v48 }
 0x14a   :  { %v442_v25 = vpack.c.bf16 %v625_v35, %v625_v35  ;;  %636 = vpow2.f32 %v368_v17  ;;  %v952_v11 = vpop.eup %626  ;;  %v328_v18 = vmax.f32 %v326_v20, %v327_v26 }
 0x14b   :  { %443 = vst.msk [vmem:[%s1064_s7] sm:$0xf] %vm345_vm0, %v441_v37  ;;  %v958_v28 = vpop.eup %628  ;;  %638 = vpow2.f32 %v374_v21  ;;  %v481_v29 = vsel %vm465_vm9, %v952_v11, 0.0 }
 0x14c   :  { %444 = vst.msk [vmem:[%s1064_s7 + $0x4] sm:$0xf] %vm345_vm0, %v442_v25  ;;  %v631_v31 = vpop.eup %630  ;;  %v482_v33 = vsel %vm465_vm9, %v958_v28, 0.0  ;;  %v332_v36 = vsub.f32 %v913_v27, %v328_v18  ;;  %v330_v40 = vsub.f32 %v908_v24, %v328_v18  ;;  %v329_v45 = vsub.f32 %v906_v23, %v328_v18  ;;  %s653_s7 = smov 16  }
 0x14d   :  { %v633_v41 = vpop.eup %632  ;;  %v483_v42 = vadd.f32 %v482_v33, %v481_v29  ;;  %v378_v43 = vpack.c.bf16 %v631_v31, %v631_v31  ;;  %v331_v47 = vsub.f32 %v911_v7, %v328_v18  ;;  %v982_v27 = vsel %vm960_vm3, %v462_v16, %v458_v32 }
 0x14e   :  { %v339_v50 = vmul.f32 1.442695, %v332_v36  ;;  %v377_v51 = vpack.c.bf16 %v633_v41, %v633_v41  ;;  %v335_v52 = vmul.f32 1.442695, %v330_v40  ;;  %v333_v24 = vmul.f32 1.442695, %v329_v45 }
 0x14f   :  { %v975_v49 = vpop.eup %634  ;;  %v484_v53 = vrot.slane %v483_v42, 4  ;;  %388 = vrot.lane.b32.xlu0 %v378_v43, %s653_s7  ;;  %v337_v7 = vmul.f32 1.442695, %v331_v47  ;;  %v506_v63 = vsub.f32 1.0, %v982_v27  ;;  %v554_v3 = vrot.slane %v982_v27, 7 }
 0x150   :  { %v637_v46 = vpop.eup %636  ;;  %v525_v54 = vsel %vm465_vm9, %v975_v49, 0.0  ;;  %640 = vpow2.f32 %v339_v50  ;;  %386 = vrot.lane.b32.xlu2 %v377_v51, %s653_s7  ;;  %552 = vst.msk [vmem:[%s1065_s9 - $0x1] sm:$0x2] %vm551_vm4, %v982_v27 }
 0x151   :  { %v526_v23 = vrot.slane %v525_v54, 4  ;;  %v639_v55 = vpop.eup %638  ;;  %v485_v56 = vadd.f32 %v484_v53, %v483_v42  ;;  %v376_v58 = vpack.c.bf16 %v637_v46, %v637_v46  ;;  %642 = vpow2.f32 %v335_v52 }
 0x152   :  { %644 = vpow2.f32 %v333_v24  ;;  %v556_v5 = vsub.f32 %v506_v63, %v554_v3  ;;  %v379_v9 = vpack.c.bf16 %v639_v55, %v639_v55  ;;  %v507_v33 = vperm.slane %v506_v63, 0 }
 0x153   :  { %v527_v59 = vadd.f32 %v526_v23, %v525_v54  ;;  %v486_v62 = vrot.slane %v485_v56, 2  ;;  %384 = vrot.lane.b32.xlu1 %v376_v58, %s653_s7  ;;  %646 = vpow2.f32 %v337_v7  ;;  %v547_v42 = vperm.slane %v982_v27, 0 }
 0x154   :  { %558 = vst.msk [vmem:[%s1065_s9 - $0x1] sm:$0x4] %vm557_vm5, %v556_v5 }
 0x155   :  { %v528_v34 = vrot.slane %v527_v59, 2  ;;  %v487_v44 = vadd.f32 %v486_v62, %v485_v56 }
 0x156   :  { %v641_v61 = vpop.eup %640 }
 0x157   :  { %v529_v8 = vadd.f32 %v528_v34, %v527_v59  ;;  %v643_v1 = vpop.eup %642  ;;  %v488_v0 = vrot.slane %v487_v44, 1  ;;  %v344_v39 = vpack.c.bf16 %v641_v61, %v641_v61  ;;  %411 = vrot.lane.b32.xlu0 %v402_v60, %s652_s24 }
 0x158   :  { %v645_v10 = vpop.eup %644  ;;  %390 = vrot.lane.b32.xlu2 %v379_v9, %s653_s7  ;;  %v342_v12 = vpack.c.bf16 %v643_v1, %v643_v1 }
 0x159   :  { %v530_v38 = vrot.slane %v529_v8, 1  ;;  %v489_v13 = vadd.f32 %v488_v0, %v487_v44  ;;  %349 = vst.msk [vmem:[%s1066_s6 + $0xc] sm:$0xf] %vm345_vm0, %v344_v39  ;;  %v341_v15 = vpack.c.bf16 %v645_v10, %v645_v10  ;;  %v647_v17 = vpop.eup %646 }
 0x15a   :  { %347 = vst.msk [vmem:[%s1066_s6 + $0x4] sm:$0xf] %vm345_vm0, %v342_v12  ;;  %v343_v48 = vpack.c.bf16 %v647_v17, %v647_v17 }
 0x15b   :  { %v531_v19 = vadd.f32 %v530_v38, %v529_v8  ;;  %648 = vrcp.f32 %v489_v13  ;;  %415 = vrot.lane.b32.xlu1 %v404_v57, %s652_s24  ;;  %346 = vst.msk [vmem:[%s1066_s6] sm:$0xf] %vm345_vm0, %v341_v15  ;;  %v501_v25 = vand.u32 2147483648, %v489_v13  ;;  %v499_v6 = vand.u32 2147483647, %v489_v13 }
 0x15c   :  { %348 = vst.msk [vmem:[%s1066_s6 + $0x8] sm:$0xf] %vm345_vm0, %v343_v48  ;;  %vm495_vm8 = vweird.f32 %v489_v13  ;;  %vm396_vm0 = vcmask 191616  }
 0x15d   :  { %650 = vrcp.f32 %v531_v19  ;;  %v543_v18 = vand.u32 2147483648, %v531_v19  ;;  %v541_v30 = vand.u32 2147483647, %v531_v19  ;;  %v502_v29 = vor.u32 1.1754944e-38, %v501_v25 }
 0x15e   :  { %vm537_vm10 = vweird.f32 %v531_v19  ;;  %vm500_vm11 = vcmp.eq.f32.partialorder %v499_v6, 8.507059e+37 }
 0x15f   :  { %v544_v36 = vor.u32 1.1754944e-38, %v543_v18  ;;  %vm542_vm13 = vcmp.eq.f32.partialorder %v541_v30, 8.507059e+37 }
 0x160   :  { %413 = vrot.lane.b32.xlu2 %v403_v2, %s652_s24 }
 0x161   :  { %v649_v20 = vpop.eup %648 }
 0x162   :  { %v491_v21 = vmul.f32 %v649_v20, %v489_v13  ;;  %vm496_vm6 = vweird.f32 %v649_v20 }
 0x163   :  { %v651_v35 = vpop.eup %650  ;;  %vm497_vm9 = vmor %vm495_vm8, %vm496_vm6 }
 0x164   :  { %v533_v37 = vmul.f32 %v651_v35, %v531_v19  ;;  %v492_v22 = vsub.f32 1.0, %v491_v21  ;;  %vm538_vm7 = vweird.f32 %v651_v35 }
 0x165   :  { %vm539_vm12 = vmor %vm537_vm10, %vm538_vm7 }
 0x166   :  { %v534_v14 = vsub.f32 1.0, %v533_v37  ;;  %v493_v26 = vmul.f32 %v649_v20, %v492_v22 }
 0x168   :  { %v535_v4 = vmul.f32 %v651_v35, %v534_v14  ;;  %v494_v16 = vadd.f32 %v649_v20, %v493_v26 }
 0x16a   :  { %v536_v31 = vadd.f32 %v651_v35, %v535_v4  ;;  %v498_v32 = vsel %vm497_vm9, %v649_v20, %v494_v16 }
 0x16b   :  { %v503_v40 = vsel %vm500_vm11, %v502_v29, %v498_v32 }
 0x16c   :  { %v540_v41 = vsel %vm539_vm12, %v651_v35, %v536_v31  ;;  %v504_v43 = vmul.f32 %v952_v11, %v503_v40  ;;  %v505_v45 = vmul.f32 %v958_v28, %v503_v40 }
 0x16d   :  { %v545_v47 = vsel %vm542_vm13, %v544_v36, %v540_v41 }
 0x16e   :  { %v546_v50 = vmul.f32 %v975_v49, %v545_v47  ;;  %v508_v51 = vmul.f32 %v507_v33, %v504_v43  ;;  %v509_v52 = vmul.f32 %v507_v33, %v505_v45  ;;  %v410_v49 = vpop.permute.xlu1 %409 }
 0x170   :  { %v548_v46 = vmul.f32 %v547_v42, %v546_v50  ;;  %v510_v53 = vpack.c.bf16 %v508_v51, %v508_v51  ;;  %v511_v54 = vpack.c.bf16 %v509_v52, %v509_v52 }
 0x172   :  { %v549_v24 = vpack.c.bf16 %v548_v46, %v548_v46  ;;  %513 = vst.msk [vmem:[%s1067_s8] sm:$0xf] %vm512_vm14, %v510_v53 }
 0x173   :  { %514 = vst.msk [vmem:[%s1067_s8 + $0x4] sm:$0xf] %vm512_vm14, %v511_v54 }
 0x174   :  { %550 = vst.msk [vmem:[%s1067_s8 + $0x8] sm:$0xf] %vm512_vm14, %v549_v24 }
 0x1aa   :  { %v387_v11 = vpop.permute.xlu2 %386 }
 0x1ab   :  { %398 = vst.msk [vmem:[%s1066_s6 + $0x4] sm:$0xf] %vm396_vm0, %v387_v11 }
 0x1b2   :  { %v391_v28 = vpop.permute.xlu2 %390 }
 0x1b3   :  { %400 = vst.msk [vmem:[%s1066_s6 + $0xc] sm:$0xf] %vm396_vm0, %v391_v28 }
 0x1ba   :  { %v414_v27 = vpop.permute.xlu2 %413 }
 0x1c1   :  { %v389_v23 = vpop.permute.xlu0 %388 }
 0x1c2   :  { %399 = vst.msk [vmem:[%s1066_s6 + $0x8] sm:$0xf] %vm396_vm0, %v389_v23 }
 0x1c3   :  { %424 = vst.msk [vmem:[%s1066_s6 + $0x8] sm:$0xf] %vm421_vm15, %v414_v27 }
 0x1c5   :  { %v385_v7 = vpop.permute.xlu1 %384 }
 0x1c6   :  { %397 = vst.msk [vmem:[%s1066_s6] sm:$0xf] %vm396_vm0, %v385_v7 }
 0x1c7   :  { %422 = vst.msk [vmem:[%s1066_s6] sm:$0xf] %vm421_vm15, %v410_v49 }
 0x1c9   :  { %v412_v55 = vpop.permute.xlu0 %411 }
 0x1ca   :  { %423 = vst.msk [vmem:[%s1066_s6 + $0x4] sm:$0xf] %vm421_vm15, %v412_v55 }
 0x1cd   :  { %v416_v56 = vpop.permute.xlu1 %415 }
 0x1ce   :  { %425 = vst.msk [vmem:[%s1066_s6 + $0xc] sm:$0xf] %vm421_vm15, %v416_v56 }

// kernel: _lambda_.3
= control target key start
LH: loop header
LB: loop body
LE: loop exit
PB: predicated region body
PF: predicated region fallthrough
CT: control target
= control target key end

     0   :  { %s4245_s24 = smov 0   ;;  %s7418_s0 = inlined_call_operand.vmem [shape: s32[256,8], index: 0, kind: input, shape index: {}]   ;;  %s7419_s1 = inlined_call_operand.vmem [shape: f32[256,8], index: 1, kind: input, shape index: {}]   ;;  %s7420_s2 = inlined_call_operand.vmem [shape: f32[256,8], index: 2, kind: input, shape index: {}]   ;;  %s7421_s3 = inlined_call_operand.vmem [shape: bf16[32,40], index: 3, kind: input, shape index: {}]   ;;  %s7422_s4 = inlined_call_operand.vmem [shape: bf16[16,16], index: 4, kind: input, shape index: {}]   ;;  %s7423_s5 = inlined_call_operand.vmem [shape: bf16[24,32], index: 5, kind: input, shape index: {}]   ;;  %s7424_s6 = inlined_call_operand.vmem [shape: f32[2,32], index: 6, kind: input, shape index: {}]   ;;  %s7425_s7 = inlined_call_operand.vmem [shape: f32[256,48], index: 7, kind: output, shape index: {}]  }
   0x1 LB: > { %s3787_s25 = sadd.s32 4294967295, %s4192_s24   ;;  %p3791_p0 = scmp.ge.s32.totalorder %s4192_s24, 1  ;;  %s4192_s24 = sphi %s4245_s24, %s17_s24  }
   0x2   : > { %p260_p1 = scmp.lt.s32.totalorder %s4192_s24, 3 }
   0x4   : > { %p261_p2 = pnand %p3791_p0, %p260_p1 }
   0x6   : > { %264 = sbr.rel (%p261_p2) target bundleno = 2098 (0x832), region = 48 }
   0xb   : > { %s3792_s26 = sshll.u32 %s3787_s25, 4  ;;  %v4194_v0 = vmov 0   ;;  %v4195_v58 = vmov 1   ;;  %s4203_s18 = smov 104  }
   0xc   : > { %3904 = vset.pattern.permute.xlu2 %v4194_v0  ;;  %3903 = vset.pattern.permute.xlu1 %v4194_v0  ;;  %p303_p3 = scmp.lt.s32.totalorder %s3792_s26, 31  ;;  %s4204_s8 = smov 16  }
   0xd   : > { %3902 = vset.pattern.permute.xlu0 %v4194_v0 }
   0xe   : > { %s8263_s26 = smov (!%p303_p3, %s3792_s26), 31 }
   0xf   : > { %s4253_s27 = sshll.u32 %s8263_s26, 3 }
  0x10   : > { %s4259_s30 = scalar_lea.vmem %s7418_s0, %s4253_s27  ;;  %s4325_s10 = scalar_lea.vmem %s7419_s1, %s4253_s27 }
  0x11   : > { %v4262_v1 = vld [vmem:[%s4259_s30 + $0x20] sm:$0xff]  ;;  %v4265_v2 = vld [vmem:[%s4259_s30 + $0x10] sm:$0xff]  ;;  %v4274_v4 = vld [vmem:[%s4259_s30 + $0x28] sm:$0xff]  ;;  %s4391_s13 = scalar_lea.vmem %s7420_s2, %s4253_s27  ;;  %s7195_s23 = scalar_lea.vmem %s7425_s7, %s4253_s27 }
  0x12   : > { %7674 = vst [vmem:[#allocation2_spill] sm:$0xff] %v4262_v1  ;;  %v4268_v3 = vld [vmem:[%s4259_s30] sm:$0xff]  ;;  %390 = vperm.xlu2 %3904, %v4262_v1   ;;  %384 = vperm.xlu1 %3903, %v4265_v2   ;;  %v4277_v5 = vld [vmem:[%s4259_s30 + $0x18] sm:$0xff]  ;;  %v4280_v6 = vld [vmem:[%s4259_s30 + $0x8] sm:$0xff] }
  0x13   : > { %378 = vperm.xlu0 %3902, %v4268_v3   ;;  %v4286_v7 = vld [vmem:[%s4259_s30 + $0x40] sm:$0xff]  ;;  %v4289_v8 = vld [vmem:[%s4259_s30 + $0x38] sm:$0xff]  ;;  %v4292_v9 = vld [vmem:[%s4259_s30 + $0x30] sm:$0xff] }
  0x14   : > { %7675 = vst [vmem:[#allocation3_spill] sm:$0xff] %v4286_v7  ;;  %v4298_v10 = vld [vmem:[%s4259_s30 + $0x58] sm:$0xff]  ;;  %v4301_v11 = vld [vmem:[%s4259_s30 + $0x50] sm:$0xff]  ;;  %v4304_v12 = vld [vmem:[%s4259_s30 + $0x48] sm:$0xff] }
  0x15   : > { %7676 = vst [vmem:[#allocation4_spill] sm:$0xff] %v4289_v8  ;;  %v4310_v13 = vld [vmem:[%s4259_s30 + $0x70] sm:$0xff]  ;;  %v4313_v14 = vld [vmem:[%s4259_s30 + $0x68] sm:$0xff]  ;;  %v4316_v15 = vld [vmem:[%s4259_s30 + $0x60] sm:$0xff] }
  0x16   : > { %7677 = vst [vmem:[#allocation5_spill] sm:$0xff] %v4301_v11  ;;  %v4328_v16 = vld [vmem:[%s4325_s10 + $0x8] sm:$0xff]  ;;  %v4331_v17 = vld [vmem:[%s4325_s10] sm:$0xff]  ;;  %v4334_v18 = vld [vmem:[%s4259_s30 + $0x78] sm:$0xff] }
  0x17   : > { %v4340_v19 = vld [vmem:[%s4325_s10 + $0x20] sm:$0xff]  ;;  %v4343_v20 = vld [vmem:[%s4325_s10 + $0x18] sm:$0xff]  ;;  %v4346_v21 = vld [vmem:[%s4325_s10 + $0x10] sm:$0xff] }
  0x18   : > { %v4352_v22 = vld [vmem:[%s4325_s10 + $0x38] sm:$0xff]  ;;  %v4355_v23 = vld [vmem:[%s4325_s10 + $0x30] sm:$0xff]  ;;  %v4358_v24 = vld [vmem:[%s4325_s10 + $0x28] sm:$0xff] }
  0x19   : > { %v4364_v25 = vld [vmem:[%s4325_s10 + $0x50] sm:$0xff]  ;;  %v4367_v26 = vld [vmem:[%s4325_s10 + $0x48] sm:$0xff]  ;;  %v4370_v27 = vld [vmem:[%s4325_s10 + $0x40] sm:$0xff] }
  0x1a   : > { %393 = vperm.xlu2 %3904, %v4274_v4   ;;  %387 = vperm.xlu1 %3903, %v4277_v5   ;;  %v4376_v28 = vld [vmem:[%s4325_s10 + $0x68] sm:$0xff]  ;;  %v4379_v29 = vld [vmem:[%s4325_s10 + $0x60] sm:$0xff]  ;;  %v4382_v30 = vld [vmem:[%s4325_s10 + $0x58] sm:$0xff] }
  0x1b   : > { %381 = vperm.xlu0 %3902, %v4280_v6   ;;  %v4394_v31 = vld [vmem:[%s4391_s13] sm:$0xff]  ;;  %v4397_v32 = vld [vmem:[%s4325_s10 + $0x78] sm:$0xff]  ;;  %v4400_v33 = vld [vmem:[%s4325_s10 + $0x70] sm:$0xff] }
  0x1c   : > { %v4406_v34 = vld [vmem:[%s4391_s13 + $0x18] sm:$0xff]  ;;  %v4409_v35 = vld [vmem:[%s4391_s13 + $0x10] sm:$0xff]  ;;  %v4412_v36 = vld [vmem:[%s4391_s13 + $0x8] sm:$0xff] }
  0x1d   : > { %v4420_v38 = vld [vmem:[%s4391_s13 + $0x30] sm:$0xff]  ;;  %v4423_v39 = vld [vmem:[%s4391_s13 + $0x28] sm:$0xff]  ;;  %v4426_v40 = vld [vmem:[%s4391_s13 + $0x20] sm:$0xff] }
  0x1e   : > { %7679 = vst [vmem:[#allocation7_spill] sm:$0xff] %v4420_v38  ;;  %v4434_v42 = vld [vmem:[%s4391_s13 + $0x48] sm:$0xff]  ;;  %v4437_v43 = vld [vmem:[%s4391_s13 + $0x40] sm:$0xff]  ;;  %v4440_v44 = vld [vmem:[%s4391_s13 + $0x38] sm:$0xff] }
  0x1f   : > { %7680 = vst [vmem:[#allocation8_spill] sm:$0xff] %v4423_v39  ;;  %v4448_v46 = vld [vmem:[%s4391_s13 + $0x60] sm:$0xff]  ;;  %v4451_v47 = vld [vmem:[%s4391_s13 + $0x58] sm:$0xff]  ;;  %v4454_v48 = vld [vmem:[%s4391_s13 + $0x50] sm:$0xff] }
  0x20   : > { %7682 = vst [vmem:[#allocation10_spill] sm:$0xff] %v4434_v42  ;;  %v4466_v52 = vld [vmem:[%s4391_s13 + $0x78] sm:$0xff]  ;;  %v4469_v53 = vld [vmem:[%s4391_s13 + $0x70] sm:$0xff]  ;;  %v4472_v54 = vld [vmem:[%s4391_s13 + $0x68] sm:$0xff] }
  0x21   : > { %7683 = vst [vmem:[#allocation11_spill] sm:$0xff] %v4437_v43 }
  0x22   : > { %402 = vperm.xlu2 %3904, %v4286_v7   ;;  %399 = vperm.xlu1 %3903, %v4289_v8   ;;  %7685 = vst [vmem:[#allocation13_spill] sm:$0xff] %v4448_v46 }
  0x23   : > { %396 = vperm.xlu0 %3902, %v4292_v9   ;;  %7686 = vst [vmem:[#allocation14_spill] sm:$0xff] %v4451_v47 }
  0x24   : > { %7687 = vst [vmem:[#allocation15_spill] sm:$0xff] %v4454_v48 }
  0x25   : > { %7691 = vst [vmem:[#allocation19_spill] sm:$0xff] %v4466_v52 }
  0x26   : > { %7692 = vst [vmem:[#allocation20_spill] sm:$0xff] %v4469_v53 }
  0x27   : > { %7693 = vst [vmem:[#allocation21_spill] sm:$0xff] %v4472_v54 }
  0x2a   : > { %411 = vperm.xlu2 %3904, %v4298_v10   ;;  %408 = vperm.xlu1 %3903, %v4301_v11  }
  0x2b   : > { %405 = vperm.xlu0 %3902, %v4304_v12  }
  0x32   : > { %420 = vperm.xlu2 %3904, %v4310_v13   ;;  %417 = vperm.xlu1 %3903, %v4313_v14  }
  0x33   : > { %414 = vperm.xlu0 %3902, %v4316_v15  }
  0x3a   : > { %448 = vperm.xlu2 %3904, %v4328_v16   ;;  %443 = vperm.xlu1 %3903, %v4331_v17  }
  0x3b   : > { %423 = vperm.xlu0 %3902, %v4334_v18  }
  0x42   : > { %463 = vperm.xlu2 %3904, %v4340_v19   ;;  %458 = vperm.xlu1 %3903, %v4343_v20  }
  0x43   : > { %453 = vperm.xlu0 %3902, %v4346_v21  }
  0x4a   : > { %478 = vperm.xlu2 %3904, %v4352_v22   ;;  %473 = vperm.xlu1 %3903, %v4355_v23  }
  0x4b   : > { %468 = vperm.xlu0 %3902, %v4358_v24  }
  0x52   : > { %493 = vperm.xlu2 %3904, %v4364_v25   ;;  %488 = vperm.xlu1 %3903, %v4367_v26  }
  0x53   : > { %483 = vperm.xlu0 %3902, %v4370_v27  }
  0x5a   : > { %508 = vperm.xlu2 %3904, %v4376_v28   ;;  %503 = vperm.xlu1 %3903, %v4379_v29  }
  0x5b   : > { %498 = vperm.xlu0 %3902, %v4382_v30  }
  0x62   : > { %555 = vperm.xlu2 %3904, %v4394_v31   ;;  %518 = vperm.xlu1 %3903, %v4397_v32  }
  0x63   : > { %513 = vperm.xlu0 %3902, %v4400_v33  }
  0x6a   : > { %570 = vperm.xlu2 %3904, %v4406_v34   ;;  %565 = vperm.xlu1 %3903, %v4409_v35  }
  0x6b   : > { %560 = vperm.xlu0 %3902, %v4412_v36  }
  0x6c   : > { %v4417_v37 = vpop.permute.xlu2 %390 }
  0x6d   : > { %7678 = vst [vmem:[#allocation6_spill] sm:$0xff] %v4417_v37 }
  0x72   : > { %585 = vperm.xlu2 %3904, %v4420_v38   ;;  %580 = vperm.xlu1 %3903, %v4423_v39  }
  0x73   : > { %575 = vperm.xlu0 %3902, %v4426_v40  }
  0x74   : > { %v4431_v41 = vpop.permute.xlu2 %393 }
  0x75   : > { %7681 = vst [vmem:[#allocation9_spill] sm:$0xff] %v4431_v41 }
  0x7a   : > { %600 = vperm.xlu2 %3904, %v4434_v42   ;;  %595 = vperm.xlu1 %3903, %v4437_v43  }
  0x7b   : > { %590 = vperm.xlu0 %3902, %v4440_v44  }
  0x7c   : > { %v4445_v45 = vpop.permute.xlu2 %402 }
  0x7d   : > { %7684 = vst [vmem:[#allocation12_spill] sm:$0xff] %v4445_v45 }
  0x82   : > { %615 = vperm.xlu2 %3904, %v4448_v46   ;;  %610 = vperm.xlu1 %3903, %v4451_v47  }
  0x83   : > { %605 = vperm.xlu0 %3902, %v4454_v48  }
  0x84   : > { %v4459_v49 = vpop.permute.xlu2 %411  ;;  %v4461_v50 = vpop.permute.xlu1 %384 }
  0x85   : > { %7688 = vst [vmem:[#allocation16_spill] sm:$0xff] %v4459_v49  ;;  %v4463_v51 = vpop.permute.xlu0 %378 }
  0x86   : > { %7689 = vst [vmem:[#allocation17_spill] sm:$0xff] %v4461_v50 }
  0x87   : > { %7690 = vst [vmem:[#allocation18_spill] sm:$0xff] %v4463_v51 }
  0x8a   : > { %630 = vperm.xlu2 %3904, %v4466_v52   ;;  %625 = vperm.xlu1 %3903, %v4469_v53  }
  0x8b   : > { %620 = vperm.xlu0 %3902, %v4472_v54  }
  0x8c   : > { %v4477_v55 = vpop.permute.xlu2 %420  ;;  %v4479_v56 = vpop.permute.xlu1 %387 }
  0x8d   : > { %7694 = vst [vmem:[#allocation22_spill] sm:$0xff] %v4477_v55  ;;  %v4481_v57 = vpop.permute.xlu0 %381 }
  0x8e   : > { %7695 = vst [vmem:[#allocation23_spill] sm:$0xff] %v4479_v56 }
  0x8f   : > { %7696 = vst [vmem:[#allocation24_spill] sm:$0xff] %v4481_v57 }
  0x92   : > { %3907 = vset.pattern.permute.xlu2 %v4195_v58  ;;  %3906 = vset.pattern.permute.xlu1 %v4195_v58 }
  0x93   : > { %3905 = vset.pattern.permute.xlu0 %v4195_v58  ;;  %672 = vperm.xlu2 %3907, %v4265_v2  }
  0x94   : > { %669 = vperm.xlu1 %3906, %v4280_v6   ;;  %666 = vperm.xlu0 %3905, %v4268_v3   ;;  %v4486_v59 = vpop.permute.xlu2 %448  ;;  %v4488_v60 = vpop.permute.xlu1 %399 }
  0x95   : > { %7697 = vst [vmem:[#allocation25_spill] sm:$0xff] %v4486_v59  ;;  %v4490_v61 = vpop.permute.xlu0 %396 }
  0x96   : > { %7698 = vst [vmem:[#allocation26_spill] sm:$0xff] %v4488_v60 }
  0x97   : > { %7699 = vst [vmem:[#allocation27_spill] sm:$0xff] %v4490_v61 }
  0x9b   : > { %678 = vperm.xlu2 %3907, %v4262_v1  }
  0x9c   : > { %675 = vperm.xlu1 %3906, %v4277_v5   ;;  %681 = vperm.xlu0 %3905, %v4274_v4   ;;  %v4495_v62 = vpop.permute.xlu2 %463  ;;  %v4497_v63 = vpop.permute.xlu1 %408 }
  0x9d   : > { %7700 = vst [vmem:[#allocation28_spill] sm:$0xff] %v4495_v62  ;;  %v4499_v0 = vpop.permute.xlu0 %405 }
  0x9e   : > { %7701 = vst [vmem:[#allocation29_spill] sm:$0xff] %v4497_v63 }
  0x9f   : > { %7702 = vst [vmem:[#allocation30_spill] sm:$0xff] %v4499_v0 }
  0xa3   : > { %687 = vperm.xlu2 %3907, %v4289_v8  }
  0xa4   : > { %684 = vperm.xlu1 %3906, %v4292_v9   ;;  %690 = vperm.xlu0 %3905, %v4286_v7   ;;  %v4504_v58 = vpop.permute.xlu2 %478  ;;  %v4506_v59 = vpop.permute.xlu1 %417 }
  0xa5   : > { %7703 = vst [vmem:[#allocation31_spill] sm:$0xff] %v4504_v58  ;;  %v4508_v61 = vpop.permute.xlu0 %414 }
  0xa6   : > { %7704 = vst [vmem:[#allocation32_spill] sm:$0xff] %v4506_v59 }
  0xa7   : > { %7705 = vst [vmem:[#allocation33_spill] sm:$0xff] %v4508_v61 }
  0xab   : > { %696 = vperm.xlu2 %3907, %v4301_v11  }
  0xac   : > { %693 = vperm.xlu1 %3906, %v4304_v12   ;;  %699 = vperm.xlu0 %3905, %v4298_v10   ;;  %v4513_v62 = vpop.permute.xlu2 %493  ;;  %v4515_v0 = vpop.permute.xlu1 %443 }
  0xad   : > { %7706 = vst [vmem:[#allocation34_spill] sm:$0xff] %v4513_v62  ;;  %v4517_v56 = vpop.permute.xlu0 %423 }
  0xae   : > { %7707 = vst [vmem:[#allocation35_spill] sm:$0xff] %v4515_v0 }
  0xaf   : > { %7708 = vst [vmem:[#allocation36_spill] sm:$0xff] %v4517_v56 }
  0xb3   : > { %705 = vperm.xlu2 %3907, %v4313_v14  }
  0xb4   : > { %702 = vperm.xlu1 %3906, %v4316_v15   ;;  %708 = vperm.xlu0 %3905, %v4310_v13   ;;  %v4522_v58 = vpop.permute.xlu2 %508  ;;  %v4524_v61 = vpop.permute.xlu1 %458 }
  0xb5   : > { %7709 = vst [vmem:[#allocation37_spill] sm:$0xff] %v4522_v58  ;;  %v4526_v59 = vpop.permute.xlu0 %453 }
  0xb6   : > { %7710 = vst [vmem:[#allocation38_spill] sm:$0xff] %v4524_v61 }
  0xb7   : > { %7711 = vst [vmem:[#allocation39_spill] sm:$0xff] %v4526_v59 }
  0xbb   : > { %730 = vperm.xlu2 %3907, %v4331_v17  }
  0xbc   : > { %711 = vperm.xlu1 %3906, %v4334_v18   ;;  %734 = vperm.xlu0 %3905, %v4328_v16   ;;  %v4531_v62 = vpop.permute.xlu2 %555  ;;  %v4533_v0 = vpop.permute.xlu1 %473 }
  0xbd   : > { %7712 = vst [vmem:[#allocation40_spill] sm:$0xff] %v4531_v62  ;;  %v4535_v56 = vpop.permute.xlu0 %468 }
  0xbe   : > { %7713 = vst [vmem:[#allocation41_spill] sm:$0xff] %v4533_v0 }
  0xbf   : > { %7714 = vst [vmem:[#allocation42_spill] sm:$0xff] %v4535_v56 }
  0xc3   : > { %742 = vperm.xlu2 %3907, %v4343_v20  }
  0xc4   : > { %738 = vperm.xlu1 %3906, %v4346_v21   ;;  %746 = vperm.xlu0 %3905, %v4340_v19   ;;  %v4540_v58 = vpop.permute.xlu2 %570  ;;  %v4542_v59 = vpop.permute.xlu1 %488 }
  0xc5   : > { %7715 = vst [vmem:[#allocation43_spill] sm:$0xff] %v4540_v58  ;;  %v4544_v61 = vpop.permute.xlu0 %483 }
  0xc6   : > { %7716 = vst [vmem:[#allocation44_spill] sm:$0xff] %v4542_v59 }
  0xc7   : > { %7717 = vst [vmem:[#allocation45_spill] sm:$0xff] %v4544_v61 }
  0xcb   : > { %754 = vperm.xlu2 %3907, %v4355_v23  }
  0xcc   : > { %750 = vperm.xlu1 %3906, %v4358_v24   ;;  %758 = vperm.xlu0 %3905, %v4352_v22   ;;  %v4549_v0 = vpop.permute.xlu2 %585  ;;  %v4551_v56 = vpop.permute.xlu1 %503 }
  0xcd   : > { %7718 = vst [vmem:[#allocation46_spill] sm:$0xff] %v4549_v0  ;;  %v4553_v62 = vpop.permute.xlu0 %498 }
  0xce   : > { %7719 = vst [vmem:[#allocation47_spill] sm:$0xff] %v4551_v56 }
  0xcf   : > { %7720 = vst [vmem:[#allocation48_spill] sm:$0xff] %v4553_v62 }
  0xd3   : > { %766 = vperm.xlu2 %3907, %v4367_v26  }
  0xd4   : > { %762 = vperm.xlu1 %3906, %v4370_v27   ;;  %770 = vperm.xlu0 %3905, %v4364_v25   ;;  %v4558_v59 = vpop.permute.xlu2 %600  ;;  %v4560_v61 = vpop.permute.xlu1 %518 }
  0xd5   : > { %7721 = vst [vmem:[#allocation49_spill] sm:$0xff] %v4558_v59  ;;  %v4562_v58 = vpop.permute.xlu0 %513 }
  0xd6   : > { %7722 = vst [vmem:[#allocation50_spill] sm:$0xff] %v4560_v61 }
  0xd7   : > { %7723 = vst [vmem:[#allocation51_spill] sm:$0xff] %v4562_v58 }
  0xdb   : > { %778 = vperm.xlu2 %3907, %v4379_v29  }
  0xdc   : > { %774 = vperm.xlu1 %3906, %v4382_v30   ;;  %782 = vperm.xlu0 %3905, %v4376_v28   ;;  %v4567_v56 = vpop.permute.xlu2 %615  ;;  %v4569_v62 = vpop.permute.xlu1 %565 }
  0xdd   : > { %7724 = vst [vmem:[#allocation52_spill] sm:$0xff] %v4567_v56  ;;  %v4571_v0 = vpop.permute.xlu0 %560 }
  0xde   : > { %7725 = vst [vmem:[#allocation53_spill] sm:$0xff] %v4571_v0 }
  0xe3   : > { %790 = vperm.xlu2 %3907, %v4397_v32  }
  0xe4   : > { %786 = vperm.xlu1 %3906, %v4400_v33   ;;  %826 = vperm.xlu0 %3905, %v4394_v31   ;;  %v4576_v61 = vpop.permute.xlu2 %630  ;;  %v4578_v58 = vpop.permute.xlu1 %580 }
  0xe5   : > { %7726 = vst [vmem:[#allocation54_spill] sm:$0xff] %v4576_v61  ;;  %v4580_v59 = vpop.permute.xlu0 %575 }
  0xe6   : > { %7727 = vst [vmem:[#allocation55_spill] sm:$0xff] %v4580_v59 }
  0xeb   : > { %834 = vperm.xlu2 %3907, %v4409_v35  }
  0xec   : > { %830 = vperm.xlu1 %3906, %v4412_v36   ;;  %838 = vperm.xlu0 %3905, %v4406_v34   ;;  %v4585_v56 = vpop.permute.xlu1 %595 }
  0xed   : > { %v4587_v63 = vpop.permute.xlu0 %590  ;;  %v4589_v51 = vpop.permute.xlu2 %672 }
  0xee   : > { %7728 = vst [vmem:[#allocation56_spill] sm:$0xff] %v4587_v63 }
  0xef   : > { %7729 = vst [vmem:[#allocation57_spill] sm:$0xff] %v4589_v51 }
  0xf3   : > { %846 = vperm.xlu2 %3907, %v4423_v39  }
  0xf4   : > { %842 = vperm.xlu1 %3906, %v4426_v40   ;;  %850 = vperm.xlu0 %3905, %v4420_v38   ;;  %v4594_v61 = vpop.permute.xlu1 %610 }
  0xf5   : > { %v4596_v60 = vpop.permute.xlu0 %605  ;;  %v4598_v59 = vpop.permute.xlu2 %678 }
  0xf6   : > { %7730 = vst [vmem:[#allocation58_spill] sm:$0xff] %v4596_v60 }
  0xf7   : > { %7731 = vst [vmem:[#allocation59_spill] sm:$0xff] %v4598_v59 }
  0xfb   : > { %858 = vperm.xlu2 %3907, %v4437_v43  }
  0xfc   : > { %854 = vperm.xlu1 %3906, %v4440_v44   ;;  %862 = vperm.xlu0 %3905, %v4434_v42   ;;  %v4603_v63 = vpop.permute.xlu1 %625 }
  0xfd   : > { %v4605_v37 = vpop.permute.xlu0 %620  ;;  %v4607_v0 = vpop.permute.xlu2 %687 }
  0xfe   : > { %7732 = vst [vmem:[#allocation60_spill] sm:$0xff] %v4605_v37 }
  0xff   : > { %7733 = vst [vmem:[#allocation61_spill] sm:$0xff] %v4607_v0 }
 0x103   : > { %870 = vperm.xlu2 %3907, %v4451_v47  }
 0x104   : > { %866 = vperm.xlu1 %3906, %v4454_v48   ;;  %874 = vperm.xlu0 %3905, %v4448_v46   ;;  %v4196_v48 = vmov 2  }
 0x105   : > { %v4612_v60 = vpop.permute.xlu2 %696 }
 0x106   : > { %7734 = vst [vmem:[#allocation62_spill] sm:$0xff] %v4612_v60  ;;  %v4614_v59 = vpop.permute.xlu1 %669  ;;  %v4616_v57 = vpop.permute.xlu0 %666 }
 0x107   : > { %7735 = vst [vmem:[#allocation63_spill] sm:$0xff] %v4614_v59 }
 0x108   : > { %7736 = vst [vmem:[#allocation64_spill] sm:$0xff] %v4616_v57 }
 0x10b   : > { %882 = vperm.xlu2 %3907, %v4469_v53  }
 0x10c   : > { %878 = vperm.xlu1 %3906, %v4472_v54   ;;  %886 = vperm.xlu0 %3905, %v4466_v52  }
 0x10d   : > { %v4621_v37 = vpop.permute.xlu2 %705 }
 0x10e   : > { %7737 = vst [vmem:[#allocation65_spill] sm:$0xff] %v4621_v37  ;;  %v4623_v0 = vpop.permute.xlu1 %675  ;;  %v4625_v42 = vpop.permute.xlu0 %681 }
 0x10f   : > { %7738 = vst [vmem:[#allocation66_spill] sm:$0xff] %v4623_v0 }
 0x110   : > { %7739 = vst [vmem:[#allocation67_spill] sm:$0xff] %v4625_v42 }
 0x113   : > { %3909 = vset.pattern.permute.xlu2 %v4196_v48 }
 0x114   : > { %3908 = vset.pattern.permute.xlu1 %v4196_v48  ;;  %3910 = vset.pattern.permute.xlu0 %v4196_v48 }
 0x115   : > { %925 = vperm.xlu2 %3909, %v4280_v6   ;;  %922 = vperm.xlu1 %3908, %v4268_v3   ;;  %v4629_v57 = vpop.permute.xlu2 %730 }
 0x116   : > { %7740 = vst [vmem:[#allocation68_spill] sm:$0xff] %v4629_v57  ;;  %928 = vperm.xlu0 %3910, %v4265_v2   ;;  %v4632_v60 = vpop.permute.xlu1 %684  ;;  %v4634_v59 = vpop.permute.xlu0 %690 }
 0x117   : > { %7741 = vst [vmem:[#allocation69_spill] sm:$0xff] %v4632_v60 }
 0x118   : > { %7742 = vst [vmem:[#allocation70_spill] sm:$0xff] %v4634_v59 }
 0x11d   : > { %934 = vperm.xlu2 %3909, %v4262_v1   ;;  %931 = vperm.xlu1 %3908, %v4277_v5   ;;  %v4638_v0 = vpop.permute.xlu2 %742 }
 0x11e   : > { %7743 = vst [vmem:[#allocation71_spill] sm:$0xff] %v4638_v0  ;;  %943 = vperm.xlu0 %3910, %v4289_v8   ;;  %v4641_v48 = vpop.permute.xlu1 %693  ;;  %v4643_v37 = vpop.permute.xlu0 %699 }
 0x11f   : > { %7744 = vst [vmem:[#allocation72_spill] sm:$0xff] %v4641_v48 }
 0x120   : > { %7745 = vst [vmem:[#allocation73_spill] sm:$0xff] %v4643_v37 }
 0x125   : > { %940 = vperm.xlu2 %3909, %v4292_v9   ;;  %937 = vperm.xlu1 %3908, %v4274_v4   ;;  %v4647_v57 = vpop.permute.xlu2 %754 }
 0x126   : > { %7746 = vst [vmem:[#allocation74_spill] sm:$0xff] %v4647_v57  ;;  %952 = vperm.xlu0 %3910, %v4301_v11   ;;  %v4650_v60 = vpop.permute.xlu1 %702  ;;  %v4652_v1 = vpop.permute.xlu0 %708 }
 0x127   : > { %7747 = vst [vmem:[#allocation75_spill] sm:$0xff] %v4650_v60 }
 0x128   : > { %7748 = vst [vmem:[#allocation76_spill] sm:$0xff] %v4652_v1 }
 0x12d   : > { %949 = vperm.xlu2 %3909, %v4304_v12   ;;  %946 = vperm.xlu1 %3908, %v4286_v7   ;;  %v4656_v0 = vpop.permute.xlu2 %766  ;;  %v375_v7 = vlaneseq }
 0x12e   : > { %7749 = vst [vmem:[#allocation77_spill] sm:$0xff] %v4656_v0  ;;  %961 = vperm.xlu0 %3910, %v4313_v14   ;;  %v4659_v48 = vpop.permute.xlu1 %711  ;;  %v4661_v8 = vpop.permute.xlu0 %734 }
 0x12f   : > { %7750 = vst [vmem:[#allocation78_spill] sm:$0xff] %v4659_v48 }
 0x130   : > { %7751 = vst [vmem:[#allocation79_spill] sm:$0xff] %v4661_v8 }
 0x135   : > { %958 = vperm.xlu2 %3909, %v4316_v15   ;;  %955 = vperm.xlu1 %3908, %v4298_v10   ;;  %v4665_v57 = vpop.permute.xlu2 %778 }
 0x136   : > { %7752 = vst [vmem:[#allocation80_spill] sm:$0xff] %v4665_v57  ;;  %986 = vperm.xlu0 %3910, %v4331_v17   ;;  %v4668_v60 = vpop.permute.xlu1 %738  ;;  %v4670_v11 = vpop.permute.xlu0 %746  ;;  %v4681_v57 = vand.u32 127, %v375_v7 }
 0x137   : > { %7753 = vst [vmem:[#allocation81_spill] sm:$0xff] %v4668_v60 }
 0x138   : > { %7754 = vst [vmem:[#allocation82_spill] sm:$0xff] %v4670_v11  ;;  %vm427_vm0 = vcmp.eq.s32.totalorder %v4461_v50, %v4681_v57  ;;  %vm715_vm1 = vcmp.eq.s32.totalorder %v4589_v51, %v4681_v57  ;;  %vm7490_vm2 = vcmp.eq.s32.totalorder %v4431_v41, %v4681_v57  ;;  %vm7494_vm3 = vcmp.eq.s32.totalorder %v4625_v42, %v4681_v57  ;;  %v7768_v50 = vld [vmem:[#allocation15_spill] sm:$0xff]  ;;  %v7769_v51 = vld [vmem:[#allocation10_spill] sm:$0xff] }
 0x139   : > { %vm7480_vm4 = vcmp.eq.s32.totalorder %v4445_v45, %v4681_v57  ;;  %vm7481_vm5 = vcmp.eq.s32.totalorder %v4634_v59, %v4681_v57  ;;  %vm7478_vm6 = vcmp.eq.s32.totalorder %v4459_v49, %v4681_v57  ;;  %vm7479_vm7 = vcmp.eq.s32.totalorder %v4643_v37, %v4681_v57 }
 0x13a   : > { %vm7476_vm8 = vcmp.eq.s32.totalorder %v4477_v55, %v4681_v57  ;;  %vm7477_vm9 = vcmp.eq.s32.totalorder %v4652_v1, %v4681_v57 }
 0x13d   : > { %967 = vperm.xlu2 %3909, %v4334_v18   ;;  %964 = vperm.xlu1 %3908, %v4310_v13   ;;  %v4674_v0 = vpop.permute.xlu2 %790 }
 0x13e   : > { %7755 = vst [vmem:[#allocation83_spill] sm:$0xff] %v4674_v0  ;;  %998 = vperm.xlu0 %3910, %v4343_v20   ;;  %v4677_v8 = vpop.permute.xlu1 %750  ;;  %v4679_v48 = vpop.permute.xlu0 %758  ;;  %v635_v0 = vsel %vm427_vm0, %v4569_v62, 0.0 }
 0x13f   : > { %7756 = vst [vmem:[#allocation84_spill] sm:$0xff] %v4677_v8 }
 0x140   : > { %7757 = vst [vmem:[#allocation85_spill] sm:$0xff] %v4679_v48 }
 0x145   : > { %994 = vperm.xlu2 %3909, %v4346_v21   ;;  %990 = vperm.xlu1 %3908, %v4328_v16   ;;  %v835_v11 = vpop.permute.xlu2 %834 }
 0x146   : > { %1010 = vperm.xlu0 %3910, %v4355_v23   ;;  %v891_v7 = vsel %vm715_vm1, %v835_v11, 0.0  ;;  %v4697_v48 = vpop.permute.xlu1 %762  ;;  %v4699_v8 = vpop.permute.xlu0 %770  ;;  %v638_v11 = vsel %vm7490_vm2, %v4578_v58, 0.0 }
 0x147   : > { %7758 = vst [vmem:[#allocation86_spill] sm:$0xff] %v4697_v48  ;;  %v4701_v60 = vadd.f32 %v891_v7, %v635_v0 }
 0x148   : > { %7759 = vst [vmem:[#allocation87_spill] sm:$0xff] %v4699_v8 }
 0x14d   : > { %1006 = vperm.xlu2 %3909, %v4358_v24   ;;  %1002 = vperm.xlu1 %3908, %v4340_v19   ;;  %v847_v62 = vpop.permute.xlu2 %846 }
 0x14e   : > { %1022 = vperm.xlu0 %3910, %v4367_v26   ;;  %v894_v0 = vsel %vm7494_vm3, %v847_v62, 0.0  ;;  %v4717_v7 = vpop.permute.xlu1 %774  ;;  %v4719_v8 = vpop.permute.xlu0 %782  ;;  %v641_v62 = vsel %vm7480_vm4, %v4585_v56, 0.0 }
 0x14f   : > { %7760 = vst [vmem:[#allocation88_spill] sm:$0xff] %v4717_v7  ;;  %v4721_v48 = vadd.f32 %v894_v0, %v638_v11 }
 0x150   : > { %7761 = vst [vmem:[#allocation89_spill] sm:$0xff] %v4719_v8 }
 0x155   : > { %1018 = vperm.xlu2 %3909, %v4370_v27   ;;  %1014 = vperm.xlu1 %3908, %v4352_v22   ;;  %v859_v58 = vpop.permute.xlu2 %858 }
 0x156   : > { %1034 = vperm.xlu0 %3910, %v4379_v29   ;;  %v897_v11 = vsel %vm7481_vm5, %v859_v58, 0.0  ;;  %v4737_v0 = vpop.permute.xlu1 %786  ;;  %v4739_v8 = vpop.permute.xlu0 %826  ;;  %v644_v58 = vsel %vm7478_vm6, %v4594_v61, 0.0 }
 0x157   : > { %7762 = vst [vmem:[#allocation90_spill] sm:$0xff] %v4737_v0  ;;  %v4741_v7 = vadd.f32 %v897_v11, %v641_v62 }
 0x15d   : > { %1030 = vperm.xlu2 %3909, %v4382_v30   ;;  %1026 = vperm.xlu1 %3908, %v4364_v25   ;;  %v871_v56 = vpop.permute.xlu2 %870 }
 0x15e   : > { %1046 = vperm.xlu0 %3910, %v4397_v32   ;;  %v900_v62 = vsel %vm7479_vm7, %v871_v56, 0.0  ;;  %v4757_v11 = vpop.permute.xlu1 %830  ;;  %v4759_v0 = vpop.permute.xlu0 %838  ;;  %v647_v56 = vsel %vm7476_vm8, %v4603_v63, 0.0 }
 0x15f   : > { %v4761_v45 = vadd.f32 %v900_v62, %v644_v58 }
 0x165   : > { %1042 = vperm.xlu2 %3909, %v4400_v33   ;;  %1038 = vperm.xlu1 %3908, %v4376_v28   ;;  %v883_v61 = vpop.permute.xlu2 %882 }
 0x166   : > { %1090 = vperm.xlu0 %3910, %v4409_v35   ;;  %v903_v58 = vsel %vm7477_vm9, %v883_v61, 0.0  ;;  %v4777_v62 = vpop.permute.xlu1 %842  ;;  %v4779_v49 = vpop.permute.xlu0 %850 }
 0x167   : > { %v4781_v37 = vadd.f32 %v903_v58, %v647_v56 }
 0x16d   : > { %1086 = vperm.xlu2 %3909, %v4412_v36   ;;  %1082 = vperm.xlu1 %3908, %v4394_v31  }
 0x16e   : > { %1102 = vperm.xlu0 %3910, %v4423_v39   ;;  %v4786_v55 = vpop.permute.xlu1 %854  ;;  %v4788_v63 = vpop.permute.xlu0 %862 }
 0x16f   : > { %v4790_v59 = vpop.permute.xlu2 %925 }
 0x170   : > { %7763 = vst [vmem:[#allocation91_spill] sm:$0xff] %v4790_v59  ;;  %vm970_vm12 = vcmp.eq.s32.totalorder %v4790_v59, %v4681_v57  ;;  %v5353_v59 = vld [vmem:[%s4325_s10 + $0x28] sm:$0xff] }
 0x175   : > { %1098 = vperm.xlu2 %3909, %v4426_v40   ;;  %1094 = vperm.xlu1 %3908, %v4406_v34  }
 0x176   : > { %1114 = vperm.xlu0 %3910, %v4437_v43   ;;  %v4795_v61 = vpop.permute.xlu1 %866  ;;  %v4797_v56 = vpop.permute.xlu0 %874 }
 0x177   : > { %7764 = vst [vmem:[#allocation92_spill] sm:$0xff] %v4797_v56  ;;  %v4799_v58 = vpop.permute.xlu2 %934 }
 0x178   : > { %7765 = vst [vmem:[#allocation93_spill] sm:$0xff] %v4799_v58  ;;  %vm7486_vm15 = vcmp.eq.s32.totalorder %v4799_v58, %v4681_v57  ;;  %v5252_v58 = vld [vmem:[%s4325_s10 + $0x8] sm:$0xff] }
 0x17d   : > { %1110 = vperm.xlu2 %3909, %v4440_v44   ;;  %1106 = vperm.xlu1 %3908, %v4420_v38  }
 0x17e   : > { %1126 = vperm.xlu0 %3910, %v4451_v47   ;;  %v4804_v1 = vpop.permute.xlu1 %878  ;;  %v4806_v41 = vpop.permute.xlu0 %886  ;;  %v4197_v47 = vmov 3  }
 0x17f   : > { %7766 = vst [vmem:[#allocation94_spill] sm:$0xff] %v4806_v41  ;;  %v4808_v42 = vpop.permute.xlu2 %940 }
 0x180   : > { %7767 = vst [vmem:[#allocation95_spill] sm:$0xff] %v4808_v42 }
 0x185   : > { %1122 = vperm.xlu2 %3909, %v7768_v50   ;;  %1118 = vperm.xlu1 %3908, %v7769_v51  }
 0x186   : > { %1138 = vperm.xlu0 %3910, %v4469_v53  }
 0x187   : > { %v4813_v43 = vpop.permute.xlu2 %949  ;;  %v4815_v39 = vpop.permute.xlu1 %922 }
 0x188   : > { %7770 = vst [vmem:[#allocation15_spill] sm:$0xff] %v4813_v43  ;;  %v4817_v56 = vpop.permute.xlu0 %928 }
 0x189   : > { %7771 = vst [vmem:[#allocation96_spill] sm:$0xff] %v4815_v39  ;;  %vm7560_vm7 = vcmp.eq.s32.totalorder %v4817_v56, %v4681_v57 }
 0x18a   : > { %7772 = vst [vmem:[#allocation97_spill] sm:$0xff] %v4817_v56  ;;  %v5280_v56 = vld [vmem:[%s4259_s30 + $0x68] sm:$0xff] }
 0x18d   : > { %1134 = vperm.xlu2 %3909, %v4472_v54   ;;  %1130 = vperm.xlu1 %3908, %v4448_v46  }
 0x18e   : > { %3912 = vset.pattern.permute.xlu0 %v4197_v47 }
 0x18f   : > { %1181 = vperm.xlu0 %3912, %v4280_v6   ;;  %v4822_v41 = vpop.permute.xlu2 %958  ;;  %v4824_v38 = vpop.permute.xlu1 %931 }
 0x190   : > { %7773 = vst [vmem:[#allocation98_spill] sm:$0xff] %v4822_v41  ;;  %v4826_v51 = vpop.permute.xlu0 %943 }
 0x191   : > { %7774 = vst [vmem:[#allocation99_spill] sm:$0xff] %v4824_v38  ;;  %vm7482_vm6 = vcmp.eq.s32.totalorder %v4826_v51, %v4681_v57 }
 0x192   : > { %7775 = vst [vmem:[#allocation100_spill] sm:$0xff] %v4826_v51  ;;  %v5226_v51 = vld [vmem:[%s4259_s30 + $0x20] sm:$0xff] }
 0x195   : > { %3911 = vset.pattern.permute.xlu2 %v4197_v47  ;;  %1142 = vperm.xlu1 %3908, %v4466_v52  }
 0x196   : > { %1178 = vperm.xlu2 %3911, %v4268_v3  }
 0x197   : > { %1196 = vperm.xlu0 %3912, %v4292_v9   ;;  %v4831_v53 = vpop.permute.xlu2 %967  ;;  %v4833_v46 = vpop.permute.xlu1 %937  ;;  %v7782_v9 = vld [vmem:[#allocation2_spill] sm:$0xff] }
 0x198   : > { %7776 = vst [vmem:[#allocation101_spill] sm:$0xff] %v4831_v53  ;;  %v4835_v54 = vpop.permute.xlu0 %952 }
 0x199   : > { %7777 = vst [vmem:[#allocation102_spill] sm:$0xff] %v4833_v46 }
 0x19a   : > { %7778 = vst [vmem:[#allocation103_spill] sm:$0xff] %v4835_v54 }
 0x19d   : > { %3913 = vset.pattern.permute.xlu1 %v4197_v47 }
 0x19e   : > { %1187 = vperm.xlu2 %3911, %v4277_v5   ;;  %1184 = vperm.xlu1 %3913, %v4265_v2   ;;  %v7786_v2 = vld [vmem:[#allocation3_spill] sm:$0xff] }
 0x19f   : > { %1205 = vperm.xlu0 %3912, %v4304_v12   ;;  %v4840_v6 = vpop.permute.xlu2 %994  ;;  %v4842_v52 = vpop.permute.xlu1 %946  ;;  %v7787_v12 = vld [vmem:[#allocation4_spill] sm:$0xff] }
 0x1a0   : > { %7779 = vst [vmem:[#allocation104_spill] sm:$0xff] %v4840_v6  ;;  %v4844_v3 = vpop.permute.xlu0 %961  ;;  %vm7497_vm3 = vcmp.eq.s32.totalorder %v4842_v52, %v4681_v57 }
 0x1a1   : > { %7780 = vst [vmem:[#allocation105_spill] sm:$0xff] %v4842_v52  ;;  %v5208_v52 = vld [vmem:[%s4259_s30 + $0x10] sm:$0xff] }
 0x1a2   : > { %7781 = vst [vmem:[#allocation106_spill] sm:$0xff] %v4844_v3 }
 0x1a6   : > { %1193 = vperm.xlu2 %3911, %v4274_v4   ;;  %1190 = vperm.xlu1 %3913, %v7782_v9  }
 0x1a7   : > { %1214 = vperm.xlu0 %3912, %v4316_v15   ;;  %v4849_v53 = vpop.permute.xlu2 %1006  ;;  %v4851_v47 = vpop.permute.xlu1 %955  ;;  %v7791_v15 = vld [vmem:[#allocation5_spill] sm:$0xff] }
 0x1a8   : > { %7783 = vst [vmem:[#allocation2_spill] sm:$0xff] %v4849_v53  ;;  %v4853_v5 = vpop.permute.xlu0 %986 }
 0x1a9   : > { %7784 = vst [vmem:[#allocation107_spill] sm:$0xff] %v4851_v47 }
 0x1aa   : > { %7785 = vst [vmem:[#allocation108_spill] sm:$0xff] %v4853_v5  ;;  %v5323_v5 = vld [vmem:[%s4325_s10 + $0x10] sm:$0xff] }
 0x1ae   : > { %1202 = vperm.xlu2 %3911, %v7786_v2   ;;  %1199 = vperm.xlu1 %3913, %v7787_v12  }
 0x1af   : > { %1223 = vperm.xlu0 %3912, %v4334_v18   ;;  %v4858_v6 = vpop.permute.xlu2 %1018  ;;  %v4860_v41 = vpop.permute.xlu1 %964 }
 0x1b0   : > { %7788 = vst [vmem:[#allocation3_spill] sm:$0xff] %v4858_v6  ;;  %v4862_v4 = vpop.permute.xlu0 %998 }
 0x1b1   : > { %7789 = vst [vmem:[#allocation4_spill] sm:$0xff] %v4860_v41 }
 0x1b2   : > { %7790 = vst [vmem:[#allocation109_spill] sm:$0xff] %v4862_v4 }
 0x1b6   : > { %1211 = vperm.xlu2 %3911, %v4298_v10   ;;  %1208 = vperm.xlu1 %3913, %v7791_v15   ;;  %v7798_v15 = vld [vmem:[#allocation63_spill] sm:$0xff] }
 0x1b7   : > { %1250 = vperm.xlu0 %3912, %v4346_v21   ;;  %v4867_v9 = vpop.permute.xlu2 %1030  ;;  %v4869_v53 = vpop.permute.xlu1 %990  ;;  %v7797_v21 = vld [vmem:[#allocation24_spill] sm:$0xff]  ;;  %vm714_vm11 = vcmp.eq.s32.totalorder %v7798_v15, %v4681_v57 }
 0x1b8   : > { %7792 = vst [vmem:[#allocation5_spill] sm:$0xff] %v4867_v9  ;;  %v4871_v2 = vpop.permute.xlu0 %1010  ;;  %vm426_vm10 = vcmp.eq.s32.totalorder %v7797_v21, %v4681_v57  ;;  %v7799_v9 = vld [vmem:[#allocation53_spill] sm:$0xff]  ;;  %v1050_v15 = vsel %vm970_vm12, %v4869_v53, 0.0 }
 0x1b9   : > { %7793 = vst [vmem:[#allocation110_spill] sm:$0xff] %v4871_v2 }
 0x1be   : > { %1220 = vperm.xlu2 %3911, %v4310_v13   ;;  %1217 = vperm.xlu1 %3913, %v4313_v14   ;;  %v634_v13 = vsel %vm426_vm10, %v7799_v9, 0.0  ;;  %v890_v14 = vsel %vm714_vm11, %v4757_v11, 0.0 }
 0x1bf   : > { %1262 = vperm.xlu0 %3912, %v4358_v24   ;;  %v4876_v18 = vpop.permute.xlu2 %1042  ;;  %v4878_v12 = vpop.permute.xlu1 %1002  ;;  %v906_v24 = vadd.f32 %v890_v14, %v634_v13  ;;  %v7804_v13 = vld [vmem:[#allocation55_spill] sm:$0xff] }
 0x1c0   : > { %7794 = vst [vmem:[#allocation111_spill] sm:$0xff] %v4876_v18  ;;  %v4880_v10 = vpop.permute.xlu0 %1022 }
 0x1c1   : > { %7795 = vst [vmem:[#allocation112_spill] sm:$0xff] %v4878_v12 }
 0x1c2   : > { %7796 = vst [vmem:[#allocation113_spill] sm:$0xff] %v4880_v10 }
 0x1c6   : > { %1246 = vperm.xlu2 %3911, %v4328_v16   ;;  %1242 = vperm.xlu1 %3913, %v4331_v17   ;;  %v7802_v16 = vld [vmem:[#allocation59_spill] sm:$0xff] }
 0x1c7   : > { %1274 = vperm.xlu0 %3912, %v4370_v27   ;;  %v1087_v18 = vpop.permute.xlu2 %1086  ;;  %v4899_v10 = vpop.permute.xlu1 %1014  ;;  %vm7552_vm13 = vcmp.eq.s32.totalorder %v7802_v16, %v4681_v57  ;;  %v7803_v27 = vld [vmem:[#allocation6_spill] sm:$0xff]  ;;  %v5266_v16 = vld [vmem:[%s4259_s30 + $0x48] sm:$0xff] }
 0x1c8   : > { %7800 = vst [vmem:[#allocation24_spill] sm:$0xff] %v4899_v10  ;;  %v1146_v9 = vsel %vm970_vm12, %v1087_v18, 0.0  ;;  %v4904_v6 = vpop.permute.xlu0 %1034  ;;  %v893_v17 = vsel %vm7552_vm13, %v4777_v62, 0.0  ;;  %vm7492_vm14 = vcmp.eq.s32.totalorder %v7803_v27, %v4681_v57  ;;  %v5230_v10 = vld [vmem:[%s4259_s30 + $0x18] sm:$0xff]  ;;  %v5262_v27 = vld [vmem:[%s4259_s30 + $0x50] sm:$0xff] }
 0x1c9   : > { %7801 = vst [vmem:[#allocation63_spill] sm:$0xff] %v4904_v6  ;;  %v4906_v11 = vadd.f32 %v1146_v9, %v906_v24  ;;  %v637_v18 = vsel %vm7492_vm14, %v7804_v13, 0.0  ;;  %vm7496_vm14 = vcmp.eq.s32.totalorder %v4844_v3, %v4681_v57 }
 0x1ca   : > { %v909_v14 = vadd.f32 %v893_v17, %v637_v18  ;;  %v7809_v17 = vld [vmem:[#allocation56_spill] sm:$0xff]  ;;  %7869 = vst [vmem:[#allocation115_spill] sm:$0xff] %v5262_v27 }
 0x1ce   : > { %1258 = vperm.xlu2 %3911, %v4340_v19   ;;  %1254 = vperm.xlu1 %3913, %v4343_v20   ;;  %v7807_v19 = vld [vmem:[#allocation61_spill] sm:$0xff] }
 0x1cf   : > { %1286 = vperm.xlu0 %3912, %v4382_v30   ;;  %v1099_v24 = vpop.permute.xlu2 %1098  ;;  %v4925_v62 = vpop.permute.xlu1 %1026  ;;  %vm7485_vm8 = vcmp.eq.s32.totalorder %v7807_v19, %v4681_v57  ;;  %v7808_v30 = vld [vmem:[#allocation26_spill] sm:$0xff]  ;;  %v5244_v19 = vld [vmem:[%s4259_s30 + $0x38] sm:$0xff] }
 0x1d0   : > { %7805 = vst [vmem:[#allocation53_spill] sm:$0xff] %v4925_v62  ;;  %v1149_v9 = vsel %vm7486_vm15, %v1099_v24, 0.0  ;;  %v4930_v6 = vpop.permute.xlu0 %1046  ;;  %v896_v20 = vsel %vm7485_vm8, %v4786_v55, 0.0  ;;  %vm7483_vm9 = vcmp.eq.s32.totalorder %v7808_v30, %v4681_v57  ;;  %vm7488_vm8 = vcmp.eq.s32.totalorder %v4835_v54, %v4681_v57  ;;  %v5234_v30 = vld [vmem:[%s4259_s30 + $0x70] sm:$0xff] }
 0x1d1   : > { %7806 = vst [vmem:[#allocation55_spill] sm:$0xff] %v4930_v6  ;;  %v4932_v13 = vadd.f32 %v1149_v9, %v909_v14  ;;  %v640_v18 = vsel %vm7483_vm9, %v7809_v17, 0.0  ;;  %v7816_v6 = vld [vmem:[#allocation58_spill] sm:$0xff]  ;;  %vm7489_vm15 = vcmp.eq.s32.totalorder %v4833_v46, %v4681_v57  ;;  %v4198_v54 = vmov 4  }
 0x1d2   : > { %v912_v14 = vadd.f32 %v896_v20, %v640_v18  ;;  %v7812_v18 = vld [vmem:[#allocation64_spill] sm:$0xff] }
 0x1d3   : > { %vm713_vm5 = vcmp.eq.s32.totalorder %v7812_v18, %v4681_v57 }
 0x1d6   : > { %1270 = vperm.xlu2 %3911, %v4352_v22   ;;  %1266 = vperm.xlu1 %3913, %v4355_v23  }
 0x1d7   : > { %1298 = vperm.xlu0 %3912, %v4400_v33   ;;  %v1111_v24 = vpop.permute.xlu2 %1110  ;;  %v4951_v55 = vpop.permute.xlu1 %1038  ;;  %v7811_v33 = vld [vmem:[#allocation62_spill] sm:$0xff] }
 0x1d8   : > { %7810 = vst [vmem:[#allocation56_spill] sm:$0xff] %v4951_v55  ;;  %v1152_v9 = vsel %vm7482_vm6, %v1111_v24, 0.0  ;;  %v1091_v17 = vpop.permute.xlu0 %1090  ;;  %vm7484_vm4 = vcmp.eq.s32.totalorder %v7811_v33, %v4681_v57  ;;  %v889_v24 = vsel %vm713_vm5, %v4739_v8, 0.0 }
 0x1d9   : > { %v4958_v22 = vadd.f32 %v1152_v9, %v912_v14  ;;  %v1147_v23 = vsel %vm7560_vm7, %v1091_v17, 0.0  ;;  %v899_v14 = vsel %vm7484_vm4, %v4795_v61, 0.0  ;;  %v7813_v9 = vld [vmem:[#allocation18_spill] sm:$0xff]  ;;  %v7815_v17 = vld [vmem:[#allocation40_spill] sm:$0xff]  ;;  %vm969_vm4 = vcmp.eq.s32.totalorder %v4815_v39, %v4681_v57 }
 0x1da   : > { %v4964_v20 = vadd.f32 %v1147_v23, %v4701_v60  ;;  %vm425_vm6 = vcmp.eq.s32.totalorder %v7813_v9, %v4681_v57  ;;  %v7814_v60 = vld [vmem:[#allocation29_spill] sm:$0xff] }
 0x1db   : > { %vm7487_vm9 = vcmp.eq.s32.totalorder %v7814_v60, %v4681_v57  ;;  %v633_v23 = vsel %vm425_vm6, %v7815_v17, 0.0 }
 0x1dc   : > { %v643_v8 = vsel %vm7487_vm9, %v7816_v6, 0.0  ;;  %v905_v61 = vadd.f32 %v889_v24, %v633_v23 }
 0x1dd   : > { %v915_v55 = vadd.f32 %v899_v14, %v643_v8  ;;  %v7817_v8 = vld [vmem:[#allocation65_spill] sm:$0xff] }
 0x1de   : > { %1282 = vperm.xlu2 %3911, %v4364_v25   ;;  %1278 = vperm.xlu1 %3913, %v4367_v26   ;;  %vm7491_vm9 = vcmp.eq.s32.totalorder %v7817_v8, %v4681_v57 }
 0x1df   : > { %1342 = vperm.xlu0 %3912, %v4412_v36   ;;  %v1123_v17 = vpop.permute.xlu2 %1122  ;;  %v1083_v62 = vpop.permute.xlu1 %1082 }
 0x1e0   : > { %v1155_v25 = vsel %vm7488_vm8, %v1123_v17, 0.0  ;;  %v1145_v26 = vsel %vm969_vm4, %v1083_v62, 0.0  ;;  %v1103_v6 = vpop.permute.xlu0 %1102  ;;  %v7818_v17 = vld [vmem:[#allocation66_spill] sm:$0xff] }
 0x1e1   : > { %v5005_v24 = vadd.f32 %v1155_v25, %v915_v55  ;;  %v5007_v14 = vadd.f32 %v1145_v26, %v905_v61  ;;  %v1150_v36 = vsel %vm7489_vm15, %v1103_v6, 0.0  ;;  %vm716_vm8 = vcmp.eq.s32.totalorder %v7818_v17, %v4681_v57  ;;  %v7819_v61 = vld [vmem:[#allocation23_spill] sm:$0xff]  ;;  %v7822_v6 = vld [vmem:[#allocation60_spill] sm:$0xff]  ;;  %v4134_v17 = vld [vmem:[%s4259_s30 + $0x78] sm:$0xff] }
 0x1e2   : > { %v5013_v23 = vadd.f32 %v1150_v36, %v4721_v48  ;;  %v892_v62 = vsel %vm716_vm8, %v4759_v0, 0.0  ;;  %v902_v55 = vsel %vm7491_vm9, %v4804_v1, 0.0  ;;  %vm428_vm15 = vcmp.eq.s32.totalorder %v7819_v61, %v4681_v57  ;;  %v7820_v48 = vld [vmem:[#allocation32_spill] sm:$0xff]  ;;  %v7821_v25 = vld [vmem:[#allocation43_spill] sm:$0xff] }
 0x1e3   : > { %vm7495_vm2 = vcmp.eq.s32.totalorder %v7820_v48, %v4681_v57  ;;  %v636_v26 = vsel %vm428_vm15, %v7821_v25, 0.0  ;;  %vm972_vm9 = vcmp.eq.s32.totalorder %v4824_v38, %v4681_v57  ;;  %v5288_v38 = vld [vmem:[%s4325_s10 + $0x38] sm:$0xff] }
 0x1e4   : > { %v646_v0 = vsel %vm7495_vm2, %v7822_v6, 0.0  ;;  %v908_v1 = vadd.f32 %v892_v62, %v636_v26 }
 0x1e5   : > { %v918_v36 = vadd.f32 %v902_v55, %v646_v0  ;;  %v7823_v0 = vld [vmem:[#allocation69_spill] sm:$0xff] }
 0x1e6   : > { %1294 = vperm.xlu2 %3911, %v4376_v28   ;;  %1290 = vperm.xlu1 %3913, %v4379_v29   ;;  %vm7498_vm2 = vcmp.eq.s32.totalorder %v7823_v0, %v4681_v57  ;;  %v5248_v0 = vld [vmem:[%s4259_s30 + $0x30] sm:$0xff] }
 0x1e7   : > { %1354 = vperm.xlu0 %3912, %v4426_v40   ;;  %v1135_v25 = vpop.permute.xlu2 %1134  ;;  %v1095_v8 = vpop.permute.xlu1 %1094 }
 0x1e8   : > { %v1158_v28 = vsel %vm7496_vm14, %v1135_v25, 0.0  ;;  %v1148_v29 = vsel %vm972_vm9, %v1095_v8, 0.0  ;;  %v1115_v62 = vpop.permute.xlu0 %1114  ;;  %v895_v8 = vsel %vm7498_vm2, %v4779_v49, 0.0  ;;  %vm7501_vm2 = vcmp.eq.s32.totalorder %v4851_v47, %v4681_v57  ;;  %v5174_v47 = vld [vmem:[%s4259_s30] sm:$0xff] }
 0x1e9   : > { %v5054_v55 = vadd.f32 %v1158_v28, %v918_v36  ;;  %v5056_v26 = vadd.f32 %v1148_v29, %v908_v1  ;;  %v1153_v40 = vsel %vm7497_vm3, %v1115_v62, 0.0  ;;  %v7824_v36 = vld [vmem:[#allocation27_spill] sm:$0xff]  ;;  %v7825_v1 = vld [vmem:[#allocation46_spill] sm:$0xff]  ;;  %vm7500_vm3 = vcmp.eq.s32.totalorder %v4808_v42, %v4681_v57 }
 0x1ea   : > { %v5062_v6 = vadd.f32 %v1153_v40, %v4741_v7  ;;  %vm7499_vm14 = vcmp.eq.s32.totalorder %v7824_v36, %v4681_v57 }
 0x1eb   : > { %v639_v25 = vsel %vm7499_vm14, %v7825_v1, 0.0  ;;  %v7828_v1 = vld [vmem:[#allocation30_spill] sm:$0xff] }
 0x1ec   : > { %v911_v7 = vadd.f32 %v895_v8, %v639_v25  ;;  %v7829_v25 = vld [vmem:[#allocation49_spill] sm:$0xff] }
 0x1ee   : > { %1338 = vperm.xlu2 %3911, %v4394_v31   ;;  %1302 = vperm.xlu1 %3913, %v4397_v32  }
 0x1ef   : > { %1366 = vperm.xlu0 %3912, %v4440_v44   ;;  %v1107_v28 = vpop.permute.xlu1 %1106  ;;  %v7827_v44 = vld [vmem:[#allocation72_spill] sm:$0xff] }
 0x1f0   : > { %v1151_v49 = vsel %vm7500_vm3, %v1107_v28, 0.0  ;;  %v1127_v29 = vpop.permute.xlu0 %1126  ;;  %v5086_v62 = vpop.permute.xlu2 %1178  ;;  %vm7502_vm14 = vcmp.eq.s32.totalorder %v7827_v44, %v4681_v57  ;;  %vm7503_vm3 = vcmp.eq.s32.totalorder %v7828_v1, %v4681_v57 }
 0x1f1   : > { %7826 = vst [vmem:[#allocation64_spill] sm:$0xff] %v5086_v62  ;;  %v5088_v31 = vadd.f32 %v1151_v49, %v911_v7  ;;  %v1156_v32 = vsel %vm7501_vm2, %v1127_v29, 0.0  ;;  %v898_v8 = vsel %vm7502_vm14, %v4788_v63, 0.0  ;;  %v642_v7 = vsel %vm7503_vm3, %v7829_v25, 0.0 }
 0x1f2   : > { %v5094_v40 = vadd.f32 %v1156_v32, %v4761_v45  ;;  %v914_v45 = vadd.f32 %v898_v8, %v642_v7  ;;  %vm7504_vm2 = vcmp.eq.s32.totalorder %v4813_v43, %v4681_v57  ;;  %vm7505_vm14 = vcmp.eq.s32.totalorder %v4860_v41, %v4681_v57  ;;  %v7832_v8 = vld [vmem:[#allocation92_spill] sm:$0xff]  ;;  %v7833_v7 = vld [vmem:[#allocation33_spill] sm:$0xff] }
 0x1f3   : > { %v7838_v41 = vld [vmem:[#allocation21_spill] sm:$0xff] }
 0x1f6   : > { %1350 = vperm.xlu2 %3911, %v4406_v34   ;;  %1346 = vperm.xlu1 %3913, %v4409_v35  }
 0x1f7   : > { %1378 = vperm.xlu0 %3912, %v7768_v50   ;;  %v1119_v28 = vpop.permute.xlu1 %1118  ;;  %v7831_v50 = vld [vmem:[#allocation75_spill] sm:$0xff] }
 0x1f8   : > { %v1154_v63 = vsel %vm7504_vm2, %v1119_v28, 0.0  ;;  %v1139_v49 = vpop.permute.xlu0 %1138  ;;  %v5118_v29 = vpop.permute.xlu2 %1187  ;;  %vm7511_vm3 = vcmp.eq.s32.totalorder %v7831_v50, %v4681_v57  ;;  %vm7510_vm2 = vcmp.eq.s32.totalorder %v7833_v7, %v4681_v57  ;;  %v7846_v50 = vld [vmem:[#allocation101_spill] sm:$0xff] }
 0x1f9   : > { %7830 = vst [vmem:[#allocation40_spill] sm:$0xff] %v5118_v29  ;;  %v5120_v34 = vadd.f32 %v1154_v63, %v914_v45  ;;  %v1159_v35 = vsel %vm7505_vm14, %v1139_v49, 0.0  ;;  %v901_v25 = vsel %vm7511_vm3, %v7832_v8, 0.0  ;;  %v7834_v45 = vld [vmem:[#allocation52_spill] sm:$0xff]  ;;  %v7835_v63 = vld [vmem:[#allocation7_spill] sm:$0xff] }
 0x1fa   : > { %v5126_v32 = vadd.f32 %v1159_v35, %v4781_v37  ;;  %v645_v28 = vsel %vm7510_vm2, %v7834_v45, 0.0  ;;  %v7836_v37 = vld [vmem:[#allocation8_spill] sm:$0xff]  ;;  %v7837_v35 = vld [vmem:[#allocation98_spill] sm:$0xff] }
 0x1fb   : > { %v917_v49 = vadd.f32 %v901_v25, %v645_v28  ;;  %vm7514_vm14 = vcmp.eq.s32.totalorder %v7837_v35, %v4681_v57  ;;  %v7841_v25 = vld [vmem:[#allocation94_spill] sm:$0xff]  ;;  %v7842_v28 = vld [vmem:[#allocation36_spill] sm:$0xff] }
 0x1fc   : > { %vm7546_vm3 = vcmp.eq.s32.totalorder %v7842_v28, %v4681_v57  ;;  %v5186_v28 = vld [vmem:[%s4259_s30 + $0x28] sm:$0xff] }
 0x1fe   : > { %1362 = vperm.xlu2 %3911, %v7835_v63   ;;  %1358 = vperm.xlu1 %3913, %v7836_v37   ;;  %v7840_v63 = vld [vmem:[#allocation78_spill] sm:$0xff] }
 0x1ff   : > { %1390 = vperm.xlu0 %3912, %v7838_v41   ;;  %v1131_v3 = vpop.permute.xlu1 %1130  ;;  %vm7547_vm2 = vcmp.eq.s32.totalorder %v7840_v63, %v4681_v57  ;;  %v7843_v37 = vld [vmem:[#allocation54_spill] sm:$0xff] }
 0x200   : > { %v1157_v8 = vsel %vm7514_vm14, %v1131_v3, 0.0  ;;  %v5148_v48 = vpop.permute.xlu2 %1193  ;;  %v904_v41 = vsel %vm7547_vm2, %v7841_v25, 0.0  ;;  %v648_v3 = vsel %vm7546_vm3, %v7843_v37, 0.0  ;;  %vm7544_vm14 = vcmp.eq.s32.totalorder %v7846_v50, %v4681_v57 }
 0x201   : > { %7839 = vst [vmem:[#allocation58_spill] sm:$0xff] %v5148_v48  ;;  %v5150_v7 = vadd.f32 %v1157_v8, %v917_v49  ;;  %v5152_v45 = vpop.permute.xlu0 %1181  ;;  %v7844_v49 = vld [vmem:[#allocation10_spill] sm:$0xff]  ;;  %v7845_v8 = vld [vmem:[#allocation11_spill] sm:$0xff]  ;;  %v920_v35 = vadd.f32 %v904_v41, %v648_v3  ;;  %v7849_v3 = vld [vmem:[#allocation13_spill] sm:$0xff]  ;;  %vm7553_vm3 = vcmp.eq.s32.totalorder %v5118_v29, %v4681_v57 }
 0x202   : > { %vm1226_vm2 = vcmp.eq.s32.totalorder %v5152_v45, %v4681_v57  ;;  %v5380_v29 = vld [vmem:[%s4325_s10 + $0x40] sm:$0xff] }
 0x203   : > { %7884 = vst [vmem:[#allocation130_spill] sm:$0xff] %v5380_v29 }
 0x206   : > { %1374 = vperm.xlu2 %3911, %v7844_v49   ;;  %1370 = vperm.xlu1 %3913, %v7845_v8   ;;  %v7850_v8 = vld [vmem:[#allocation14_spill] sm:$0xff] }
 0x207   : > { %3914 = vset.pattern.permute.xlu0 %v4198_v54  ;;  %v1143_v25 = vpop.permute.xlu1 %1142 }
 0x208   : > { %v1160_v63 = vsel %vm7544_vm14, %v1143_v25, 0.0  ;;  %1434 = vperm.xlu0 %3914, %v5174_v47   ;;  %v5177_v37 = vpop.permute.xlu2 %1202  ;;  %vm1225_vm14 = vcmp.eq.s32.totalorder %v5086_v62, %v4681_v57 }
 0x209   : > { %7847 = vst [vmem:[#allocation43_spill] sm:$0xff] %v5177_v37  ;;  %v5179_v49 = vadd.f32 %v1160_v63, %v920_v35  ;;  %v5181_v41 = vpop.permute.xlu0 %1196  ;;  %v7854_v35 = vld [vmem:[#allocation19_spill] sm:$0xff]  ;;  %v7855_v63 = vld [vmem:[#allocation20_spill] sm:$0xff] }
 0x20a   : > { %7848 = vst [vmem:[#allocation60_spill] sm:$0xff] %v5181_v41  ;;  %vm7555_vm13 = vcmp.eq.s32.totalorder %v5181_v41, %v4681_v57 }
 0x20e   : > { %1386 = vperm.xlu2 %3911, %v7849_v3   ;;  %1382 = vperm.xlu1 %3913, %v7850_v8   ;;  %v5198_v3 = vld [vmem:[%s4259_s30 + $0x40] sm:$0xff] }
 0x210   : > { %1449 = vperm.xlu0 %3914, %v5186_v28   ;;  %v5189_v25 = vpop.permute.xlu2 %1211  ;;  %v5191_v50 = vpop.permute.xlu1 %1184 }
 0x211   : > { %7851 = vst [vmem:[#allocation46_spill] sm:$0xff] %v5189_v25  ;;  %v5193_v60 = vpop.permute.xlu0 %1205 }
 0x212   : > { %7852 = vst [vmem:[#allocation49_spill] sm:$0xff] %v5191_v50 }
 0x213   : > { %7853 = vst [vmem:[#allocation92_spill] sm:$0xff] %v5193_v60 }
 0x216   : > { %1398 = vperm.xlu2 %3911, %v7854_v35   ;;  %1394 = vperm.xlu1 %3913, %v7855_v63   ;;  %v5212_v35 = vld [vmem:[%s4259_s30 + $0x8] sm:$0xff]  ;;  %v5216_v63 = vld [vmem:[%s4259_s30 + $0x58] sm:$0xff] }
 0x217   : > { %7859 = vst [vmem:[#allocation21_spill] sm:$0xff] %v5216_v63 }
 0x218   : > { %1458 = vperm.xlu0 %3914, %v5198_v3   ;;  %v5201_v8 = vpop.permute.xlu2 %1220  ;;  %v5203_v33 = vpop.permute.xlu1 %1190 }
 0x219   : > { %7856 = vst [vmem:[#allocation52_spill] sm:$0xff] %v5201_v8  ;;  %v5205_v43 = vpop.permute.xlu0 %1214 }
 0x21a   : > { %7857 = vst [vmem:[#allocation7_spill] sm:$0xff] %v5203_v33  ;;  %vm7566_vm7 = vcmp.eq.s32.totalorder %v5205_v43, %v4681_v57 }
 0x21b   : > { %7858 = vst [vmem:[#allocation8_spill] sm:$0xff] %v5205_v43  ;;  %v5442_v43 = vld [vmem:[%s4325_s10 + $0x78] sm:$0xff] }
 0x21e   : > { %3916 = vset.pattern.permute.xlu2 %v4198_v54  ;;  %3915 = vset.pattern.permute.xlu1 %v4198_v54 }
 0x21f   : > { %1440 = vperm.xlu2 %3916, %v5208_v52   ;;  %1437 = vperm.xlu1 %3915, %v5212_v35  }
 0x220   : > { %1467 = vperm.xlu0 %3914, %v5216_v63   ;;  %v5219_v1 = vpop.permute.xlu2 %1246  ;;  %v5221_v44 = vpop.permute.xlu1 %1199  ;;  %v5270_v63 = vld [vmem:[%s4325_s10 + $0x20] sm:$0xff] }
 0x221   : > { %7860 = vst [vmem:[#allocation94_spill] sm:$0xff] %v5219_v1  ;;  %v5223_v54 = vpop.permute.xlu0 %1223 }
 0x222   : > { %7861 = vst [vmem:[#allocation54_spill] sm:$0xff] %v5221_v44 }
 0x223   : > { %7862 = vst [vmem:[#allocation10_spill] sm:$0xff] %v5223_v54 }
 0x227   : > { %1446 = vperm.xlu2 %3916, %v5226_v51   ;;  %1443 = vperm.xlu1 %3915, %v5230_v10  }
 0x228   : > { %1476 = vperm.xlu0 %3914, %v5234_v30   ;;  %v5237_v42 = vpop.permute.xlu2 %1258  ;;  %v5239_v2 = vpop.permute.xlu1 %1208 }
 0x229   : > { %7863 = vst [vmem:[#allocation11_spill] sm:$0xff] %v5237_v42  ;;  %v5241_v36 = vpop.permute.xlu0 %1250 }
 0x22a   : > { %7864 = vst [vmem:[#allocation13_spill] sm:$0xff] %v5239_v2 }
 0x22b   : > { %7865 = vst [vmem:[#allocation14_spill] sm:$0xff] %v5241_v36 }
 0x22f   : > { %1455 = vperm.xlu2 %3916, %v5244_v19   ;;  %1452 = vperm.xlu1 %3915, %v5248_v0  }
 0x230   : > { %1502 = vperm.xlu0 %3914, %v5252_v58   ;;  %v5255_v42 = vpop.permute.xlu2 %1270  ;;  %v5257_v12 = vpop.permute.xlu1 %1217 }
 0x231   : > { %7866 = vst [vmem:[#allocation19_spill] sm:$0xff] %v5255_v42  ;;  %v5259_v46 = vpop.permute.xlu0 %1262 }
 0x232   : > { %7867 = vst [vmem:[#allocation20_spill] sm:$0xff] %v5257_v12 }
 0x233   : > { %7868 = vst [vmem:[#allocation114_spill] sm:$0xff] %v5259_v46 }
 0x237   : > { %1464 = vperm.xlu2 %3916, %v5262_v27   ;;  %1461 = vperm.xlu1 %3915, %v5266_v16   ;;  %v5284_v27 = vld [vmem:[%s4259_s30 + $0x60] sm:$0xff] }
 0x238   : > { %1514 = vperm.xlu0 %3914, %v5270_v63   ;;  %v5273_v42 = vpop.permute.xlu2 %1282  ;;  %v5275_v36 = vpop.permute.xlu1 %1242 }
 0x239   : > { %7870 = vst [vmem:[#allocation116_spill] sm:$0xff] %v5273_v42  ;;  %v5277_v46 = vpop.permute.xlu0 %1274 }
 0x23a   : > { %7871 = vst [vmem:[#allocation117_spill] sm:$0xff] %v5275_v36  ;;  %v5305_v36 = vld [vmem:[%s4325_s10 + $0x50] sm:$0xff] }
 0x23b   : > { %7872 = vst [vmem:[#allocation118_spill] sm:$0xff] %v5277_v46  ;;  %v5298_v46 = vld [vmem:[%s4325_s10] sm:$0xff] }
 0x23f   : > { %1473 = vperm.xlu2 %3916, %v5280_v56   ;;  %1470 = vperm.xlu1 %3915, %v5284_v27  }
 0x240   : > { %1526 = vperm.xlu0 %3914, %v5288_v38   ;;  %v5291_v4 = vpop.permute.xlu2 %1294  ;;  %v5293_v42 = vpop.permute.xlu1 %1254 }
 0x241   : > { %7873 = vst [vmem:[#allocation119_spill] sm:$0xff] %v5291_v4  ;;  %v5295_v61 = vpop.permute.xlu0 %1286  ;;  %v7951_v53 = vld [vmem:[#allocation117_spill] sm:$0xff] }
 0x242   : > { %7874 = vst [vmem:[#allocation120_spill] sm:$0xff] %v5293_v42 }
 0x243   : > { %7875 = vst [vmem:[#allocation121_spill] sm:$0xff] %v5295_v61 }
 0x247   : > { %1498 = vperm.xlu2 %3916, %v5298_v46   ;;  %1479 = vperm.xlu1 %3915, %v4134_v17   ;;  %v5319_v17 = vld [vmem:[%s4325_s10 + $0x18] sm:$0xff] }
 0x248   : > { %1538 = vperm.xlu0 %3914, %v5305_v36   ;;  %v1339_v4 = vpop.permute.xlu2 %1338  ;;  %v5308_v1 = vpop.permute.xlu1 %1266 }
 0x249   : > { %7876 = vst [vmem:[#allocation122_spill] sm:$0xff] %v5308_v1  ;;  %v1401_v61 = vsel %vm1225_vm14, %v1339_v4, 0.0  ;;  %v5313_v42 = vpop.permute.xlu0 %1298  ;;  %v5329_v4 = vld [vmem:[%s4325_s10 + $0x68] sm:$0xff] }
 0x24a   : > { %7877 = vst [vmem:[#allocation123_spill] sm:$0xff] %v5313_v42  ;;  %v5316_v39 = vadd.f32 %v1401_v61, %v5007_v14 }
 0x24b   : > { %7878 = vst [vmem:[#allocation124_spill] sm:$0xff] %v5329_v4 }
 0x24f   : > { %1510 = vperm.xlu2 %3916, %v5319_v17   ;;  %1506 = vperm.xlu1 %3915, %v5323_v5  }
 0x250   : > { %1550 = vperm.xlu0 %3914, %v5329_v4   ;;  %v1351_v14 = vpop.permute.xlu2 %1350  ;;  %v5332_v61 = vpop.permute.xlu1 %1278 }
 0x251   : > { %7879 = vst [vmem:[#allocation125_spill] sm:$0xff] %v5332_v61  ;;  %v1404_v42 = vsel %vm7553_vm3, %v1351_v14, 0.0  ;;  %v1343_v1 = vpop.permute.xlu0 %1342  ;;  %v5349_v61 = vld [vmem:[%s4325_s10 + $0x30] sm:$0xff]  ;;  %vm7556_vm3 = vcmp.eq.s32.totalorder %v5203_v33, %v4681_v57  ;;  %v5406_v33 = vld [vmem:[%s4325_s10 + $0x60] sm:$0xff] }
 0x252   : > { %v5340_v62 = vadd.f32 %v1404_v42, %v5056_v26  ;;  %v1402_v9 = vsel %vm1226_vm2, %v1343_v1, 0.0  ;;  %v4141_v42 = vld [vmem:[%s4391_s13] sm:$0xff] }
 0x253   : > { %v5346_v4 = vadd.f32 %v1402_v9, %v4906_v11 }
 0x255   : > { %7880 = vst [vmem:[#allocation126_spill] sm:$0xff] %v5346_v4 }
 0x257   : > { %1522 = vperm.xlu2 %3916, %v5349_v61   ;;  %1518 = vperm.xlu1 %3915, %v5353_v59  }
 0x258   : > { %1594 = vperm.xlu0 %3914, %v4141_v42   ;;  %v1363_v26 = vpop.permute.xlu2 %1362  ;;  %v5359_v1 = vpop.permute.xlu1 %1290 }
 0x259   : > { %7881 = vst [vmem:[#allocation127_spill] sm:$0xff] %v5359_v1  ;;  %v1407_v11 = vsel %vm7555_vm13, %v1363_v26, 0.0  ;;  %v1355_v9 = vpop.permute.xlu0 %1354  ;;  %v5376_v1 = vld [vmem:[%s4325_s10 + $0x48] sm:$0xff]  ;;  %vm7559_vm13 = vcmp.eq.s32.totalorder %v5193_v60, %v4681_v57 }
 0x25a   : > { %v5367_v14 = vadd.f32 %v1407_v11, %v5088_v31  ;;  %v1405_v4 = vsel %vm7556_vm3, %v1355_v9, 0.0  ;;  %7883 = vst [vmem:[#allocation129_spill] sm:$0xff] %v5376_v1  ;;  %v5386_v31 = vld [vmem:[%s4391_s13 + $0x18] sm:$0xff]  ;;  %vm7561_vm3 = vcmp.eq.s32.totalorder %v5221_v44, %v4681_v57 }
 0x25b   : > { %v5373_v42 = vadd.f32 %v1405_v4, %v4932_v13  ;;  %7885 = vst [vmem:[#allocation131_spill] sm:$0xff] %v5386_v31 }
 0x25d   : > { %7882 = vst [vmem:[#allocation128_spill] sm:$0xff] %v5373_v42 }
 0x25f   : > { %1534 = vperm.xlu2 %3916, %v5376_v1   ;;  %1530 = vperm.xlu1 %3915, %v5380_v29  }
 0x260   : > { %1606 = vperm.xlu0 %3914, %v5386_v31   ;;  %v1375_v13 = vpop.permute.xlu2 %1374  ;;  %v5389_v4 = vpop.permute.xlu1 %1302 }
 0x261   : > { %7886 = vst [vmem:[#allocation132_spill] sm:$0xff] %v5389_v4  ;;  %v1410_v26 = vsel %vm7559_vm13, %v1375_v13, 0.0  ;;  %v1367_v11 = vpop.permute.xlu0 %1366  ;;  %v5410_v4 = vld [vmem:[%s4325_s10 + $0x58] sm:$0xff]  ;;  %vm7567_vm13 = vcmp.eq.s32.totalorder %v5191_v50, %v4681_v57  ;;  %v7602_v50 = vmov 6  }
 0x262   : > { %v5397_v9 = vadd.f32 %v1410_v26, %v5120_v34  ;;  %v1408_v42 = vsel %vm7561_vm3, %v1367_v11, 0.0  ;;  %v5418_v34 = vld [vmem:[%s4391_s13 + $0x30] sm:$0xff]  ;;  %vm7568_vm3 = vcmp.eq.s32.totalorder %v5239_v2, %v4681_v57 }
 0x263   : > { %v5403_v41 = vadd.f32 %v1408_v42, %v4958_v22  ;;  %7888 = vst [vmem:[#allocation134_spill] sm:$0xff] %v5418_v34 }
 0x265   : > { %7887 = vst [vmem:[#allocation133_spill] sm:$0xff] %v5403_v41 }
 0x267   : > { %1546 = vperm.xlu2 %3916, %v5406_v33   ;;  %1542 = vperm.xlu1 %3915, %v5410_v4  }
 0x268   : > { %1618 = vperm.xlu0 %3914, %v5418_v34   ;;  %v1387_v22 = vpop.permute.xlu2 %1386  ;;  %v1347_v42 = vpop.permute.xlu1 %1346 }
 0x269   : > { %v1413_v13 = vsel %vm7566_vm7, %v1387_v22, 0.0  ;;  %v1403_v26 = vsel %vm7567_vm13, %v1347_v42, 0.0  ;;  %v1379_v11 = vpop.permute.xlu0 %1378  ;;  %v5446_v22 = vld [vmem:[%s4325_s10 + $0x70] sm:$0xff]  ;;  %vm7606_vm7 = vcmp.eq.s32.totalorder %v5148_v48, %v4681_v57  ;;  %vm7571_vm13 = vcmp.eq.s32.totalorder %v5223_v54, %v4681_v57  ;;  %v4158_v48 = vld [vmem:[%s4391_s13 + $0x38] sm:$0xff] }
 0x26a   : > { %v5430_v41 = vadd.f32 %v1413_v13, %v5150_v7  ;;  %v5433_v60 = vadd.f32 %v1403_v26, %v4964_v20  ;;  %v1411_v44 = vsel %vm7568_vm3, %v1379_v11, 0.0  ;;  %7890 = vst [vmem:[#allocation136_spill] sm:$0xff] %v5446_v22  ;;  %v5454_v20 = vld [vmem:[%s4391_s13 + $0x48] sm:$0xff]  ;;  %vm7572_vm3 = vcmp.eq.s32.totalorder %v5257_v12, %v4681_v57 }
 0x26b   : > { %v5439_v34 = vadd.f32 %v1411_v44, %v5005_v24  ;;  %7891 = vst [vmem:[#allocation137_spill] sm:$0xff] %v5454_v20 }
 0x26d   : > { %7889 = vst [vmem:[#allocation135_spill] sm:$0xff] %v5439_v34 }
 0x26f   : > { %1558 = vperm.xlu2 %3916, %v5442_v43   ;;  %1554 = vperm.xlu1 %3915, %v5446_v22   ;;  %v4157_v22 = vld [vmem:[%s4391_s13 + $0x40] sm:$0xff] }
 0x270   : > { %1630 = vperm.xlu0 %3914, %v5454_v20   ;;  %v1399_v24 = vpop.permute.xlu2 %1398  ;;  %v1359_v44 = vpop.permute.xlu1 %1358 }
 0x271   : > { %v1416_v7 = vsel %vm7571_vm13, %v1399_v24, 0.0  ;;  %v1406_v42 = vsel %vm7606_vm7, %v1359_v44, 0.0  ;;  %v1391_v13 = vpop.permute.xlu0 %1390  ;;  %v5478_v24 = vld [vmem:[%s4391_s13 + $0x10] sm:$0xff]  ;;  %v5482_v44 = vld [vmem:[%s4391_s13 + $0x8] sm:$0xff]  ;;  %vm7577_vm13 = vcmp.eq.s32.totalorder %v5177_v37, %v4681_v57 }
 0x272   : > { %v5466_v26 = vadd.f32 %v1416_v7, %v5179_v49  ;;  %v5469_v11 = vadd.f32 %v1406_v42, %v5013_v23  ;;  %v1414_v2 = vsel %vm7572_vm3, %v1391_v13, 0.0  ;;  %v5488_v23 = vld [vmem:[%s4391_s13 + $0x60] sm:$0xff]  ;;  %v5502_v13 = vld [vmem:[%s4391_s13 + $0x28] sm:$0xff]  ;;  %vm7605_vm3 = vcmp.eq.s32.totalorder %v5189_v25, %v4681_v57  ;;  %v5539_v25 = vld [vmem:[%s4391_s13 + $0x58] sm:$0xff] }
 0x273   : > { %v5475_v54 = vadd.f32 %v1414_v2, %v5054_v55  ;;  %7893 = vst [vmem:[#allocation139_spill] sm:$0xff] %v5488_v23 }
 0x274   : > { %7894 = vst [vmem:[#allocation140_spill] sm:$0xff] %v5502_v13 }
 0x275   : > { %7892 = vst [vmem:[#allocation138_spill] sm:$0xff] %v5475_v54  ;;  %v5506_v54 = vld [vmem:[%s4391_s13 + $0x20] sm:$0xff] }
 0x276   : > { %7895 = vst [vmem:[#allocation141_spill] sm:$0xff] %v5506_v54 }
 0x277   : > { %1602 = vperm.xlu2 %3916, %v5478_v24   ;;  %1598 = vperm.xlu1 %3915, %v5482_v44   ;;  %7898 = vst [vmem:[#allocation144_spill] sm:$0xff] %v5539_v25 }
 0x278   : > { %1642 = vperm.xlu0 %3914, %v5488_v23   ;;  %v1371_v49 = vpop.permute.xlu1 %1370 }
 0x279   : > { %v1409_v2 = vsel %vm7577_vm13, %v1371_v49, 0.0  ;;  %v5494_v55 = vpop.permute.xlu2 %1440  ;;  %v4156_v49 = vld [vmem:[%s4391_s13 + $0x78] sm:$0xff]  ;;  %vm7604_vm13 = vcmp.eq.s32.totalorder %v5201_v8, %v4681_v57 }
 0x27a   : > { %v5497_v7 = vadd.f32 %v1409_v2, %v5062_v6  ;;  %v5499_v42 = vpop.permute.xlu0 %1434 }
 0x27f   : > { %1614 = vperm.xlu2 %3916, %v5502_v13   ;;  %1610 = vperm.xlu1 %3915, %v5506_v54  }
 0x280   : > { %1654 = vperm.xlu0 %3914, %v4156_v49   ;;  %v1383_v12 = vpop.permute.xlu1 %1382  ;;  %v7579_v49 = vmov 7  }
 0x281   : > { %v1412_v6 = vsel %vm7605_vm3, %v1383_v12, 0.0  ;;  %v5515_v2 = vpop.permute.xlu2 %1446  ;;  %vm7607_vm3 = vcmp.eq.s32.totalorder %v5494_v55, %v4681_v57 }
 0x282   : > { %7896 = vst [vmem:[#allocation142_spill] sm:$0xff] %v5515_v2  ;;  %v5518_v34 = vadd.f32 %v1412_v6, %v5094_v40  ;;  %v5520_v37 = vpop.permute.xlu0 %1449  ;;  %v7592_v2 = vmov 5  }
 0x287   : > { %1626 = vperm.xlu2 %3916, %v4157_v22   ;;  %1622 = vperm.xlu1 %3915, %v4158_v48  }
 0x288   : > { %3923 = vset.pattern.permute.xlu0 %v7579_v49  ;;  %v1395_v12 = vpop.permute.xlu1 %1394  ;;  %v5543_v49 = vld [vmem:[%s4391_s13 + $0x50] sm:$0xff] }
 0x289   : > { %v1415_v40 = vsel %vm7604_vm13, %v1395_v12, 0.0  ;;  %2266 = vperm.xlu0 %3923, %v5298_v46   ;;  %v5531_v6 = vpop.permute.xlu2 %1455  ;;  %7899 = vst [vmem:[#allocation145_spill] sm:$0xff] %v5543_v49  ;;  %vm1481_vm13 = vcmp.eq.s32.totalorder %v5499_v42, %v4681_v57 }
 0x28a   : > { %7897 = vst [vmem:[#allocation143_spill] sm:$0xff] %v5531_v6  ;;  %v5534_v22 = vadd.f32 %v1415_v40, %v5126_v32  ;;  %v5536_v48 = vpop.permute.xlu0 %1458  ;;  %v5554_v32 = vld [vmem:[%s4391_s13 + $0x70] sm:$0xff]  ;;  %v5558_v40 = vld [vmem:[%s4391_s13 + $0x68] sm:$0xff] }
 0x28b   : > { %7902 = vst [vmem:[#allocation148_spill] sm:$0xff] %v5554_v32 }
 0x28c   : > { %7903 = vst [vmem:[#allocation149_spill] sm:$0xff] %v5558_v40 }
 0x28f   : > { %1638 = vperm.xlu2 %3916, %v5539_v25   ;;  %1634 = vperm.xlu1 %3915, %v5543_v49  }
 0x291   : > { %2274 = vperm.xlu0 %3923, %v5323_v5   ;;  %v5547_v12 = vpop.permute.xlu2 %1464  ;;  %v5549_v8 = vpop.permute.xlu1 %1437 }
 0x292   : > { %7900 = vst [vmem:[#allocation146_spill] sm:$0xff] %v5547_v12  ;;  %v5551_v6 = vpop.permute.xlu0 %1467 }
 0x293   : > { %7901 = vst [vmem:[#allocation147_spill] sm:$0xff] %v5551_v6 }
 0x297   : > { %1650 = vperm.xlu2 %3916, %v5554_v32   ;;  %1646 = vperm.xlu1 %3915, %v5558_v40  }
 0x299   : > { %3930 = vset.pattern.permute.xlu0 %v7592_v2  ;;  %v5562_v23 = vpop.permute.xlu2 %1473  ;;  %v5564_v25 = vpop.permute.xlu1 %1443 }
 0x29a   : > { %7904 = vst [vmem:[#allocation150_spill] sm:$0xff] %v5562_v23  ;;  %1696 = vperm.xlu0 %3930, %v5208_v52   ;;  %v5567_v12 = vpop.permute.xlu0 %1476  ;;  %vm7608_vm7 = vcmp.eq.s32.totalorder %v5564_v25, %v4681_v57 }
 0x29b   : > { %7905 = vst [vmem:[#allocation151_spill] sm:$0xff] %v5567_v12 }
 0x29f   : > { %3918 = vset.pattern.permute.xlu2 %v7592_v2  ;;  %3917 = vset.pattern.permute.xlu1 %v7592_v2 }
 0x2a0   : > { %1693 = vperm.xlu2 %3918, %v5212_v35   ;;  %1690 = vperm.xlu1 %3917, %v5174_v47  }
 0x2a1   : > { %v5573_v32 = vpop.permute.xlu2 %1498  ;;  %v5575_v40 = vpop.permute.xlu1 %1452 }
 0x2a2   : > { %1774 = vperm.xlu0 %3930, %v5353_v59   ;;  %v5578_v23 = vpop.permute.xlu0 %1502 }
 0x2a8   : > { %1754 = vperm.xlu2 %3918, %v5298_v46   ;;  %1699 = vperm.xlu1 %3917, %v5230_v10  }
 0x2a9   : > { %v5582_v49 = vpop.permute.xlu2 %1510  ;;  %v5584_v20 = vpop.permute.xlu1 %1461 }
 0x2aa   : > { %7906 = vst [vmem:[#allocation152_spill] sm:$0xff] %v5582_v49  ;;  %1711 = vperm.xlu0 %3930, %v5244_v19   ;;  %v5587_v2 = vpop.permute.xlu0 %1514 }
 0x2ab   : > { %7907 = vst [vmem:[#allocation153_spill] sm:$0xff] %v5587_v2 }
 0x2b0   : > { %3919 = vset.pattern.permute.xlu2 %v7602_v50  ;;  %1758 = vperm.xlu1 %3917, %v5252_v58  }
 0x2b1   : > { %1946 = vperm.xlu2 %3919, %v5174_v47   ;;  %v5592_v29 = vpop.permute.xlu2 %1522  ;;  %v5594_v1 = vpop.permute.xlu1 %1470 }
 0x2b2   : > { %7908 = vst [vmem:[#allocation154_spill] sm:$0xff] %v5592_v29  ;;  %3938 = vset.pattern.permute.xlu0 %v7602_v50  ;;  %v5597_v49 = vpop.permute.xlu0 %1526  ;;  %v7914_v29 = vmov 7  }
 0x2b3   : > { %7909 = vst [vmem:[#allocation155_spill] sm:$0xff] %v5594_v1  ;;  %1949 = vperm.xlu0 %3938, %v5212_v35  }
 0x2b4   : > { %7910 = vst [vmem:[#allocation156_spill] sm:$0xff] %v5597_v49 }
 0x2b8   : > { %3920 = vset.pattern.permute.xlu1 %v7602_v50 }
 0x2b9   : > { %2014 = vperm.xlu2 %3919, %v5252_v58   ;;  %v5602_v2 = vpop.permute.xlu2 %1534  ;;  %2010 = vperm.xlu1 %3920, %v5298_v46   ;;  %v5605_v13 = vpop.permute.xlu1 %1479 }
 0x2ba   : > { %7911 = vst [vmem:[#allocation157_spill] sm:$0xff] %v5602_v2  ;;  %v5607_v54 = vpop.permute.xlu0 %1538  ;;  %v7919_v2 = vmov 5  }
 0x2bb   : > { %7912 = vst [vmem:[#allocation158_spill] sm:$0xff] %v5605_v13  ;;  %1955 = vperm.xlu0 %3938, %v5230_v10  }
 0x2bc   : > { %7913 = vst [vmem:[#allocation159_spill] sm:$0xff] %v5607_v54 }
 0x2c1   : > { %3922 = vset.pattern.permute.xlu2 %v7914_v29  ;;  %v5611_v31 = vpop.permute.xlu2 %1546  ;;  %3921 = vset.pattern.permute.xlu1 %v7914_v29  ;;  %v5614_v49 = vpop.permute.xlu1 %1506 }
 0x2c2   : > { %7915 = vst [vmem:[#allocation160_spill] sm:$0xff] %v5611_v31  ;;  %v5616_v50 = vpop.permute.xlu0 %1550  ;;  %2205 = vperm.xlu2 %3922, %v5212_v35   ;;  %2202 = vperm.xlu1 %3921, %v5174_v47  }
 0x2c3   : > { %7916 = vst [vmem:[#allocation161_spill] sm:$0xff] %v5616_v50  ;;  %2034 = vperm.xlu0 %3938, %v5349_v61  }
 0x2c9   : > { %v5621_v46 = vpop.permute.xlu2 %1558  ;;  %v5623_v54 = vpop.permute.xlu1 %1518 }
 0x2ca   : > { %7917 = vst [vmem:[#allocation162_spill] sm:$0xff] %v5621_v46  ;;  %v1595_v31 = vpop.permute.xlu0 %1594  ;;  %3924 = vset.pattern.permute.xlu2 %v7919_v2  ;;  %2270 = vperm.xlu1 %3921, %v5252_v58  }
 0x2cb   : > { %7918 = vst [vmem:[#allocation163_spill] sm:$0xff] %v5623_v54  ;;  %v1657_v35 = vsel %vm1481_vm13, %v1595_v31, 0.0  ;;  %1970 = vperm.xlu0 %3938, %v5198_v3   ;;  %1762 = vperm.xlu2 %3924, %v5323_v5  }
 0x2cc   : > { %v5635_v47 = vadd.f32 %v1657_v35, %v5316_v39  ;;  %v7922_v35 = vmov 6  }
 0x2ce   : > { %7920 = vst [vmem:[#allocation164_spill] sm:$0xff] %v5635_v47 }
 0x2d1   : > { %v1603_v46 = vpop.permute.xlu2 %1602  ;;  %v5639_v50 = vpop.permute.xlu1 %1530 }
 0x2d2   : > { %v1659_v58 = vsel %vm7607_vm3, %v1603_v46, 0.0  ;;  %v1607_v31 = vpop.permute.xlu0 %1606  ;;  %3925 = vset.pattern.permute.xlu1 %v7919_v2  ;;  %vm7609_vm3 = vcmp.eq.s32.totalorder %v5520_v37, %v4681_v57 }
 0x2d3   : > { %v5648_v54 = vadd.f32 %v1659_v58, %v5433_v60  ;;  %v1660_v39 = vsel %vm7608_vm7, %v1607_v31, 0.0  ;;  %2054 = vperm.xlu0 %3938, %v5410_v4   ;;  %3926 = vset.pattern.permute.xlu2 %v7922_v35  ;;  %vm7610_vm7 = vcmp.eq.s32.totalorder %v5575_v40, %v4681_v57 }
 0x2d4   : > { %v5656_v47 = vadd.f32 %v1660_v39, %v5340_v62  ;;  %1766 = vperm.xlu1 %3925, %v5319_v17   ;;  %1952 = vperm.xlu2 %3926, %v5208_v52  }
 0x2d5   : > { %7921 = vst [vmem:[#allocation165_spill] sm:$0xff] %v5648_v54 }
 0x2d6   : > { %7923 = vst [vmem:[#allocation166_spill] sm:$0xff] %v5656_v47  ;;  %v7944_v47 = vld [vmem:[#allocation68_spill] sm:$0xff] }
 0x2d9   : > { %v1615_v60 = vpop.permute.xlu2 %1614  ;;  %v5662_v46 = vpop.permute.xlu1 %1542 }
 0x2da   : > { %7924 = vst [vmem:[#allocation167_spill] sm:$0xff] %v5662_v46  ;;  %v1662_v58 = vsel %vm7609_vm3, %v1615_v60, 0.0  ;;  %v1619_v31 = vpop.permute.xlu0 %1618  ;;  %vm7611_vm3 = vcmp.eq.s32.totalorder %v5536_v48, %v4681_v57 }
 0x2db   : > { %v5670_v62 = vadd.f32 %v1662_v58, %v5469_v11  ;;  %v1663_v39 = vsel %vm7610_vm7, %v1619_v31, 0.0  ;;  %1985 = vperm.xlu0 %3938, %v5280_v56   ;;  %vm7612_vm7 = vcmp.eq.s32.totalorder %v5584_v20, %v4681_v57 }
 0x2dc   : > { %v5677_v54 = vadd.f32 %v1663_v39, %v5367_v14  ;;  %3927 = vset.pattern.permute.xlu1 %v7922_v35  ;;  %2022 = vperm.xlu2 %3926, %v5319_v17  }
 0x2dd   : > { %7925 = vst [vmem:[#allocation168_spill] sm:$0xff] %v5670_v62  ;;  %2018 = vperm.xlu1 %3927, %v5323_v5   ;;  %v7943_v62 = vld [vmem:[#allocation25_spill] sm:$0xff] }
 0x2de   : > { %7926 = vst [vmem:[#allocation169_spill] sm:$0xff] %v5677_v54 }
 0x2e1   : > { %v1627_v11 = vpop.permute.xlu2 %1626  ;;  %v5684_v60 = vpop.permute.xlu1 %1554 }
 0x2e2   : > { %7927 = vst [vmem:[#allocation170_spill] sm:$0xff] %v5684_v60  ;;  %v1665_v58 = vsel %vm7611_vm3, %v1627_v11, 0.0  ;;  %v1631_v14 = vpop.permute.xlu0 %1630  ;;  %vm7613_vm3 = vcmp.eq.s32.totalorder %v5551_v6, %v4681_v57  ;;  %v1305_v60 = vsel %vm1225_vm14, %v7951_v53, 0.0 }
 0x2e3   : > { %v5692_v31 = vadd.f32 %v1665_v58, %v5497_v7  ;;  %v1666_v5 = vsel %vm7612_vm7, %v1631_v14, 0.0  ;;  %3959 = vset.pattern.permute.xlu0 %v7914_v29  ;;  %vm7614_vm7 = vcmp.eq.s32.totalorder %v5594_v1, %v4681_v57  ;;  %v7948_v1 = vld [vmem:[#allocation108_spill] sm:$0xff] }
 0x2e4   : > { %v5699_v39 = vadd.f32 %v1666_v5, %v5397_v9  ;;  %2214 = vperm.xlu0 %3959, %v5226_v51   ;;  %3929 = vset.pattern.permute.xlu2 %v7914_v29  ;;  %v1049_v21 = vsel %vm969_vm4, %v7948_v1, 0.0 }
 0x2e5   : > { %7928 = vst [vmem:[#allocation171_spill] sm:$0xff] %v5692_v31  ;;  %3928 = vset.pattern.permute.xlu1 %v7914_v29  ;;  %2211 = vperm.xlu2 %3929, %v5230_v10  }
 0x2e6   : > { %2208 = vperm.xlu1 %3928, %v5208_v52  }
 0x2e9   : > { %v1639_v7 = vpop.permute.xlu2 %1638  ;;  %v5708_v11 = vpop.permute.xlu1 %1598 }
 0x2ea   : > { %7929 = vst [vmem:[#allocation172_spill] sm:$0xff] %v5708_v11  ;;  %v1668_v9 = vsel %vm7613_vm3, %v1639_v7, 0.0  ;;  %v1643_v58 = vpop.permute.xlu0 %1642  ;;  %vm1495_vm3 = vcmp.eq.s32.totalorder %v5567_v12, %v4681_v57  ;;  %v793_v11 = vsel %vm713_vm5, %v7944_v47, 0.0  ;;  %vm1482_vm5 = vcmp.eq.s32.totalorder %v5549_v8, %v4681_v57  ;;  %v7955_v12 = vld [vmem:[#allocation141_spill] sm:$0xff]  ;;  %v8178_v8 = vld [vmem:[#allocation126_spill] sm:$0xff] }
 0x2eb   : > { %v5716_v14 = vadd.f32 %v1668_v9, %v5518_v34  ;;  %v1669_v52 = vsel %vm7614_vm7, %v1643_v58, 0.0  ;;  %vm1496_vm7 = vcmp.eq.s32.totalorder %v5605_v13, %v4681_v57  ;;  %v1562_v1 = vsel %vm1482_vm5, %v5578_v23, 0.0 }
 0x2ec   : > { %v5722_v10 = vadd.f32 %v1669_v52, %v5430_v41  ;;  %2294 = vperm.xlu0 %3959, %v5288_v38  }
 0x2ed   : > { %7930 = vst [vmem:[#allocation173_spill] sm:$0xff] %v5716_v14  ;;  %3931 = vset.pattern.permute.xlu2 %v7919_v2 }
 0x2ee   : > { %7931 = vst [vmem:[#allocation174_spill] sm:$0xff] %v5722_v10  ;;  %2278 = vperm.xlu1 %3928, %v5319_v17   ;;  %1702 = vperm.xlu2 %3931, %v5226_v51  }
 0x2f1   : > { %v1651_v34 = vpop.permute.xlu2 %1650  ;;  %v5730_v5 = vpop.permute.xlu1 %1610 }
 0x2f2   : > { %7932 = vst [vmem:[#allocation175_spill] sm:$0xff] %v5730_v5  ;;  %v1671_v7 = vsel %vm1495_vm3, %v1651_v34, 0.0  ;;  %v1655_v41 = vpop.permute.xlu0 %1654  ;;  %v522_v5 = vsel %vm426_vm10, %v7943_v62, 0.0  ;;  %v7950_v62 = vld [vmem:[#allocation94_spill] sm:$0xff] }
 0x2f3   : > { %v5738_v9 = vadd.f32 %v1671_v7, %v5534_v22  ;;  %v1672_v17 = vsel %vm1496_vm7, %v1655_v41, 0.0  ;;  %v1306_v18 = vsel %vm1226_vm2, %v7950_v62, 0.0 }
 0x2f4   : > { %v5744_v58 = vadd.f32 %v1672_v17, %v5466_v26  ;;  %2229 = vperm.xlu0 %3959, %v5266_v16  }
 0x2f5   : > { %7933 = vst [vmem:[#allocation176_spill] sm:$0xff] %v5738_v9 }
 0x2f6   : > { %7934 = vst [vmem:[#allocation177_spill] sm:$0xff] %v5744_v58  ;;  %3932 = vset.pattern.permute.xlu1 %v7919_v2  ;;  %1770 = vperm.xlu2 %3931, %v5270_v63  }
 0x2f7   : > { %1705 = vperm.xlu1 %3932, %v5186_v28  }
 0x2f9   : > { %v5750_v52 = vpop.permute.xlu1 %1622 }
 0x2fa   : > { %7935 = vst [vmem:[#allocation178_spill] sm:$0xff] %v5750_v52  ;;  %v5752_v34 = vpop.permute.xlu2 %1693  ;;  %v7940_v52 = vld [vmem:[#allocation79_spill] sm:$0xff] }
 0x2fb   : > { %v5754_v22 = vpop.permute.xlu0 %2266  ;;  %vm1738_vm2 = vcmp.eq.s32.totalorder %v5752_v34, %v4681_v57 }
 0x2fc   : > { %2314 = vperm.xlu0 %3959, %v5406_v33  }
 0x2fe   : > { %3934 = vset.pattern.permute.xlu2 %v7922_v35 }
 0x2ff   : > { %3933 = vset.pattern.permute.xlu1 %v7922_v35  ;;  %1961 = vperm.xlu2 %3934, %v5186_v28  }
 0x300   : > { %1958 = vperm.xlu1 %3933, %v5226_v51  }
 0x301   : > { %v5761_v26 = vpop.permute.xlu1 %1634 }
 0x302   : > { %v5763_v7 = vpop.permute.xlu2 %1754 }
 0x303   : > { %v5765_v41 = vpop.permute.xlu0 %2274 }
 0x304   : > { %2244 = vperm.xlu0 %3959, %v5234_v30  }
 0x307   : > { %2030 = vperm.xlu2 %3934, %v5353_v59  }
 0x308   : > { %2026 = vperm.xlu1 %3933, %v5270_v63  }
 0x309   : > { %v5770_v17 = vpop.permute.xlu1 %1646 }
 0x30a   : > { %7936 = vst [vmem:[#allocation179_spill] sm:$0xff] %v5770_v17 }
 0x30b   : > { %v5772_v58 = vpop.permute.xlu2 %1946 }
 0x30c   : > { %3967 = vset.pattern.permute.xlu0 %v7919_v2  ;;  %v5775_v9 = vpop.permute.xlu0 %1696 }
 0x30d   : > { %7937 = vst [vmem:[#allocation180_spill] sm:$0xff] %v5775_v9  ;;  %1794 = vperm.xlu0 %3967, %v5305_v36   ;;  %vm7630_vm14 = vcmp.eq.s32.totalorder %v5775_v9, %v4681_v57  ;;  %v8012_v9 = vld [vmem:[#allocation11_spill] sm:$0xff] }
 0x30f   : > { %3936 = vset.pattern.permute.xlu2 %v7914_v29 }
 0x310   : > { %3935 = vset.pattern.permute.xlu1 %v7914_v29  ;;  %2282 = vperm.xlu2 %3936, %v5270_v63  }
 0x311   : > { %2217 = vperm.xlu1 %3935, %v5186_v28   ;;  %v3875_v28 = vld [vmem:[%s7421_s3 + $0x8] sm:$0xff] }
 0x312   : > { %v5782_v51 = vpop.permute.xlu1 %1690  ;;  %2544 = vmatpush.bf16.msra.mxu0 %v3875_v28  ;;  %3878 = vmatpush.bf16.msra.mxu2 %v3875_v28 }
 0x313   : > { %v5784_v30 = vpop.permute.xlu2 %2014  ;;  %3879 = vmatpush.bf16.msra.mxu3 %v3875_v28  ;;  %vm1737_vm4 = vcmp.eq.s32.totalorder %v5782_v51, %v4681_v57 }
 0x314   : > { %v5786_v17 = vpop.permute.xlu0 %1774 }
 0x315   : > { %1726 = vperm.xlu0 %3967, %v5284_v27  }
 0x318   : > { %3937 = vset.pattern.permute.xlu2 %v7919_v2 }
 0x319   : > { %2286 = vperm.xlu1 %3935, %v5353_v59   ;;  %1708 = vperm.xlu2 %3937, %v5248_v0   ;;  %v3874_v59 = vld [vmem:[%s7421_s3] sm:$0xff] }
 0x31a   : > { %v5792_v10 = vpop.permute.xlu1 %1699  ;;  %2545 = vmatpush.bf16.msra.mxu0 %v3874_v59  ;;  %3880 = vmatpush.bf16.msra.mxu2 %v3874_v59 }
 0x31b   : > { %7938 = vst [vmem:[#allocation181_spill] sm:$0xff] %v5792_v10  ;;  %3881 = vmatpush.bf16.msra.mxu3 %v3874_v59  ;;  %v794_v59 = vsel %vm714_vm11, %v7940_v52, 0.0  ;;  %v7946_v52 = vld [vmem:[#allocation35_spill] sm:$0xff] }
 0x31c   : > { %v5797_v63 = vpop.permute.xlu0 %1711  ;;  %v5799_v14 = vpop.permute.xlu2 %2205  ;;  %v521_v13 = vsel %vm425_vm6, %v7946_v52, 0.0  ;;  %vm1993_vm6 = vcmp.eq.s32.totalorder %v5772_v58, %v4681_v57 }
 0x31d   : > { %7939 = vst [vmem:[#allocation182_spill] sm:$0xff] %v5797_v63  ;;  %1814 = vperm.xlu0 %3967, %v5442_v43   ;;  %v809_v47 = vadd.f32 %v793_v11, %v521_v13  ;;  %v1561_v11 = vsel %vm1481_vm13, %v5573_v32, 0.0  ;;  %v1817_v32 = vsel %vm1737_vm4, %v5763_v7, 0.0  ;;  %vm2250_vm12 = vcmp.eq.s32.totalorder %v5799_v14, %v4681_v57 }
 0x31e   : > { %vm2489_vm13 = vcmask 261120  }
 0x31f   : > { %v1065_v45 = vadd.f32 %v1049_v21, %v809_v47 }
 0x321   : > { %3939 = vset.pattern.permute.xlu1 %v7919_v2  ;;  %1782 = vperm.xlu2 %3937, %v5288_v38   ;;  %v1321_v23 = vadd.f32 %v1305_v60, %v1065_v45 }
 0x322   : > { %1778 = vperm.xlu1 %3939, %v5349_v61   ;;  %v1759_v27 = vpop.permute.xlu1 %1758 }
 0x325   : > { %1854 = vperm.xlu0 %3967, %v5482_v44   ;;  %v5809_v31 = vpop.permute.xlu0 %1949  ;;  %v5811_v43 = vpop.permute.xlu2 %1762 }
 0x326   : > { %vm1994_vm10 = vcmp.eq.s32.totalorder %v5809_v31, %v4681_v57 }
 0x329   : > { %3941 = vset.pattern.permute.xlu2 %v7922_v35 }
 0x32a   : > { %3940 = vset.pattern.permute.xlu1 %v7922_v35  ;;  %1967 = vperm.xlu2 %3941, %v5244_v19  }
 0x32b   : > { %1964 = vperm.xlu1 %3940, %v5248_v0   ;;  %v2011_v28 = vpop.permute.xlu1 %2010 }
 0x32d   : > { %1858 = vperm.xlu0 %3967, %v5478_v24   ;;  %v5822_v44 = vpop.permute.xlu0 %1955  ;;  %v810_v24 = vadd.f32 %v794_v59, %v522_v5  ;;  %v7954_v5 = vld [vmem:[#allocation131_spill] sm:$0xff] }
 0x32e   : > { %7941 = vst [vmem:[#allocation79_spill] sm:$0xff] %v5822_v44  ;;  %v5824_v54 = vpop.permute.xlu2 %1952 }
 0x32f   : > { %7942 = vst [vmem:[#allocation183_spill] sm:$0xff] %v5824_v54  ;;  %v1066_v46 = vadd.f32 %v1050_v15, %v810_v24  ;;  %v2074_v15 = vsel %vm1994_vm10, %v5784_v30, 0.0  ;;  %v2073_v24 = vsel %vm1993_vm6, %v2011_v28, 0.0 }
 0x331   : > { %v1322_v13 = vadd.f32 %v1306_v18, %v1066_v46 }
 0x332   : > { %3942 = vset.pattern.permute.xlu2 %v7914_v29 }
 0x333   : > { %2038 = vperm.xlu1 %3940, %v5288_v38   ;;  %2220 = vperm.xlu2 %3942, %v5248_v0   ;;  %v1818_v38 = vsel %vm1738_vm2, %v1759_v27, 0.0  ;;  %v1578_v46 = vadd.f32 %v1562_v1, %v1322_v13  ;;  %v1577_v27 = vadd.f32 %v1561_v11, %v1321_v23  ;;  %v7957_v1 = vld [vmem:[#allocation140_spill] sm:$0xff]  ;;  %v7958_v13 = vld [vmem:[#allocation129_spill] sm:$0xff]  ;;  %v7959_v11 = vld [vmem:[#allocation130_spill] sm:$0xff] }
 0x334   : > { %v5867_v6 = vpop.permute.xlu1 %2202 }
 0x335   : > { %7953 = vst [vmem:[#allocation25_spill] sm:$0xff] %v5867_v6  ;;  %3977 = vset.pattern.permute.xlu0 %v7922_v35  ;;  %v5877_v0 = vpop.permute.xlu0 %2034  ;;  %v1834_v59 = vadd.f32 %v1818_v38, %v1578_v46  ;;  %vm2249_vm11 = vcmp.eq.s32.totalorder %v5867_v6, %v4681_v57  ;;  %v1833_v52 = vadd.f32 %v1817_v32, %v1577_v27  ;;  %v7961_v46 = vld [vmem:[#allocation134_spill] sm:$0xff] }
 0x336   : > { %2118 = vperm.xlu0 %3977, %v7954_v5   ;;  %v5884_v42 = vpop.permute.xlu2 %2022  ;;  %v2329_v7 = vsel %vm2249_vm11, %v5754_v22, 0.0  ;;  %v7962_v5 = vld [vmem:[#allocation71_spill] sm:$0xff]  ;;  %v8016_v6 = vld [vmem:[#allocation58_spill] sm:$0xff] }
 0x337   : > { %v2090_v21 = vadd.f32 %v2074_v15, %v1834_v59  ;;  %v2089_v62 = vadd.f32 %v2073_v24, %v1833_v52  ;;  %v796_v27 = vsel %vm716_vm8, %v7962_v5, 0.0  ;;  %v7964_v15 = vld [vmem:[#allocation38_spill] sm:$0xff]  ;;  %v7973_v5 = vld [vmem:[#allocation97_spill] sm:$0xff]  ;;  %v7976_v24 = vld [vmem:[#allocation40_spill] sm:$0xff] }
 0x338   : > { %v524_v52 = vsel %vm428_vm15, %v7964_v15, 0.0  ;;  %vm7974_vm8 = vcmp.eq.s32.totalorder %v7973_v5, %v4681_v57  ;;  %v7975_v15 = vld [vmem:[#allocation120_spill] sm:$0xff]  ;;  %vm7638_vm15 = vcmp.eq.s32.totalorder %v5792_v10, %v4681_v57  ;;  %v8013_v10 = vld [vmem:[#allocation7_spill] sm:$0xff] }
 0x339   : > { %v2345_v47 = vadd.f32 %v2329_v7, %v2089_v62  ;;  %v7966_v7 = vld [vmem:[#allocation81_spill] sm:$0xff] }
 0x33a   : > { %v795_v62 = vsel %vm715_vm1, %v7966_v7, 0.0  ;;  %vm7977_vm1 = vcmp.eq.s32.totalorder %v7976_v24, %v4681_v57 }
 0x33b   : > { %3943 = vset.pattern.permute.xlu1 %v7914_v29  ;;  %2290 = vperm.xlu2 %3942, %v5349_v61   ;;  %v1308_v7 = vsel %vm7977_vm1, %v7975_v15, 0.0  ;;  %vm7622_vm1 = vcmp.eq.s32.totalorder %v5822_v44, %v4681_v57 }
 0x33c   : > { %2223 = vperm.xlu1 %3943, %v5244_v19   ;;  %v2271_v30 = vpop.permute.xlu1 %2270 }
 0x33d   : > { %v2330_v28 = vsel %vm2250_vm12, %v2271_v30, 0.0  ;;  %v5911_v18 = vpop.permute.xlu0 %1970  ;;  %v7968_v30 = vld [vmem:[#allocation109_spill] sm:$0xff] }
 0x33e   : > { %v2346_v53 = vadd.f32 %v2330_v28, %v2090_v21  ;;  %2122 = vperm.xlu0 %3977, %v7955_v12   ;;  %v7970_v12 = vld [vmem:[#allocation39_spill] sm:$0xff]  ;;  %v7980_v28 = vld [vmem:[#allocation49_spill] sm:$0xff] }
 0x33f   : > { %v5914_v22 = vpop.permute.xlu2 %2211 }
 0x340   : > { %7956 = vst [vmem:[#allocation68_spill] sm:$0xff] %v5914_v22  ;;  %v2457_v60 = vpack.c.bf16 %v2346_v53, %v2345_v47  ;;  %v1052_v47 = vsel %vm972_vm9, %v7968_v30, 0.0  ;;  %v812_v53 = vadd.f32 %v796_v27, %v524_v52  ;;  %v7979_v30 = vld [vmem:[#allocation14_spill] sm:$0xff]  ;;  %vm7983_vm9 = vcmp.eq.s32.totalorder %v5564_v25, %v4681_v57 }
 0x342   : > { %3808 = vmatmul.msk.bf16.vlgmr.msra.gmra.mxu0 %vm2489_vm13, %v2457_v60  ;;  %v1068_v52 = vadd.f32 %v1052_v47, %v812_v53  ;;  %v7982_v60 = vld [vmem:[#allocation152_spill] sm:$0xff] }
 0x343   : > { %3945 = vset.pattern.permute.xlu2 %v7919_v2 }
 0x344   : > { %3944 = vset.pattern.permute.xlu1 %v7919_v2  ;;  %1717 = vperm.xlu2 %3945, %v5266_v16   ;;  %v1324_v15 = vadd.f32 %v1308_v7, %v1068_v52 }
 0x345   : > { %1714 = vperm.xlu1 %3944, %v5198_v3   ;;  %v5921_v19 = vpop.permute.xlu0 %2054 }
 0x346   : > { %v1767_v61 = vpop.permute.xlu1 %1766  ;;  %3984 = vset.pattern.permute.xlu0 %v7914_v29 }
 0x347   : > { %2382 = vperm.xlu0 %3984, %v7957_v1   ;;  %v523_v1 = vsel %vm427_vm0, %v7970_v12, 0.0  ;;  %vm7981_vm0 = vcmp.eq.s32.totalorder %v7980_v28, %v4681_v57  ;;  %v1820_v47 = vsel %vm7638_vm15, %v1767_v61, 0.0  ;;  %v2076_v61 = vsel %vm7622_vm1, %v5884_v42, 0.0  ;;  %v7987_v28 = vld [vmem:[#allocation145_spill] sm:$0xff] }
 0x348   : > { %v5925_v45 = vpop.permute.xlu2 %1702  ;;  %v811_v27 = vadd.f32 %v795_v62, %v523_v1  ;;  %v1307_v12 = vsel %vm7981_vm0, %v7979_v30, 0.0  ;;  %v7985_v62 = vld [vmem:[#allocation137_spill] sm:$0xff]  ;;  %vm7621_vm0 = vcmp.eq.s32.totalorder %v5824_v54, %v4681_v57 }
 0x34c   : > { %1790 = vperm.xlu2 %3945, %v7958_v13  }
 0x34d   : > { %1786 = vperm.xlu1 %3944, %v7959_v11   ;;  %v5929_v38 = vpop.permute.xlu0 %1985 }
 0x34e   : > { %7960 = vst [vmem:[#allocation91_spill] sm:$0xff] %v5929_v38 }
 0x34f   : > { %v2019_v23 = vpop.permute.xlu1 %2018  ;;  %2386 = vperm.xlu0 %3984, %v7961_v46   ;;  %v7972_v46 = vld [vmem:[#allocation104_spill] sm:$0xff] }
 0x350   : > { %v5936_v59 = vpop.permute.xlu2 %1770  ;;  %v1051_v32 = vsel %vm7974_vm8, %v7972_v46, 0.0  ;;  %v1564_v46 = vsel %vm7983_vm9, %v7982_v60, 0.0  ;;  %vm7986_vm8 = vcmp.eq.s32.totalorder %v5494_v55, %v4681_v57  ;;  %v1819_v55 = vsel %vm7630_vm14, %v5811_v43, 0.0 }
 0x351   : > { %v1067_v5 = vadd.f32 %v1051_v32, %v811_v27  ;;  %v1563_v25 = vsel %vm7986_vm8, %v5614_v49, 0.0  ;;  %v1580_v32 = vadd.f32 %v1564_v46, %v1324_v15  ;;  %v2075_v7 = vsel %vm7621_vm0, %v2019_v23, 0.0 }
 0x352   : > { %vm7620_vm8 = vcmp.eq.s32.totalorder %v5914_v22, %v4681_v57 }
 0x353   : > { %v1323_v1 = vadd.f32 %v1307_v12, %v1067_v5  ;;  %v1836_v24 = vadd.f32 %v1820_v47, %v1580_v32  ;;  %v7990_v32 = vld [vmem:[#allocation115_spill] sm:$0xff] }
 0x354   : > { %3947 = vset.pattern.permute.xlu2 %v7922_v35 }
 0x355   : > { %3946 = vset.pattern.permute.xlu1 %v7922_v35  ;;  %2042 = vperm.xlu2 %3947, %v7959_v11   ;;  %v1579_v49 = vadd.f32 %v1563_v25, %v1323_v1  ;;  %v2092_v23 = vadd.f32 %v2076_v61, %v1836_v24  ;;  %v7989_v1 = vld [vmem:[#allocation21_spill] sm:$0xff] }
 0x356   : > { %1973 = vperm.xlu1 %3946, %v5266_v16   ;;  %v5966_v21 = vpop.permute.xlu0 %2214  ;;  %v7993_v61 = vld [vmem:[#allocation149_spill] sm:$0xff] }
 0x357   : > { %7978 = vst [vmem:[#allocation35_spill] sm:$0xff] %v5966_v21  ;;  %3991 = vset.pattern.permute.xlu0 %v7919_v2  ;;  %v1835_v27 = vadd.f32 %v1819_v55, %v1579_v49 }
 0x358   : > { %v5981_v16 = vpop.permute.xlu1 %2208  ;;  %1886 = vperm.xlu0 %3991, %v7985_v62   ;;  %v7988_v62 = vld [vmem:[#allocation144_spill] sm:$0xff] }
 0x359   : > { %7984 = vst [vmem:[#allocation18_spill] sm:$0xff] %v5981_v16  ;;  %v5991_v53 = vpop.permute.xlu2 %1961  ;;  %vm7619_vm9 = vcmp.eq.s32.totalorder %v5981_v16, %v4681_v57  ;;  %v2091_v52 = vadd.f32 %v2075_v7, %v1835_v27  ;;  %v7994_v7 = vld [vmem:[#allocation82_spill] sm:$0xff]  ;;  %v7995_v27 = vld [vmem:[#allocation59_spill] sm:$0xff]  ;;  %v8009_v16 = vld [vmem:[#allocation112_spill] sm:$0xff] }
 0x35a   : > { %v2331_v42 = vsel %vm7619_vm9, %v5765_v41, 0.0  ;;  %vm7996_vm9 = vcmp.eq.s32.totalorder %v7995_v27, %v4681_v57  ;;  %v8007_v27 = vld [vmem:[#allocation102_spill] sm:$0xff] }
 0x35b   : > { %v2347_v46 = vadd.f32 %v2331_v42, %v2091_v52  ;;  %v797_v42 = vsel %vm7996_vm9, %v7994_v7, 0.0  ;;  %v7997_v52 = vld [vmem:[#allocation84_spill] sm:$0xff]  ;;  %vm8008_vm9 = vcmp.eq.s32.totalorder %v8007_v27, %v4681_v57 }
 0x35d   : > { %3948 = vset.pattern.permute.xlu2 %v7914_v29 }
 0x35e   : > { %2046 = vperm.xlu1 %3946, %v7958_v13   ;;  %2226 = vperm.xlu2 %3948, %v5198_v3   ;;  %v6015_v43 = vpop.permute.xlu0 %2294 }
 0x360   : > { %v2279_v30 = vpop.permute.xlu1 %2278  ;;  %1890 = vperm.xlu0 %3991, %v7987_v28  }
 0x361   : > { %v2332_v12 = vsel %vm7620_vm8, %v2279_v30, 0.0  ;;  %v6025_v60 = vpop.permute.xlu2 %2030  ;;  %v7998_v30 = vld [vmem:[#allocation67_spill] sm:$0xff] }
 0x362   : > { %v2348_v3 = vadd.f32 %v2332_v12, %v2092_v23  ;;  %vm7999_vm8 = vcmp.eq.s32.totalorder %v7998_v30, %v4681_v57  ;;  %v8000_v12 = vld [vmem:[#allocation28_spill] sm:$0xff]  ;;  %v8010_v30 = vld [vmem:[#allocation93_spill] sm:$0xff] }
 0x363   : > { %v798_v23 = vsel %vm7999_vm8, %v7997_v52, 0.0  ;;  %vm8011_vm8 = vcmp.eq.s32.totalorder %v8010_v30, %v4681_v57 }
 0x364   : > { %v2458_v5 = vpack.c.bf16 %v2348_v3, %v2347_v46  ;;  %v8001_v46 = vld [vmem:[#allocation6_spill] sm:$0xff]  ;;  %v1053_v52 = vsel %vm8011_vm8, %v8009_v16, 0.0  ;;  %vm7631_vm8 = vcmp.eq.s32.totalorder %v5925_v45, %v4681_v57 }
 0x365   : > { %vm8002_vm0 = vcmp.eq.s32.totalorder %v8001_v46, %v4681_v57  ;;  %v8018_v16 = vld [vmem:[#allocation142_spill] sm:$0xff] }
 0x366   : > { %3949 = vset.pattern.permute.xlu1 %v7914_v29  ;;  %3809 = vmatmul.msk.bf16.gmra.mxu0 %vm2489_vm13, %v2458_v5  ;;  %v6029_v15 = vpop.permute.xlu0 %2229  ;;  %v525_v3 = vsel %vm8002_vm0, %v8000_v12, 0.0  ;;  %v8003_v5 = vld [vmem:[#allocation42_spill] sm:$0xff]  ;;  %vm8017_vm0 = vcmp.eq.s32.totalorder %v8016_v6, %v4681_v57 }
 0x367   : > { %2302 = vperm.xlu2 %3948, %v7958_v13   ;;  %2298 = vperm.xlu1 %3949, %v7959_v11   ;;  %v7991_v13 = vld [vmem:[#allocation139_spill] sm:$0xff]  ;;  %v813_v22 = vadd.f32 %v797_v42, %v525_v3 }
 0x368   : > { %3998 = vset.pattern.permute.xlu0 %v7922_v35 }
 0x369   : > { %v6034_v41 = vpop.permute.xlu1 %1705  ;;  %2150 = vperm.xlu0 %3998, %v7988_v62   ;;  %v8004_v62 = vld [vmem:[#allocation9_spill] sm:$0xff]  ;;  %v1069_v46 = vadd.f32 %v1053_v52, %v813_v22  ;;  %v8022_v22 = vld [vmem:[#allocation148_spill] sm:$0xff] }
 0x36a   : > { %v2283_v25 = vpop.permute.xlu2 %2282  ;;  %vm8005_vm1 = vcmp.eq.s32.totalorder %v8004_v62, %v4681_v57  ;;  %v8015_v62 = vld [vmem:[#allocation114_spill] sm:$0xff]  ;;  %vm7632_vm14 = vcmp.eq.s32.totalorder %v6034_v41, %v4681_v57 }
 0x36b   : > { %v1822_v27 = vsel %vm7632_vm14, %v5786_v17, 0.0 }
 0x36e   : > { %v6037_v47 = vpop.permute.xlu0 %2314 }
 0x36f   : > { %3951 = vset.pattern.permute.xlu2 %v7919_v2  ;;  %3950 = vset.pattern.permute.xlu1 %v7919_v2 }
 0x370   : > { %1723 = vperm.xlu2 %3951, %v7989_v1   ;;  %1720 = vperm.xlu1 %3950, %v7990_v32  }
 0x371   : > { %2154 = vperm.xlu0 %3998, %v7991_v13   ;;  %v526_v13 = vsel %vm8005_vm1, %v8003_v5, 0.0  ;;  %vm8014_vm1 = vcmp.eq.s32.totalorder %v8013_v10, %v4681_v57 }
 0x372   : > { %v6044_v11 = vpop.permute.xlu1 %1958  ;;  %v814_v54 = vadd.f32 %v798_v23, %v526_v13  ;;  %v1309_v5 = vsel %vm8014_vm1, %v8012_v9, 0.0  ;;  %v8020_v9 = vld [vmem:[#allocation163_spill] sm:$0xff]  ;;  %vm8021_vm1 = vcmp.eq.s32.totalorder %v5520_v37, %v4681_v57  ;;  %v1821_v13 = vsel %vm7631_vm8, %v5936_v59, 0.0 }
 0x373   : > { %v6046_v55 = vpop.permute.xlu2 %1708  ;;  %v1566_v6 = vsel %vm8021_vm1, %v8020_v9, 0.0  ;;  %v1325_v42 = vadd.f32 %v1309_v5, %v1069_v46  ;;  %vm7636_vm1 = vcmp.eq.s32.totalorder %v6044_v11, %v4681_v57  ;;  %vm7633_vm8 = vcmp.eq.s32.totalorder %v5966_v21, %v4681_v57  ;;  %v8078_v21 = vld [vmem:[#allocation43_spill] sm:$0xff] }
 0x374   : > { %7992 = vst [vmem:[#allocation108_spill] sm:$0xff] %v6046_v55 }
 0x376   : > { %v6048_v49 = vpop.permute.xlu0 %2244 }
 0x378   : > { %3952 = vset.pattern.permute.xlu2 %v7922_v35  ;;  %1798 = vperm.xlu1 %3950, %v5410_v4  }
 0x379   : > { %1976 = vperm.xlu2 %3952, %v7990_v32   ;;  %4005 = vset.pattern.permute.xlu0 %v7914_v29 }
 0x37a   : > { %v2027_v24 = vpop.permute.xlu1 %2026  ;;  %2414 = vperm.xlu0 %4005, %v7993_v61   ;;  %v8006_v61 = vld [vmem:[#allocation2_spill] sm:$0xff] }
 0x37b   : > { %v6063_v28 = vpop.permute.xlu2 %1782  ;;  %v1054_v7 = vsel %vm8008_vm9, %v8006_v61, 0.0  ;;  %v1310_v61 = vsel %vm8017_vm0, %v8015_v62, 0.0  ;;  %vm7637_vm9 = vcmp.eq.s32.totalorder %v8018_v16, %v4681_v57  ;;  %vm7635_vm0 = vcmp.eq.s32.totalorder %v5991_v53, %v4681_v57 }
 0x37c   : > { %v1070_v12 = vadd.f32 %v1054_v7, %v814_v54  ;;  %v8019_v54 = vld [vmem:[#allocation153_spill] sm:$0xff]  ;;  %v2077_v52 = vsel %vm7636_vm1, %v2027_v24, 0.0  ;;  %v2078_v46 = vsel %vm7635_vm0, %v6025_v60, 0.0  ;;  %v2333_v24 = vsel %vm7633_vm8, %v2283_v25, 0.0 }
 0x37d   : > { %v1565_v10 = vsel %vm7637_vm9, %v8019_v54, 0.0 }
 0x37e   : > { %v1326_v23 = vadd.f32 %v1310_v61, %v1070_v12  ;;  %v1581_v37 = vadd.f32 %v1565_v10, %v1325_v42 }
 0x37f   : > { %v6081_v44 = vpop.permute.xlu0 %1794 }
 0x380   : > { %3953 = vset.pattern.permute.xlu1 %v7922_v35  ;;  %v1582_v30 = vadd.f32 %v1566_v6, %v1326_v23  ;;  %v1837_v59 = vadd.f32 %v1821_v13, %v1581_v37  ;;  %v8028_v13 = vld [vmem:[#allocation69_spill] sm:$0xff] }
 0x381   : > { %2050 = vperm.xlu2 %3952, %v5305_v36   ;;  %1979 = vperm.xlu1 %3953, %v7989_v1   ;;  %vm8029_vm8 = vcmp.eq.s32.totalorder %v8028_v13, %v4681_v57  ;;  %v8030_v37 = vld [vmem:[#allocation85_spill] sm:$0xff]  ;;  %v8045_v13 = vld [vmem:[#allocation124_spill] sm:$0xff] }
 0x382   : > { %2418 = vperm.xlu0 %4005, %v8022_v22   ;;  %v1838_v12 = vadd.f32 %v1822_v27, %v1582_v30  ;;  %v2093_v5 = vadd.f32 %v2077_v52, %v1837_v59  ;;  %v8031_v30 = vld [vmem:[#allocation61_spill] sm:$0xff] }
 0x383   : > { %v6109_v3 = vpop.permute.xlu1 %2217  ;;  %v8033_v59 = vld [vmem:[#allocation41_spill] sm:$0xff] }
 0x384   : > { %8023 = vst [vmem:[#allocation96_spill] sm:$0xff] %v6109_v3  ;;  %v6119_v7 = vpop.permute.xlu2 %1967  ;;  %vm7634_vm14 = vcmp.eq.s32.totalorder %v6109_v3, %v4681_v57  ;;  %v2094_v61 = vadd.f32 %v2078_v46, %v1838_v12  ;;  %v2349_v54 = vadd.f32 %v2333_v24, %v2093_v5  ;;  %v8034_v12 = vld [vmem:[#allocation27_spill] sm:$0xff]  ;;  %v8036_v46 = vld [vmem:[#allocation110_spill] sm:$0xff]  ;;  %v8081_v3 = vld [vmem:[#allocation92_spill] sm:$0xff] }
 0x385   : > { %8024 = vst [vmem:[#allocation94_spill] sm:$0xff] %v6119_v7  ;;  %vm8035_vm0 = vcmp.eq.s32.totalorder %v8034_v12, %v4681_v57  ;;  %v8037_v5 = vld [vmem:[#allocation95_spill] sm:$0xff] }
 0x386   : > { %vm8038_vm1 = vcmp.eq.s32.totalorder %v8037_v5, %v4681_v57 }
 0x387   : > { %v6130_v17 = vpop.permute.xlu0 %1726  ;;  %v1055_v24 = vsel %vm8038_vm1, %v8036_v46, 0.0  ;;  %v4163_v46 = vld [vmem:[%s4259_s30 + $0x60] sm:$0xff]  ;;  %vm8053_vm1 = vcmp.eq.s32.totalorder %v5575_v40, %v4681_v57 }
 0x389   : > { %3955 = vset.pattern.permute.xlu2 %v7914_v29  ;;  %3954 = vset.pattern.permute.xlu1 %v7914_v29 }
 0x38a   : > { %2235 = vperm.xlu2 %3955, %v7989_v1   ;;  %2232 = vperm.xlu1 %3954, %v7990_v32  }
 0x38b   : > { %v2287_v62 = vpop.permute.xlu1 %2286 }
 0x38c   : > { %v2334_v60 = vsel %vm7634_vm14, %v2287_v62, 0.0  ;;  %vm8032_vm14 = vcmp.eq.s32.totalorder %v8031_v30, %v4681_v57  ;;  %v8039_v62 = vld [vmem:[#allocation31_spill] sm:$0xff]  ;;  %v8046_v30 = vld [vmem:[#allocation122_spill] sm:$0xff] }
 0x38d   : > { %v2350_v10 = vadd.f32 %v2334_v60, %v2094_v61  ;;  %v6148_v9 = vpop.permute.xlu2 %2220  ;;  %v800_v52 = vsel %vm8032_vm14, %v8030_v37, 0.0  ;;  %v8040_v61 = vld [vmem:[#allocation26_spill] sm:$0xff] }
 0x38e   : > { %8025 = vst [vmem:[#allocation117_spill] sm:$0xff] %v6148_v9  ;;  %vm8041_vm9 = vcmp.eq.s32.totalorder %v8040_v61, %v4681_v57  ;;  %v8050_v61 = vld [vmem:[#allocation54_spill] sm:$0xff] }
 0x38f   : > { %v6150_v6 = vpop.permute.xlu0 %1814  ;;  %v2459_v25 = vpack.c.bf16 %v2350_v10, %v2349_v54  ;;  %v528_v60 = vsel %vm8041_vm9, %v8039_v62, 0.0  ;;  %v8042_v10 = vld [vmem:[#allocation24_spill] sm:$0xff]  ;;  %vm7659_vm9 = vcmp.eq.s32.totalorder %v6046_v55, %v4681_v57  ;;  %v8049_v62 = vld [vmem:[#allocation19_spill] sm:$0xff]  ;;  %v8077_v55 = vld [vmem:[#allocation118_spill] sm:$0xff] }
 0x390   : > { %v816_v37 = vadd.f32 %v800_v52, %v528_v60 }
 0x391   : > { %3810 = vmatmul.msk.bf16.gmra.mxu0 %vm2489_vm13, %v2459_v25  ;;  %v8043_v25 = vld [vmem:[#allocation100_spill] sm:$0xff] }
 0x392   : > { %2310 = vperm.xlu2 %3955, %v5410_v4   ;;  %2306 = vperm.xlu1 %3954, %v5305_v36   ;;  %v8027_v36 = vld [vmem:[#allocation74_spill] sm:$0xff]  ;;  %vm8044_vm14 = vcmp.eq.s32.totalorder %v8043_v25, %v4681_v57 }
 0x393   : > { %v799_v27 = vsel %vm8029_vm8, %v8027_v36, 0.0  ;;  %v1056_v36 = vsel %vm8044_vm14, %v8042_v10, 0.0  ;;  %v8052_v25 = vld [vmem:[#allocation154_spill] sm:$0xff] }
 0x394   : > { %v1779_v1 = vpop.permute.xlu1 %1778  ;;  %v1567_v52 = vsel %vm8053_vm1, %v8052_v25, 0.0  ;;  %vm7642_vm1 = vcmp.eq.s32.totalorder %v6148_v9, %v4681_v57 }
 0x395   : > { %v2291_v32 = vpop.permute.xlu2 %2290  ;;  %v1823_v40 = vsel %vm7659_vm9, %v1779_v1, 0.0 }
 0x397   : > { %v6155_v22 = vpop.permute.xlu0 %1854 }
 0x39a   : > { %3957 = vset.pattern.permute.xlu2 %v7919_v2  ;;  %3956 = vset.pattern.permute.xlu1 %v7919_v2 }
 0x39b   : > { %1802 = vperm.xlu2 %3957, %v5406_v33   ;;  %1729 = vperm.xlu1 %3956, %v5280_v56   ;;  %v527_v56 = vsel %vm8035_vm0, %v8033_v59, 0.0  ;;  %v8047_v59 = vld [vmem:[#allocation60_spill] sm:$0xff]  ;;  %vm8051_vm0 = vcmp.eq.s32.totalorder %v8050_v61, %v4681_v57  ;;  %v4164_v61 = vld [vmem:[%s4325_s10 + $0x68] sm:$0xff] }
 0x39c   : > { %v815_v54 = vadd.f32 %v799_v27, %v527_v56  ;;  %vm8048_vm8 = vcmp.eq.s32.totalorder %v8047_v59, %v4681_v57  ;;  %v1072_v56 = vadd.f32 %v1056_v36, %v816_v37  ;;  %v1312_v10 = vsel %vm8051_vm0, %v8049_v62, 0.0 }
 0x39d   : > { %v6161_v42 = vpop.permute.xlu1 %1964  ;;  %v1311_v12 = vsel %vm8048_vm8, %v8046_v30, 0.0  ;;  %vm7639_vm8 = vcmp.eq.s32.totalorder %v5797_v63, %v4681_v57  ;;  %vm7641_vm0 = vcmp.eq.s32.totalorder %v6119_v7, %v4681_v57  ;;  %v8069_v7 = vld [vmem:[#allocation12_spill] sm:$0xff]  ;;  %v8072_v63 = vld [vmem:[#allocation105_spill] sm:$0xff] }
 0x39e   : > { %8026 = vst [vmem:[#allocation64_spill] sm:$0xff] %v6161_v42  ;;  %v6163_v23 = vpop.permute.xlu2 %1717  ;;  %v1071_v5 = vadd.f32 %v1055_v24, %v815_v54  ;;  %vm7649_vm15 = vcmp.eq.s32.totalorder %v6161_v42, %v4681_v57  ;;  %v8055_v54 = vld [vmem:[#allocation156_spill] sm:$0xff]  ;;  %v1328_v30 = vadd.f32 %v1312_v10, %v1072_v56 }
 0x39f   : > { %v6165_v4 = vpop.permute.xlu0 %1858 }
 0x3a0   : > { %v1327_v60 = vadd.f32 %v1311_v12, %v1071_v5  ;;  %v1824_v12 = vsel %vm7639_vm8, %v6063_v28, 0.0  ;;  %v2079_v5 = vsel %vm7649_vm15, %v5877_v0, 0.0  ;;  %v2335_v0 = vsel %vm7642_vm1, %v2291_v32, 0.0  ;;  %v4165_v32 = vld [vmem:[%s4259_s30 + $0x68] sm:$0xff] }
 0x3a1   : > { %vm1746_vm1 = vcmp.eq.s32.totalorder %v6163_v23, %v4681_v57 }
 0x3a2   : > { %v1583_v59 = vadd.f32 %v1567_v52, %v1327_v60 }
 0x3a3   : > { %3958 = vset.pattern.permute.xlu2 %v7922_v35  ;;  %1806 = vperm.xlu1 %3956, %v8045_v13   ;;  %v8054_v13 = vld [vmem:[#allocation143_spill] sm:$0xff] }
 0x3a4   : > { %1982 = vperm.xlu2 %3958, %v4163_v46   ;;  %vm7643_vm14 = vcmp.eq.s32.totalorder %v8054_v13, %v4681_v57  ;;  %v1839_v1 = vadd.f32 %v1823_v40, %v1583_v59  ;;  %v8075_v13 = vld [vmem:[#allocation15_spill] sm:$0xff] }
 0x3a5   : > { %v2039_v27 = vpop.permute.xlu1 %2038  ;;  %v1568_v36 = vsel %vm7643_vm14, %v8055_v54, 0.0  ;;  %vm8076_vm15 = vcmp.eq.s32.totalorder %v8075_v13, %v4681_v57 }
 0x3a6   : > { %v6214_v24 = vpop.permute.xlu2 %1790  ;;  %v1584_v62 = vadd.f32 %v1568_v36, %v1328_v30  ;;  %v2080_v56 = vsel %vm7641_vm0, %v2039_v27, 0.0  ;;  %v2095_v10 = vadd.f32 %v2079_v5, %v1839_v1 }
 0x3a8   : > { %v6223_v37 = vpop.permute.xlu0 %2118  ;;  %v1840_v28 = vadd.f32 %v1824_v12, %v1584_v62  ;;  %v2351_v54 = vadd.f32 %v2335_v0, %v2095_v10  ;;  %v4166_v12 = vld [vmem:[%s4259_s30 + $0x70] sm:$0xff]  ;;  %v8059_v10 = vld [vmem:[#allocation77_spill] sm:$0xff] }
 0x3a9   : > { %v8060_v0 = vld [vmem:[#allocation72_spill] sm:$0xff] }
 0x3aa   : > { %v2096_v52 = vadd.f32 %v2080_v56, %v1840_v28  ;;  %v4167_v56 = vld [vmem:[%s4259_s30 + $0x78] sm:$0xff] }
 0x3ab   : > { %3960 = vset.pattern.permute.xlu1 %v7922_v35 }
 0x3ac   : > { %2062 = vperm.xlu2 %3958, %v4164_v61   ;;  %2058 = vperm.xlu1 %3960, %v5406_v33  }
 0x3ae   : > { %v6246_v25 = vpop.permute.xlu1 %2223 }
 0x3af   : > { %8056 = vst [vmem:[#allocation131_spill] sm:$0xff] %v6246_v25  ;;  %vm7640_vm8 = vcmp.eq.s32.totalorder %v6246_v25, %v4681_v57  ;;  %v6250_v60 = vpop.permute.xlu2 %2042 }
 0x3b0   : > { %v2336_v27 = vsel %vm7640_vm8, %v6015_v43, 0.0  ;;  %v6256_v33 = vpop.permute.xlu0 %2122  ;;  %vm8061_vm8 = vcmp.eq.s32.totalorder %v8060_v0, %v4681_v57  ;;  %v8068_v0 = vld [vmem:[#allocation45_spill] sm:$0xff] }
 0x3b1   : > { %v2352_v36 = vadd.f32 %v2336_v27, %v2096_v52  ;;  %v802_v52 = vsel %vm8061_vm8, %v8059_v10, 0.0  ;;  %v8063_v27 = vld [vmem:[#allocation70_spill] sm:$0xff]  ;;  %vm8070_vm8 = vcmp.eq.s32.totalorder %v8069_v7, %v4681_v57 }
 0x3b2   : > { %vm8064_vm0 = vcmp.eq.s32.totalorder %v8063_v27, %v4681_v57  ;;  %v8071_v27 = vld [vmem:[#allocation3_spill] sm:$0xff] }
 0x3b3   : > { %v2460_v40 = vpack.c.bf16 %v2352_v36, %v2351_v54 }
 0x3b4   : > { %3962 = vset.pattern.permute.xlu2 %v7914_v29  ;;  %3961 = vset.pattern.permute.xlu1 %v7914_v29 }
 0x3b5   : > { %2241 = vperm.xlu2 %3962, %v4165_v32   ;;  %2238 = vperm.xlu1 %3961, %v4163_v46   ;;  %v8058_v46 = vld [vmem:[#allocation136_spill] sm:$0xff] }
 0x3b6   : > { %3811 = vmatmul.msk.bf16.gmra.mxu0 %vm2489_vm13, %v2460_v40  ;;  %v8065_v32 = vld [vmem:[#allocation44_spill] sm:$0xff] }
 0x3b7   : > { %v6262_v30 = vpop.permute.xlu1 %1714 }
 0x3b8   : > { %v6264_v59 = vpop.permute.xlu2 %2226 }
 0x3b9   : > { %v6266_v43 = vpop.permute.xlu0 %2382 }
 0x3bd   : > { %3963 = vset.pattern.permute.xlu2 %v7919_v2  ;;  %2318 = vperm.xlu1 %3961, %v4164_v61   ;;  %v8062_v61 = vld [vmem:[#allocation86_spill] sm:$0xff] }
 0x3be   : > { %1732 = vperm.xlu2 %3963, %v4166_v12   ;;  %v801_v54 = vsel %vm8064_vm0, %v8062_v61, 0.0  ;;  %v529_v61 = vsel %vm8070_vm8, %v8068_v0, 0.0  ;;  %vm8073_vm0 = vcmp.eq.s32.totalorder %v8072_v63, %v4681_v57  ;;  %v8080_v0 = vld [vmem:[#allocation125_spill] sm:$0xff]  ;;  %vm8082_vm8 = vcmp.eq.s32.totalorder %v8081_v3, %v4681_v57 }
 0x3bf   : > { %v1787_v5 = vpop.permute.xlu1 %1786  ;;  %v1057_v9 = vsel %vm8073_vm0, %v8071_v27, 0.0  ;;  %v1314_v63 = vsel %vm8082_vm8, %v8080_v0, 0.0  ;;  %vm8085_vm0 = vcmp.eq.s32.totalorder %v5584_v20, %v4681_v57  ;;  %vm7654_vm8 = vcmp.eq.s32.totalorder %v5911_v18, %v4681_v57 }
 0x3c1   : > { %v6270_v62 = vpop.permute.xlu0 %2386  ;;  %v2303_v1 = vpop.permute.xlu2 %2302 }
 0x3c2   : > { %8057 = vst [vmem:[#allocation141_spill] sm:$0xff] %v6270_v62  ;;  %v8074_v62 = vld [vmem:[#allocation113_spill] sm:$0xff] }
 0x3c5   : > { %3964 = vset.pattern.permute.xlu1 %v7919_v2 }
 0x3c6   : > { %1810 = vperm.xlu2 %3963, %v8058_v46   ;;  %1735 = vperm.xlu1 %3964, %v4167_v56   ;;  %v8066_v46 = vld [vmem:[#allocation30_spill] sm:$0xff] }
 0x3c7   : > { %vm8067_vm14 = vcmp.eq.s32.totalorder %v8066_v46, %v4681_v57  ;;  %v1058_v46 = vsel %vm8076_vm15, %v8074_v62, 0.0  ;;  %vm8083_vm15 = vcmp.eq.s32.totalorder %v5536_v48, %v4681_v57 }
 0x3c8   : > { %v6275_v28 = vpop.permute.xlu1 %1973  ;;  %v530_v25 = vsel %vm8067_vm14, %v8065_v32, 0.0  ;;  %vm8079_vm14 = vcmp.eq.s32.totalorder %v8078_v21, %v4681_v57  ;;  %v8084_v21 = vld [vmem:[#allocation157_spill] sm:$0xff] }
 0x3c9   : > { %v818_v42 = vadd.f32 %v802_v52, %v530_v25  ;;  %v1313_v7 = vsel %vm8079_vm14, %v8077_v55, 0.0  ;;  %v1570_v55 = vsel %vm8085_vm0, %v8084_v21, 0.0  ;;  %vm7658_vm14 = vcmp.eq.s32.totalorder %v6262_v30, %v4681_v57 }
 0x3ca   : > { %v1887_v36 = vpop.permute.xlu0 %1886  ;;  %v6287_v40 = vpop.permute.xlu2 %1723  ;;  %vm7655_vm0 = vcmp.eq.s32.totalorder %v6264_v59, %v4681_v57 }
 0x3cb   : > { %v1922_v10 = vsel %vm1746_vm1, %v1887_v36, 0.0  ;;  %v817_v36 = vadd.f32 %v801_v54, %v529_v61  ;;  %v1074_v62 = vadd.f32 %v1058_v46, %v818_v42  ;;  %v4169_v61 = vld [vmem:[%s4325_s10 + $0x70] sm:$0xff] }
 0x3cc   : > { %v6309_v32 = vadd.f32 %v1922_v10, %v5699_v39  ;;  %v1569_v39 = vsel %vm8083_vm15, %v5639_v50, 0.0  ;;  %v1825_v50 = vsel %vm7658_vm14, %v1787_v5, 0.0  ;;  %vm7657_vm15 = vcmp.eq.s32.totalorder %v6275_v28, %v4681_v57  ;;  %v4168_v10 = vld [vmem:[%s4325_s10 + $0x78] sm:$0xff] }
 0x3cd   : > { %v1073_v13 = vadd.f32 %v1057_v9, %v817_v36  ;;  %v1330_v52 = vadd.f32 %v1314_v63, %v1074_v62  ;;  %v1826_v9 = vsel %vm1746_vm1, %v6214_v24, 0.0  ;;  %vm7656_vm1 = vcmp.eq.s32.totalorder %v6029_v15, %v4681_v57  ;;  %v8086_v62 = vld [vmem:[#allocation146_spill] sm:$0xff] }
 0x3ce   : > { %3966 = vset.pattern.permute.xlu2 %v7922_v35  ;;  %3965 = vset.pattern.permute.xlu1 %v7922_v35  ;;  %v2081_v5 = vsel %vm7654_vm8, %v6250_v60, 0.0  ;;  %v2338_v27 = vsel %vm7656_vm1, %v2303_v1, 0.0  ;;  %vm1491_vm8 = vcmp.eq.s32.totalorder %v8086_v62, %v4681_v57 }
 0x3cf   : > { %1991 = vperm.xlu2 %3966, %v4167_v56   ;;  %1988 = vperm.xlu1 %3965, %v4166_v12   ;;  %v1329_v25 = vadd.f32 %v1313_v7, %v1073_v13  ;;  %v1586_v20 = vadd.f32 %v1570_v55, %v1330_v52  ;;  %v1667_v1 = vsel %vm1491_vm8, %v5761_v26, 0.0  ;;  %v8087_v55 = vld [vmem:[#allocation135_spill] sm:$0xff]  ;;  %v4170_v26 = vld [vmem:[%s4391_s13] sm:$0xff] }
 0x3d0   : > { %v2047_v3 = vpop.permute.xlu1 %2046 }
 0x3d1   : > { %v1585_v48 = vadd.f32 %v1569_v39, %v1329_v25  ;;  %v2082_v23 = vsel %vm7657_vm15, %v2047_v3, 0.0  ;;  %v1842_v24 = vadd.f32 %v1826_v9, %v1586_v20  ;;  %v1683_v3 = vadd.f32 %v1667_v1, %v8087_v55  ;;  %v8102_v1 = vld [vmem:[#allocation107_spill] sm:$0xff]  ;;  %v8104_v55 = vld [vmem:[#allocation53_spill] sm:$0xff] }
 0x3d2   : > { %v1891_v39 = vpop.permute.xlu0 %1890 }
 0x3d3   : > { %v6342_v42 = vpop.permute.xlu2 %1976  ;;  %v1841_v12 = vadd.f32 %v1825_v50, %v1585_v48  ;;  %v2098_v54 = vadd.f32 %v2082_v23, %v1842_v24  ;;  %v4171_v48 = vld [vmem:[%s4391_s13 + $0x8] sm:$0xff]  ;;  %v8090_v24 = vld [vmem:[#allocation62_spill] sm:$0xff] }
 0x3d4   : > { %v8089_v23 = vld [vmem:[#allocation87_spill] sm:$0xff]  ;;  %vm8091_vm1 = vcmp.eq.s32.totalorder %v8090_v24, %v4681_v57 }
 0x3d5   : > { %v2097_v36 = vadd.f32 %v2081_v5, %v1841_v12  ;;  %v2354_v0 = vadd.f32 %v2338_v27, %v2098_v54  ;;  %v803_v12 = vsel %vm8091_vm1, %v8089_v23, 0.0  ;;  %v8092_v5 = vld [vmem:[#allocation88_spill] sm:$0xff]  ;;  %v8093_v54 = vld [vmem:[#allocation73_spill] sm:$0xff]  ;;  %v8095_v27 = vld [vmem:[#allocation34_spill] sm:$0xff]  ;;  %vm8103_vm1 = vcmp.eq.s32.totalorder %v8102_v1, %v4681_v57 }
 0x3d6   : > { %vm8094_vm15 = vcmp.eq.s32.totalorder %v8093_v54, %v4681_v57  ;;  %v8108_v54 = vld [vmem:[#allocation13_spill] sm:$0xff] }
 0x3d7   : > { %2070 = vperm.xlu2 %3966, %v4168_v10   ;;  %2066 = vperm.xlu1 %3965, %v4169_v61  }
 0x3d9   : > { %v2299_v46 = vpop.permute.xlu1 %2298 }
 0x3da   : > { %v2337_v7 = vsel %vm7655_vm0, %v2299_v46, 0.0  ;;  %v8096_v46 = vld [vmem:[#allocation29_spill] sm:$0xff] }
 0x3db   : > { %v2353_v60 = vadd.f32 %v2337_v7, %v2097_v36  ;;  %v2051_v63 = vpop.permute.xlu2 %2050  ;;  %vm8097_vm14 = vcmp.eq.s32.totalorder %v8096_v46, %v4681_v57  ;;  %v8098_v7 = vld [vmem:[#allocation48_spill] sm:$0xff]  ;;  %v8110_v46 = vld [vmem:[#allocation121_spill] sm:$0xff] }
 0x3dc   : > { %v531_v36 = vsel %vm8097_vm14, %v8095_v27, 0.0  ;;  %vm8109_vm14 = vcmp.eq.s32.totalorder %v8108_v54, %v4681_v57  ;;  %v4173_v54 = vld [vmem:[%s4391_s13 + $0x10] sm:$0xff] }
 0x3dd   : > { %v2461_v13 = vpack.c.bf16 %v2354_v0, %v2353_v60  ;;  %v8099_v0 = vld [vmem:[#allocation16_spill] sm:$0xff]  ;;  %v819_v23 = vadd.f32 %v803_v12, %v531_v36  ;;  %v8113_v12 = vld [vmem:[#allocation159_spill] sm:$0xff] }
 0x3de   : > { %vm8100_vm9 = vcmp.eq.s32.totalorder %v8099_v0, %v4681_v57  ;;  %v8111_v0 = vld [vmem:[#allocation46_spill] sm:$0xff]  ;;  %v8114_v36 = vld [vmem:[#allocation167_spill] sm:$0xff] }
 0x3df   : > { %3969 = vset.pattern.permute.xlu2 %v7914_v29  ;;  %3968 = vset.pattern.permute.xlu1 %v7914_v29  ;;  %v532_v60 = vsel %vm8100_vm9, %v8098_v7, 0.0  ;;  %vm8112_vm9 = vcmp.eq.s32.totalorder %v8111_v0, %v4681_v57 }
 0x3e0   : > { %3812 = vmatmul.msk.bf16.gmra.mxu0 %vm2489_vm13, %v2461_v13  ;;  %2322 = vperm.xlu2 %3969, %v4169_v61   ;;  %v8101_v13 = vld [vmem:[#allocation5_spill] sm:$0xff]  ;;  %v1316_v7 = vsel %vm8112_vm9, %v8110_v46, 0.0 }
 0x3e1   : > { %2247 = vperm.xlu1 %3968, %v4167_v56  }
 0x3e2   : > { %v1721_v21 = vpop.permute.xlu1 %1720 }
 0x3e3   : > { %vm1747_vm0 = vcmp.eq.s32.totalorder %v1721_v21, %v4681_v57 }
 0x3e4   : > { %v1923_v25 = vsel %vm1747_vm0, %v1891_v39, 0.0  ;;  %v6376_v52 = vpop.permute.xlu2 %2235  ;;  %v1060_v39 = vsel %vm8103_vm1, %v8101_v13, 0.0  ;;  %vm1748_vm1 = vcmp.eq.s32.totalorder %v6287_v40, %v4681_v57 }
 0x3e5   : > { %v6378_v9 = vadd.f32 %v1923_v25, %v1683_v3  ;;  %v8105_v3 = vld [vmem:[#allocation103_spill] sm:$0xff] }
 0x3e7   : > { %8088 = vst [vmem:[#allocation140_spill] sm:$0xff] %v6378_v9 }
 0x3e8   : > { %3970 = vset.pattern.permute.xlu2 %v7919_v2 }
 0x3e9   : > { %2326 = vperm.xlu1 %3968, %v4168_v10   ;;  %1850 = vperm.xlu2 %3970, %v4170_v26   ;;  %v804_v10 = vsel %vm8094_vm15, %v8092_v5, 0.0  ;;  %vm8106_vm15 = vcmp.eq.s32.totalorder %v8105_v3, %v4681_v57  ;;  %v8107_v5 = vld [vmem:[#allocation116_spill] sm:$0xff] }
 0x3ea   : > { %v1799_v56 = vpop.permute.xlu1 %1798  ;;  %v1059_v25 = vsel %vm8106_vm15, %v8104_v55, 0.0  ;;  %v820_v24 = vadd.f32 %v804_v10, %v532_v60  ;;  %v1315_v27 = vsel %vm8109_vm14, %v8107_v5, 0.0  ;;  %v1571_v10 = vsel %vm1491_vm8, %v8113_v12, 0.0  ;;  %v8115_v60 = vld [vmem:[#allocation147_spill] sm:$0xff] }
 0x3eb   : > { %v1075_v1 = vadd.f32 %v1059_v25, %v819_v23  ;;  %vm8116_vm15 = vcmp.eq.s32.totalorder %v8115_v60, %v4681_v57  ;;  %v1827_v25 = vsel %vm1747_vm0, %v6081_v44, 0.0  ;;  %v1828_v62 = vsel %vm1748_vm1, %v1799_v56, 0.0  ;;  %v4174_v60 = vld [vmem:[%s4391_s13 + $0x20] sm:$0xff] }
 0x3ec   : > { %v2311_v50 = vpop.permute.xlu2 %2310  ;;  %v1076_v9 = vadd.f32 %v1060_v39, %v820_v24  ;;  %v1572_v13 = vsel %vm8116_vm15, %v8114_v36, 0.0  ;;  %vm7662_vm8 = vcmp.eq.s32.totalorder %v6342_v42, %v4681_v57  ;;  %vm7661_vm0 = vcmp.eq.s32.totalorder %v6376_v52, %v4681_v57 }
 0x3ed   : > { %v1331_v39 = vadd.f32 %v1315_v27, %v1075_v1  ;;  %v2083_v56 = vsel %vm7662_vm8, %v2051_v63, 0.0  ;;  %v2340_v5 = vsel %vm7661_vm0, %v2311_v50, 0.0 }
 0x3ee   : > { %v1332_v55 = vadd.f32 %v1316_v7, %v1076_v9 }
 0x3ef   : > { %v1587_v23 = vadd.f32 %v1571_v10, %v1331_v39 }
 0x3f1   : > { %3971 = vset.pattern.permute.xlu1 %v7922_v35  ;;  %3972 = vset.pattern.permute.xlu2 %v7922_v35 }
 0x3f2   : > { %2106 = vperm.xlu1 %3971, %v4170_v26   ;;  %2110 = vperm.xlu2 %3972, %v4171_v48  }
 0x3f3   : > { %v6385_v20 = vpop.permute.xlu1 %1979 }
 0x3f4   : > { %vm7663_vm14 = vcmp.eq.s32.totalorder %v6385_v20, %v4681_v57 }
 0x3f5   : > { %v6395_v61 = vpop.permute.xlu2 %1802  ;;  %v2084_v9 = vsel %vm7663_vm14, %v5921_v19, 0.0  ;;  %v4172_v19 = vld [vmem:[%s4391_s13 + $0x18] sm:$0xff] }
 0x3fa   : > { %3973 = vset.pattern.permute.xlu1 %v7914_v29  ;;  %3974 = vset.pattern.permute.xlu2 %v7914_v29 }
 0x3fb   : > { %2362 = vperm.xlu1 %3973, %v4170_v26   ;;  %2366 = vperm.xlu2 %3974, %v4171_v48   ;;  %v1588_v26 = vadd.f32 %v1572_v13, %v1332_v55  ;;  %v1843_v48 = vadd.f32 %v1827_v25, %v1587_v23  ;;  %v4175_v13 = vld [vmem:[%s4391_s13 + $0x28] sm:$0xff]  ;;  %v8119_v25 = vld [vmem:[#allocation89_spill] sm:$0xff] }
 0x3fc   : > { %v6435_v3 = vpop.permute.xlu1 %2232 }
 0x3fd   : > { %v1844_v44 = vadd.f32 %v1828_v62, %v1588_v26  ;;  %vm7660_vm9 = vcmp.eq.s32.totalorder %v6435_v3, %v4681_v57  ;;  %v2099_v46 = vadd.f32 %v2083_v56, %v1843_v48  ;;  %v8120_v62 = vld [vmem:[#allocation65_spill] sm:$0xff]  ;;  %v8122_v26 = vld [vmem:[#allocation80_spill] sm:$0xff] }
 0x3fe   : > { %v6451_v21 = vpop.permute.xlu2 %1982  ;;  %vm8121_vm15 = vcmp.eq.s32.totalorder %v8120_v62, %v4681_v57  ;;  %v8126_v56 = vld [vmem:[#allocation32_spill] sm:$0xff] }
 0x3ff   : > { %v2100_v24 = vadd.f32 %v2084_v9, %v1844_v44  ;;  %v806_v23 = vsel %vm8121_vm15, %v8119_v25, 0.0  ;;  %v8123_v9 = vld [vmem:[#allocation75_spill] sm:$0xff]  ;;  %v8125_v44 = vld [vmem:[#allocation37_spill] sm:$0xff]  ;;  %vm8127_vm0 = vcmp.eq.s32.totalorder %v8126_v56, %v4681_v57  ;;  %v8138_v62 = vld [vmem:[#allocation20_spill] sm:$0xff]  ;;  %vm1749_vm15 = vcmp.eq.s32.totalorder %v6130_v17, %v4681_v57 }
 0x400   : > { %v8137_v25 = vld [vmem:[#allocation119_spill] sm:$0xff]  ;;  %v8243_v17 = vld [vmem:[#allocation138_spill] sm:$0xff] }
 0x401   : > { %v2356_v0 = vadd.f32 %v2340_v5, %v2100_v24  ;;  %v534_v24 = vsel %vm8127_vm0, %v8125_v44, 0.0  ;;  %v8128_v5 = vld [vmem:[#allocation56_spill] sm:$0xff]  ;;  %vm8139_vm0 = vcmp.eq.s32.totalorder %v8138_v62, %v4681_v57  ;;  %v8140_v44 = vld [vmem:[#allocation150_spill] sm:$0xff] }
 0x403   : > { %3975 = vset.pattern.permute.xlu1 %v7919_v2  ;;  %3976 = vset.pattern.permute.xlu2 %v7922_v35 }
 0x404   : > { %1862 = vperm.xlu1 %3975, %v4172_v19   ;;  %2114 = vperm.xlu2 %3976, %v4173_v54   ;;  %v2307_v27 = vpop.permute.xlu1 %2306 }
 0x405   : > { %v2339_v63 = vsel %vm7660_vm9, %v2307_v27, 0.0  ;;  %vm8124_vm9 = vcmp.eq.s32.totalorder %v8123_v9, %v4681_v57  ;;  %v8131_v27 = vld [vmem:[#allocation47_spill] sm:$0xff] }
 0x406   : > { %v2355_v50 = vadd.f32 %v2339_v63, %v2099_v46  ;;  %v2063_v1 = vpop.permute.xlu2 %2062  ;;  %v805_v48 = vsel %vm8124_vm9, %v8122_v26, 0.0  ;;  %v8132_v46 = vld [vmem:[#allocation33_spill] sm:$0xff]  ;;  %v1318_v26 = vsel %vm8139_vm0, %v8137_v25, 0.0 }
 0x407   : > { %vm8133_vm14 = vcmp.eq.s32.totalorder %v8132_v46, %v4681_v57 }
 0x408   : > { %v2462_v7 = vpack.c.bf16 %v2356_v0, %v2355_v50  ;;  %v533_v63 = vsel %vm8133_vm14, %v8131_v27, 0.0  ;;  %v822_v0 = vadd.f32 %v806_v23, %v534_v24  ;;  %v8134_v50 = vld [vmem:[#allocation63_spill] sm:$0xff]  ;;  %v8142_v23 = vld [vmem:[#allocation8_spill] sm:$0xff] }
 0x409   : > { %vm8143_vm14 = vcmp.eq.s32.totalorder %v8142_v23, %v4681_v57 }
 0x40a   : > { %3813 = vmatmul.msk.bf16.gmra.mxu0 %vm2489_vm13, %v2462_v7  ;;  %v8135_v7 = vld [vmem:[#allocation98_spill] sm:$0xff] }
 0x40b   : > { %vm8136_vm9 = vcmp.eq.s32.totalorder %v8135_v7, %v4681_v57 }
 0x40c   : > { %3978 = vset.pattern.permute.xlu1 %v7914_v29  ;;  %3979 = vset.pattern.permute.xlu2 %v7914_v29 }
 0x40d   : > { %2370 = vperm.xlu1 %3978, %v4173_v54   ;;  %2374 = vperm.xlu2 %3979, %v4172_v19   ;;  %v6471_v12 = vpop.permute.xlu1 %1729  ;;  %v8129_v19 = vld [vmem:[#allocation106_spill] sm:$0xff] }
 0x40e   : > { %8117 = vst [vmem:[#allocation129_spill] sm:$0xff] %v6471_v12  ;;  %vm8130_vm8 = vcmp.eq.s32.totalorder %v8129_v19, %v4681_v57  ;;  %v8144_v19 = vld [vmem:[#allocation161_spill] sm:$0xff] }
 0x40f   : > { %v6473_v10 = vpop.permute.xlu2 %2241  ;;  %v1062_v54 = vsel %vm8130_vm8, %v8128_v5, 0.0  ;;  %vm7665_vm8 = vcmp.eq.s32.totalorder %v8140_v44, %v4681_v57  ;;  %v8141_v5 = vld [vmem:[#allocation127_spill] sm:$0xff] }
 0x410   : > { %8118 = vst [vmem:[#allocation130_spill] sm:$0xff] %v6473_v10  ;;  %v1078_v9 = vadd.f32 %v1062_v54, %v822_v0  ;;  %v1317_v24 = vsel %vm8143_vm14, %v8141_v5, 0.0  ;;  %v8147_v0 = vld [vmem:[#allocation155_spill] sm:$0xff]  ;;  %vm7669_vm14 = vcmp.eq.s32.totalorder %v6451_v21, %v4681_v57 }
 0x411   : > { %vm8148_vm0 = vcmp.eq.s32.totalorder %v8147_v0, %v4681_v57 }
 0x412   : > { %v1334_v46 = vadd.f32 %v1318_v26, %v1078_v9  ;;  %v1829_v26 = vsel %vm1749_vm15, %v6395_v61, 0.0 }
 0x415   : > { %3980 = vset.pattern.permute.xlu1 %v7919_v2  ;;  %3981 = vset.pattern.permute.xlu2 %v7919_v2  ;;  %v1807_v36 = vpop.permute.xlu1 %1806 }
 0x416   : > { %1866 = vperm.xlu1 %3980, %v4174_v60   ;;  %1870 = vperm.xlu2 %3981, %v4175_v13  }
 0x418   : > { %v6479_v39 = vpop.permute.xlu2 %1732 }
 0x41e   : > { %3982 = vset.pattern.permute.xlu1 %v7922_v35  ;;  %3983 = vset.pattern.permute.xlu2 %v7914_v29  ;;  %v2059_v55 = vpop.permute.xlu1 %2058 }
 0x41f   : > { %2126 = vperm.xlu1 %3982, %v4175_v13   ;;  %2378 = vperm.xlu2 %3983, %v4174_v60   ;;  %v1061_v60 = vsel %vm8136_vm9, %v8134_v50, 0.0  ;;  %v821_v13 = vadd.f32 %v805_v48, %v533_v63  ;;  %v1574_v48 = vsel %vm7665_vm8, %v8144_v19, 0.0  ;;  %vm7664_vm9 = vcmp.eq.s32.totalorder %v6471_v12, %v4681_v57  ;;  %v8146_v63 = vld [vmem:[#allocation160_spill] sm:$0xff] }
 0x420   : > { %v6521_v27 = vpop.permute.xlu2 %1810  ;;  %v1573_v50 = vsel %vm8148_vm0, %v8146_v63, 0.0  ;;  %v1830_v7 = vsel %vm7664_vm9, %v1807_v36, 0.0  ;;  %v1590_v62 = vadd.f32 %v1574_v48, %v1334_v46  ;;  %v2085_v36 = vsel %vm7669_vm14, %v2059_v55, 0.0 }
 0x421   : > { %v1077_v56 = vadd.f32 %v1061_v60, %v821_v13  ;;  %v4176_v60 = vld [vmem:[%s4391_s13 + $0x30] sm:$0xff]  ;;  %v4177_v13 = vld [vmem:[%s4391_s13 + $0x38] sm:$0xff]  ;;  %vm7668_vm9 = vcmp.eq.s32.totalorder %v5929_v38, %v4681_v57  ;;  %vm7667_vm8 = vcmp.eq.s32.totalorder %v6473_v10, %v4681_v57 }
 0x422   : > { %v1846_v5 = vadd.f32 %v1830_v7, %v1590_v62  ;;  %v2086_v61 = vsel %vm7668_vm9, %v2063_v1, 0.0  ;;  %v4178_v7 = vld [vmem:[%s4391_s13 + $0x40] sm:$0xff]  ;;  %v8167_v10 = vld [vmem:[#allocation132_spill] sm:$0xff] }
 0x423   : > { %v1333_v25 = vadd.f32 %v1317_v24, %v1077_v56 }
 0x424   : > { %v2102_v48 = vadd.f32 %v2086_v61, %v1846_v5  ;;  %v8150_v5 = vld [vmem:[#allocation78_spill] sm:$0xff] }
 0x425   : > { %v1589_v9 = vadd.f32 %v1573_v50, %v1333_v25 }
 0x427   : > { %3985 = vset.pattern.permute.xlu1 %v7919_v2  ;;  %3986 = vset.pattern.permute.xlu2 %v7919_v2  ;;  %v6529_v54 = vpop.permute.xlu1 %2238  ;;  %v1845_v56 = vadd.f32 %v1829_v26, %v1589_v9  ;;  %v8149_v9 = vld [vmem:[#allocation83_spill] sm:$0xff] }
 0x428   : > { %8145 = vst [vmem:[#allocation134_spill] sm:$0xff] %v6529_v54  ;;  %1874 = vperm.xlu1 %3985, %v4176_v60   ;;  %1878 = vperm.xlu2 %3986, %v4177_v13   ;;  %vm7666_vm0 = vcmp.eq.s32.totalorder %v6529_v54, %v4681_v57  ;;  %v8165_v54 = vld [vmem:[#allocation4_spill] sm:$0xff] }
 0x429   : > { %v2341_v23 = vsel %vm7666_vm0, %v6037_v47, 0.0  ;;  %v6562_v24 = vpop.permute.xlu2 %1991  ;;  %v2101_v19 = vadd.f32 %v2085_v36, %v1845_v56  ;;  %vm8151_vm0 = vcmp.eq.s32.totalorder %v8150_v5, %v4681_v57  ;;  %v8153_v56 = vld [vmem:[#allocation76_spill] sm:$0xff] }
 0x42a   : > { %v808_v36 = vsel %vm8151_vm0, %v8149_v9, 0.0  ;;  %v8162_v9 = vld [vmem:[#allocation22_spill] sm:$0xff] }
 0x42b   : > { %v2357_v1 = vadd.f32 %v2341_v23, %v2101_v19  ;;  %v8155_v19 = vld [vmem:[#allocation50_spill] sm:$0xff]  ;;  %vm8163_vm14 = vcmp.eq.s32.totalorder %v8162_v9, %v4681_v57 }
 0x42f   : > { %v2319_v55 = vpop.permute.xlu1 %2318 }
 0x430   : > { %3987 = vset.pattern.permute.xlu1 %v7922_v35  ;;  %v2342_v46 = vsel %vm7667_vm8, %v2319_v55, 0.0  ;;  %3988 = vset.pattern.permute.xlu2 %v7922_v35  ;;  %vm8154_vm8 = vcmp.eq.s32.totalorder %v8153_v56, %v4681_v57  ;;  %v8156_v55 = vld [vmem:[#allocation36_spill] sm:$0xff]  ;;  %v8164_v56 = vld [vmem:[#allocation111_spill] sm:$0xff] }
 0x431   : > { %v2358_v63 = vadd.f32 %v2342_v46, %v2102_v48  ;;  %2130 = vperm.xlu1 %3987, %v4176_v60   ;;  %2134 = vperm.xlu2 %3988, %v4177_v13   ;;  %v2071_v0 = vpop.permute.xlu2 %2070  ;;  %v4179_v60 = vld [vmem:[%s4391_s13 + $0x48] sm:$0xff]  ;;  %vm8157_vm9 = vcmp.eq.s32.totalorder %v8156_v55, %v4681_v57  ;;  %v8168_v55 = vld [vmem:[#allocation10_spill] sm:$0xff] }
 0x432   : > { %v536_v48 = vsel %vm8157_vm9, %v8155_v19, 0.0  ;;  %v8158_v46 = vld [vmem:[#allocation55_spill] sm:$0xff]  ;;  %vm8169_vm9 = vcmp.eq.s32.totalorder %v8168_v55, %v4681_v57  ;;  %v4181_v55 = vld [vmem:[%s4391_s13 + $0x50] sm:$0xff] }
 0x433   : > { %v2463_v47 = vpack.c.bf16 %v2358_v63, %v2357_v1  ;;  %v8159_v1 = vld [vmem:[#allocation101_spill] sm:$0xff]  ;;  %v1320_v19 = vsel %vm8169_vm9, %v8167_v10, 0.0  ;;  %vm2263_vm9 = vcmp.eq.s32.totalorder %v6048_v49, %v4681_v57 }
 0x434   : > { %vm8160_vm0 = vcmp.eq.s32.totalorder %v8159_v1, %v4681_v57  ;;  %v8170_v1 = vld [vmem:[#allocation123_spill] sm:$0xff]  ;;  %v8251_v49 = vld [vmem:[#allocation177_spill] sm:$0xff] }
 0x435   : > { %3814 = vmatmul.msk.bf16.gmra.mxu0 %vm2489_vm13, %v2463_v47  ;;  %v1064_v63 = vsel %vm8160_vm0, %v8158_v46, 0.0  ;;  %v8161_v47 = vld [vmem:[#allocation51_spill] sm:$0xff]  ;;  %v8171_v46 = vld [vmem:[#allocation52_spill] sm:$0xff] }
 0x436   : > { %v535_v5 = vsel %vm8163_vm14, %v8161_v47, 0.0  ;;  %vm8172_vm0 = vcmp.eq.s32.totalorder %v8171_v46, %v4681_v57  ;;  %v8173_v47 = vld [vmem:[#allocation162_spill] sm:$0xff]  ;;  %vm1751_vm14 = vcmp.eq.s32.totalorder %v6479_v39, %v4681_v57 }
 0x437   : > { %v1319_v12 = vsel %vm8172_vm0, %v8170_v1, 0.0 }
 0x438   : > { %v6570_v50 = vpop.permute.xlu1 %1735 }
 0x439   : > { %3989 = vset.pattern.permute.xlu1 %v7914_v29  ;;  %3990 = vset.pattern.permute.xlu2 %v7919_v2 }
 0x43a   : > { %2390 = vperm.xlu1 %3989, %v4177_v13   ;;  %1882 = vperm.xlu2 %3990, %v4178_v7   ;;  %v2323_v62 = vpop.permute.xlu2 %2322  ;;  %v8152_v13 = vld [vmem:[#allocation90_spill] sm:$0xff] }
 0x43b   : > { %v807_v61 = vsel %vm8154_vm8, %v8152_v13, 0.0  ;;  %v824_v13 = vadd.f32 %v808_v36, %v536_v48  ;;  %vm8166_vm8 = vcmp.eq.s32.totalorder %v8165_v54, %v4681_v57  ;;  %v1576_v54 = vsel %vm1496_vm7, %v8173_v47, 0.0  ;;  %v6664_v48 = vpop.f32.mrf.mxu0 }
 0x43d   : > { %v1080_v38 = vadd.f32 %v1064_v63, %v824_v13 }
 0x43f   : > { %v1336_v10 = vadd.f32 %v1320_v19, %v1080_v38 }
 0x441   : > { %v6575_v25 = vpop.permute.xlu1 %1988 }
 0x442   : > { %3992 = vset.pattern.permute.xlu1 %v7922_v35  ;;  %3993 = vset.pattern.permute.xlu2 %v7922_v35  ;;  %vm2007_vm7 = vcmp.eq.s32.totalorder %v6575_v25, %v4681_v57  ;;  %v4202_v25 = vmov 0.0  }
 0x443   : > { %2138 = vperm.xlu1 %3992, %v4178_v7   ;;  %2142 = vperm.xlu2 %3993, %v4179_v60   ;;  %v6590_v23 = vpop.permute.xlu2 %1850 }
 0x449   : > { %v2067_v26 = vpop.permute.xlu1 %2066 }
 0x44b   : > { %3994 = vset.pattern.permute.xlu1 %v7914_v29  ;;  %3995 = vset.pattern.permute.xlu2 %v7914_v29 }
 0x44c   : > { %2394 = vperm.xlu1 %3994, %v4178_v7   ;;  %2398 = vperm.xlu2 %3995, %v4179_v60   ;;  %v1063_v7 = vsel %vm8166_vm8, %v8164_v56, 0.0  ;;  %v823_v60 = vadd.f32 %v807_v61, %v535_v5  ;;  %vm1752_vm8 = vcmp.eq.s32.totalorder %v6570_v50, %v4681_v57  ;;  %v8175_v61 = vld [vmem:[#allocation170_spill] sm:$0xff]  ;;  %v1592_v56 = vadd.f32 %v1576_v54, %v1336_v10 }
 0x44d   : > { %v1575_v63 = vsel %vm1495_vm3, %v8175_v61, 0.0  ;;  %vm2008_vm3 = vcmp.eq.s32.totalorder %v6562_v24, %v4681_v57 }
 0x44e   : > { %v1079_v9 = vadd.f32 %v1063_v7, %v823_v60  ;;  %v1831_v7 = vsel %vm1751_vm14, %v6521_v27, 0.0  ;;  %v1832_v60 = vsel %vm1752_vm8, %v6150_v6, 0.0  ;;  %v2087_v27 = vsel %vm2007_vm7, %v2067_v26, 0.0  ;;  %v2111_v6 = vpop.permute.xlu2 %2110 }
 0x44f   : > { %v1848_v1 = vadd.f32 %v1832_v60, %v1592_v56  ;;  %v2088_v46 = vsel %vm2008_vm3, %v2071_v0, 0.0  ;;  %v2343_v26 = vsel %vm2263_vm9, %v2323_v62, 0.0  ;;  %v4183_v60 = vld [vmem:[%s4391_s13 + $0x68] sm:$0xff] }
 0x450   : > { %v1335_v5 = vadd.f32 %v1319_v12, %v1079_v9  ;;  %v4180_v12 = vld [vmem:[%s4391_s13 + $0x58] sm:$0xff] }
 0x451   : > { %v2104_v36 = vadd.f32 %v2088_v46, %v1848_v1 }
 0x452   : > { %v1591_v38 = vadd.f32 %v1575_v63, %v1335_v5  ;;  %v8177_v5 = vld [vmem:[#allocation172_spill] sm:$0xff] }
 0x453   : > { %v6628_v13 = vpop.permute.xlu1 %2247  ;;  %v1658_v56 = vsel %vm1482_vm5, %v8177_v5, 0.0 }
 0x454   : > { %3996 = vset.pattern.permute.xlu1 %v7919_v2  ;;  %3997 = vset.pattern.permute.xlu2 %v7922_v35  ;;  %v1847_v19 = vadd.f32 %v1831_v7, %v1591_v38  ;;  %vm2264_vm0 = vcmp.eq.s32.totalorder %v6628_v13, %v4681_v57  ;;  %v4182_v7 = vld [vmem:[%s4391_s13 + $0x60] sm:$0xff]  ;;  %v1914_v38 = vsel %vm1738_vm2, %v6155_v22, 0.0  ;;  %v8179_v22 = vld [vmem:[#allocation164_spill] sm:$0xff] }
 0x455   : > { %1894 = vperm.xlu1 %3996, %v4180_v12   ;;  %2146 = vperm.xlu2 %3997, %v4181_v55  }
 0x456   : > { %v2103_v9 = vadd.f32 %v2087_v27, %v1847_v19  ;;  %v2367_v63 = vpop.permute.xlu2 %2366  ;;  %v6684_v27 = vpop.f32.mrf.mxu0  ;;  %v2170_v19 = vsel %vm1994_vm10, %v2111_v6, 0.0 }
 0x457   : > { %v2426_v51 = vsel %vm2250_vm12, %v2367_v63, 0.0  ;;  %vm8196_vm12 = vcmp.eq.s32.totalorder %v8018_v16, %v4681_v57 }
 0x458   : > { %v2359_v10 = vadd.f32 %v2343_v26, %v2103_v9 }
 0x45b   : > { %v2327_v47 = vpop.permute.xlu1 %2326 }
 0x45c   : > { %v2344_v54 = vsel %vm2264_vm0, %v2327_v47, 0.0 }
 0x45d   : > { %v2360_v0 = vadd.f32 %v2344_v54, %v2104_v36  ;;  %3999 = vset.pattern.permute.xlu1 %v7914_v29  ;;  %4000 = vset.pattern.permute.xlu2 %v7914_v29 }
 0x45e   : > { %2402 = vperm.xlu1 %3999, %v4181_v55   ;;  %2406 = vperm.xlu2 %4000, %v4180_v12   ;;  %v1913_v12 = vsel %vm1737_vm4, %v6590_v23, 0.0  ;;  %v1674_v55 = vadd.f32 %v1658_v56, %v8178_v8  ;;  %v2115_v1 = vpop.permute.xlu2 %2114  ;;  %v6701_v14 = vpop.f32.mrf.mxu0  ;;  %v4184_v56 = vld [vmem:[%s4391_s13 + $0x70] sm:$0xff] }
 0x45f   : > { %v2464_v61 = vpack.c.bf16 %v2360_v0, %v2359_v10  ;;  %v1929_v9 = vadd.f32 %v1913_v12, %v8179_v22  ;;  %v8186_v12 = vld [vmem:[#allocation79_spill] sm:$0xff] }
 0x460   : > { %v1930_v34 = vadd.f32 %v1914_v38, %v1674_v55  ;;  %vm8187_vm4 = vcmp.eq.s32.totalorder %v8186_v12, %v4681_v57 }
 0x461   : > { %3815 = vmatmul.msk.bf16.gmra.mxu0 %vm2489_vm13, %v2464_v61  ;;  %v8181_v61 = vld [vmem:[#allocation181_spill] sm:$0xff]  ;;  %v2172_v8 = vsel %vm8187_vm4, %v6223_v37, 0.0  ;;  %vm8200_vm4 = vcmp.eq.s32.totalorder %v6034_v41, %v4681_v57 }
 0x462   : > { %v2186_v23 = vadd.f32 %v2170_v19, %v1930_v34  ;;  %vm8182_vm5 = vcmp.eq.s32.totalorder %v8181_v61, %v4681_v57  ;;  %v8188_v19 = vld [vmem:[#allocation183_spill] sm:$0xff] }
 0x464   : > { %v2107_v62 = vpop.permute.xlu1 %2106  ;;  %v2442_v6 = vadd.f32 %v2426_v51, %v2186_v23 }
 0x465   : > { %v2169_v46 = vsel %vm1993_vm6, %v2107_v62, 0.0  ;;  %v8183_v62 = vld [vmem:[#allocation166_spill] sm:$0xff]  ;;  %vm8189_vm6 = vcmp.eq.s32.totalorder %v8188_v19, %v4681_v57 }
 0x466   : > { %4001 = vset.pattern.permute.xlu1 %v7919_v2  ;;  %4002 = vset.pattern.permute.xlu2 %v7919_v2  ;;  %v2185_v47 = vadd.f32 %v2169_v46, %v1929_v9  ;;  %v6720_v55 = vpop.f32.mrf.mxu0  ;;  %v8190_v46 = vld [vmem:[#allocation165_spill] sm:$0xff] }
 0x467   : > { %1898 = vperm.xlu1 %4001, %v4182_v7   ;;  %1902 = vperm.xlu2 %4002, %v4183_v60   ;;  %v2375_v10 = vpop.permute.xlu2 %2374 }
 0x46d   : > { %v2363_v36 = vpop.permute.xlu1 %2362 }
 0x46e   : > { %v2425_v31 = vsel %vm2249_vm11, %v2363_v36, 0.0  ;;  %v8193_v36 = vld [vmem:[#allocation18_spill] sm:$0xff] }
 0x46f   : > { %v2441_v54 = vadd.f32 %v2425_v31, %v2185_v47  ;;  %4003 = vset.pattern.permute.xlu1 %v7922_v35  ;;  %4004 = vset.pattern.permute.xlu2 %v7914_v29  ;;  %v8191_v47 = vld [vmem:[#allocation68_spill] sm:$0xff]  ;;  %vm8194_vm11 = vcmp.eq.s32.totalorder %v8193_v36, %v4681_v57 }
 0x470   : > { %2158 = vperm.xlu1 %4003, %v4183_v60   ;;  %2410 = vperm.xlu2 %4004, %v4182_v7   ;;  %v4185_v7 = vld [vmem:[%s4391_s13 + $0x78] sm:$0xff]  ;;  %v8184_v60 = vld [vmem:[#allocation180_spill] sm:$0xff]  ;;  %v1871_v9 = vpop.permute.xlu2 %1870  ;;  %vm8192_vm10 = vcmp.eq.s32.totalorder %v8191_v47, %v4681_v57 }
 0x471   : > { %v2465_v58 = vpack.c.bf16 %v2442_v6, %v2441_v54  ;;  %vm8185_vm2 = vcmp.eq.s32.totalorder %v8184_v60, %v4681_v57  ;;  %v6734_v6 = vpop.f32.mrf.mxu0  ;;  %v8195_v54 = vld [vmem:[#allocation175_spill] sm:$0xff]  ;;  %v1918_v60 = vsel %vm8200_vm4, %v1871_v9, 0.0 }
 0x472   : > { %v1915_v38 = vsel %vm8185_vm2, %v6165_v4, 0.0  ;;  %v2428_v4 = vsel %vm8192_vm10, %v2375_v10, 0.0  ;;  %v8197_v10 = vld [vmem:[#allocation128_spill] sm:$0xff]  ;;  %vm8199_vm2 = vcmp.eq.s32.totalorder %v6044_v11, %v4681_v57 }
 0x473   : > { %3816 = vmatmul.msk.bf16.gmra.mxu0 %vm2489_vm13, %v2465_v58  ;;  %v1931_v34 = vadd.f32 %v1915_v38, %v8190_v46  ;;  %v1661_v58 = vsel %vm8196_vm12, %v8195_v54, 0.0  ;;  %v8201_v38 = vld [vmem:[#allocation168_spill] sm:$0xff] }
 0x474   : > { %v1934_v12 = vadd.f32 %v1918_v60, %v8201_v38  ;;  %v8203_v11 = vld [vmem:[#allocation96_spill] sm:$0xff] }
 0x475   : > { %vm8204_vm10 = vcmp.eq.s32.totalorder %v8203_v11, %v4681_v57 }
 0x476   : > { %v1863_v0 = vpop.permute.xlu1 %1862 }
 0x477   : > { %v1916_v63 = vsel %vm8182_vm5, %v1863_v0, 0.0  ;;  %v1677_v0 = vadd.f32 %v1661_v58, %v8197_v10  ;;  %vm8198_vm5 = vcmp.eq.s32.totalorder %v5925_v45, %v4681_v57  ;;  %v8215_v10 = vld [vmem:[#allocation141_spill] sm:$0xff] }
 0x478   : > { %4006 = vset.pattern.permute.xlu1 %v7919_v2  ;;  %4007 = vset.pattern.permute.xlu2 %v7919_v2  ;;  %v1932_v5 = vadd.f32 %v1916_v63, %v8183_v62  ;;  %v2171_v2 = vsel %vm8189_vm6, %v2115_v1, 0.0  ;;  %vm8202_vm6 = vcmp.eq.s32.totalorder %v5991_v53, %v4681_v57 }
 0x479   : > { %1906 = vperm.xlu1 %4006, %v4184_v56   ;;  %1910 = vperm.xlu2 %4007, %v4185_v7   ;;  %v2187_v51 = vadd.f32 %v2171_v2, %v1931_v34  ;;  %v2379_v61 = vpop.permute.xlu2 %2378 }
 0x47a   : > { %v2188_v22 = vadd.f32 %v2172_v8, %v1932_v5  ;;  %v2173_v5 = vsel %vm8199_vm2, %v6256_v33, 0.0  ;;  %v2430_v33 = vsel %vm8204_vm10, %v6266_v43, 0.0  ;;  %v8209_v43 = vld [vmem:[#allocation169_spill] sm:$0xff] }
 0x47c   : > { %v2444_v31 = vadd.f32 %v2428_v4, %v2188_v22 }
 0x47f   : > { %v2371_v23 = vpop.permute.xlu1 %2370 }
 0x480   : > { %v2427_v37 = vsel %vm8194_vm11, %v2371_v23, 0.0  ;;  %v8207_v23 = vld [vmem:[#allocation108_spill] sm:$0xff] }
 0x481   : > { %v2443_v26 = vadd.f32 %v2427_v37, %v2187_v51  ;;  %4008 = vset.pattern.permute.xlu1 %v7922_v35  ;;  %4009 = vset.pattern.permute.xlu2 %v7922_v35  ;;  %vm8208_vm12 = vcmp.eq.s32.totalorder %v8207_v23, %v4681_v57  ;;  %v8210_v37 = vld [vmem:[#allocation64_spill] sm:$0xff] }
 0x482   : > { %2162 = vperm.xlu1 %4008, %v4184_v56   ;;  %2166 = vperm.xlu2 %4009, %v4185_v7   ;;  %v6750_v56 = vpop.f32.mrf.mxu0  ;;  %v1879_v8 = vpop.permute.xlu2 %1878 }
 0x483   : > { %v2466_v1 = vpack.c.bf16 %v2444_v31, %v2443_v26  ;;  %v8212_v31 = vld [vmem:[#allocation178_spill] sm:$0xff] }
 0x485   : > { %3817 = vmatmul.msk.bf16.gmra.mxu0 %vm2489_vm13, %v2466_v1  ;;  %v8213_v1 = vld [vmem:[#allocation143_spill] sm:$0xff] }
 0x486   : > { %vm8214_vm2 = vcmp.eq.s32.totalorder %v8213_v1, %v4681_v57 }
 0x487   : > { %v1664_v54 = vsel %vm8214_vm2, %v8212_v31, 0.0  ;;  %vm8227_vm2 = vcmp.eq.s32.totalorder %v5911_v18, %v4681_v57 }
 0x488   : > { %v1867_v63 = vpop.permute.xlu1 %1866 }
 0x489   : > { %v1917_v35 = vsel %vm8198_vm5, %v1867_v63, 0.0  ;;  %vm8211_vm5 = vcmp.eq.s32.totalorder %v8210_v37, %v4681_v57 }
 0x48a   : > { %v1933_v62 = vadd.f32 %v1917_v35, %v1677_v0  ;;  %4010 = vset.pattern.permute.xlu1 %v7914_v29  ;;  %v6766_v34 = vpop.f32.mrf.mxu0  ;;  %v8216_v0 = vld [vmem:[#allocation117_spill] sm:$0xff]  ;;  %v8218_v35 = vld [vmem:[#allocation182_spill] sm:$0xff] }
 0x48b   : > { %2422 = vperm.xlu1 %4010, %v4185_v7   ;;  %v8205_v7 = vld [vmem:[#allocation35_spill] sm:$0xff]  ;;  %v2135_v53 = vpop.permute.xlu2 %2134  ;;  %vm8217_vm4 = vcmp.eq.s32.totalorder %v8216_v0, %v4681_v57  ;;  %v2151_v0 = vpop.permute.xlu0 %2150 }
 0x48c   : > { %v2189_v16 = vadd.f32 %v2173_v5, %v1933_v62  ;;  %vm8206_vm11 = vcmp.eq.s32.totalorder %v8205_v7, %v4681_v57 }
 0x48d   : > { %v2429_v2 = vsel %vm8206_vm11, %v2379_v61, 0.0  ;;  %v2431_v61 = vsel %vm8217_vm4, %v8215_v10, 0.0  ;;  %vm8229_vm4 = vcmp.eq.s32.totalorder %v6029_v15, %v4681_v57 }
 0x48e   : > { %v2445_v41 = vadd.f32 %v2429_v2, %v2189_v16  ;;  %v8220_v16 = vld [vmem:[#allocation133_spill] sm:$0xff] }
 0x48f   : > { %v1680_v60 = vadd.f32 %v1664_v54, %v8220_v16 }
 0x491   : > { %v2127_v45 = vpop.permute.xlu1 %2126 }
 0x492   : > { %v2174_v29 = vsel %vm8202_vm6, %v2127_v45, 0.0  ;;  %v6769_v51 = vpop.f32.mrf.mxu0  ;;  %vm8219_vm6 = vcmp.eq.s32.totalorder %v8218_v35, %v4681_v57 }
 0x493   : > { %v2190_v19 = vadd.f32 %v2174_v29, %v1934_v12  ;;  %v1920_v62 = vsel %vm8219_vm6, %v1879_v8, 0.0  ;;  %v8221_v12 = vld [vmem:[#allocation94_spill] sm:$0xff]  ;;  %vm8230_vm6 = vcmp.eq.s32.totalorder %v6264_v59, %v4681_v57 }
 0x494   : > { %v1883_v63 = vpop.permute.xlu2 %1882  ;;  %vm8222_vm10 = vcmp.eq.s32.totalorder %v8221_v12, %v4681_v57  ;;  %v1936_v29 = vadd.f32 %v1920_v62, %v1680_v60  ;;  %v8234_v60 = vld [vmem:[#allocation140_spill] sm:$0xff] }
 0x495   : > { %v2446_v46 = vadd.f32 %v2430_v33, %v2190_v19  ;;  %v2176_v45 = vsel %vm8222_vm10, %v2135_v53, 0.0  ;;  %v8223_v33 = vld [vmem:[#allocation131_spill] sm:$0xff]  ;;  %vm8232_vm10 = vcmp.eq.s32.totalorder %v6385_v20, %v4681_v57 }
 0x496   : > { %v2192_v19 = vadd.f32 %v2176_v45, %v1936_v29  ;;  %vm8224_vm11 = vcmp.eq.s32.totalorder %v8223_v33, %v4681_v57  ;;  %v2180_v59 = vsel %vm8232_vm10, %v2151_v0, 0.0 }
 0x497   : > { %v2467_v22 = vpack.c.bf16 %v2446_v46, %v2445_v41 }
 0x499   : > { %3818 = vmatmul.msk.bf16.vlgmr.msra.gmra.mxu2 %vm2489_vm13, %v2467_v22 }
 0x49a   : > { %v1875_v9 = vpop.permute.xlu1 %1874  ;;  %v6790_v38 = vpop.f32.mrf.mxu0 }
 0x49b   : > { %v1919_v47 = vsel %vm8208_vm12, %v1875_v9, 0.0  ;;  %vm8225_vm12 = vcmp.eq.s32.totalorder %v6262_v30, %v4681_v57 }
 0x49c   : > { %v1935_v4 = vadd.f32 %v1919_v47, %v8209_v43  ;;  %v1921_v9 = vsel %vm8225_vm12, %v1883_v63, 0.0  ;;  %vm8236_vm12 = vcmp.eq.s32.totalorder %v6435_v3, %v4681_v57 }
 0x49d   : > { %v2143_v41 = vpop.permute.xlu2 %2142 }
 0x4a2   : > { %v6798_v8 = vpop.f32.mrf.mxu0 }
 0x4a3   : > { %v2131_v36 = vpop.permute.xlu1 %2130 }
 0x4a4   : > { %v2175_v26 = vsel %vm8211_vm5, %v2131_v36, 0.0  ;;  %vm8226_vm5 = vcmp.eq.s32.totalorder %v6275_v28, %v4681_v57 }
 0x4a5   : > { %v2191_v58 = vadd.f32 %v2175_v26, %v1935_v4  ;;  %v2178_v47 = vsel %vm8226_vm5, %v2143_v41, 0.0  ;;  %v8228_v4 = vld [vmem:[#allocation171_spill] sm:$0xff]  ;;  %vm8238_vm5 = vcmp.eq.s32.totalorder %v6451_v21, %v4681_v57 }
 0x4a6   : > { %v2399_v23 = vpop.permute.xlu2 %2398  ;;  %v1937_v36 = vadd.f32 %v1921_v9, %v8228_v4  ;;  %v2194_v30 = vadd.f32 %v2178_v47, %v6309_v32  ;;  %v8231_v32 = vld [vmem:[#allocation173_spill] sm:$0xff] }
 0x4a7   : > { %v2447_v5 = vadd.f32 %v2431_v61, %v2191_v58  ;;  %v2434_v37 = vsel %vm8229_vm4, %v2399_v23, 0.0 }
 0x4a8   : > { %v2450_v28 = vadd.f32 %v2434_v37, %v2194_v30 }
 0x4aa   : > { %v6804_v53 = vpop.f32.mrf.mxu0 }
 0x4ac   : > { %v2391_v11 = vpop.permute.xlu1 %2390 }
 0x4ad   : > { %v2432_v7 = vsel %vm8224_vm11, %v2391_v11, 0.0  ;;  %vm8233_vm11 = vcmp.eq.s32.totalorder %v6342_v42, %v4681_v57 }
 0x4ae   : > { %v2448_v2 = vadd.f32 %v2432_v7, %v2192_v19  ;;  %v2155_v7 = vpop.permute.xlu0 %2154 }
 0x4af   : > { %v2147_v18 = vpop.permute.xlu2 %2146  ;;  %v2181_v3 = vsel %vm8238_vm5, %v2155_v7, 0.0 }
 0x4b0   : > { %v2468_v46 = vpack.c.bf16 %v2448_v2, %v2447_v5  ;;  %v2179_v5 = vsel %vm8233_vm11, %v2147_v18, 0.0 }
 0x4b1   : > { %v2195_v12 = vadd.f32 %v2179_v5, %v8234_v60  ;;  %v8250_v60 = vld [vmem:[#allocation176_spill] sm:$0xff] }
 0x4b2   : > { %3819 = vmatmul.msk.bf16.vlgmr.msra.gmra.mxu3 %vm2489_vm13, %v2468_v46  ;;  %v6820_v10 = vpop.f32.mrf.mxu0 }
 0x4b5   : > { %v2139_v22 = vpop.permute.xlu1 %2138 }
 0x4b6   : > { %v2177_v43 = vsel %vm8227_vm2, %v2139_v22, 0.0  ;;  %v8239_v22 = vld [vmem:[#allocation179_spill] sm:$0xff]  ;;  %vm8240_vm2 = vcmp.eq.s32.totalorder %v8140_v44, %v4681_v57  ;;  %v8246_v44 = vld [vmem:[#allocation130_spill] sm:$0xff] }
 0x4b7   : > { %v2193_v26 = vadd.f32 %v2177_v43, %v1937_v36  ;;  %v1670_v9 = vsel %vm8240_vm2, %v8239_v22, 0.0  ;;  %v8241_v43 = vld [vmem:[#allocation129_spill] sm:$0xff] }
 0x4b8   : > { %v2407_v16 = vpop.permute.xlu2 %2406  ;;  %vm8242_vm4 = vcmp.eq.s32.totalorder %v8241_v43, %v4681_v57  ;;  %v1686_v36 = vadd.f32 %v1670_v9, %v8243_v17 }
 0x4ba   : > { %v6830_v62 = vpop.f32.mrf.mxu0 }
 0x4be   : > { %v2395_v31 = vpop.permute.xlu1 %2394 }
 0x4bf   : > { %v2433_v1 = vsel %vm8230_vm6, %v2395_v31, 0.0  ;;  %v8244_v31 = vld [vmem:[#allocation91_spill] sm:$0xff]  ;;  %vm8247_vm6 = vcmp.eq.s32.totalorder %v8246_v44, %v4681_v57 }
 0x4c0   : > { %v2449_v54 = vadd.f32 %v2433_v1, %v2193_v26  ;;  %v2415_v1 = vpop.permute.xlu0 %2414 }
 0x4c1   : > { %v1903_v42 = vpop.permute.xlu2 %1902 }
 0x4c2   : > { %v2469_v58 = vpack.c.bf16 %v2450_v28, %v2449_v54  ;;  %v6842_v33 = vpop.f32.mrf.mxu0  ;;  %v1926_v4 = vsel %vm8242_vm4, %v1903_v42, 0.0  ;;  %v2438_v54 = vsel %vm8247_vm6, %v2415_v1, 0.0 }
 0x4c3   : > { %v1942_v37 = vadd.f32 %v1926_v4, %v1686_v36 }
 0x4c4   : > { %3820 = vmatmul.msk.bf16.gmra.mxu3 %vm2489_vm13, %v2469_v58  ;;  %v8248_v58 = vld [vmem:[#allocation134_spill] sm:$0xff] }
 0x4c5   : > { %vm8249_vm10 = vcmp.eq.s32.totalorder %v8248_v58, %v4681_v57 }
 0x4c7   : > { %v1895_v61 = vpop.permute.xlu1 %1894 }
 0x4c8   : > { %v1924_v15 = vsel %vm1748_vm1, %v1895_v61, 0.0  ;;  %vm8235_vm1 = vcmp.eq.s32.totalorder %v6376_v52, %v4681_v57  ;;  %v8237_v52 = vld [vmem:[#allocation174_spill] sm:$0xff] }
 0x4c9   : > { %v1940_v63 = vadd.f32 %v1924_v15, %v8231_v32  ;;  %v2436_v40 = vsel %vm8235_vm1, %v2407_v16, 0.0  ;;  %v2419_v16 = vpop.permute.xlu0 %2418 }
 0x4ca   : > { %v2411_v30 = vpop.permute.xlu2 %2410 }
 0x4cb   : > { %v2196_v35 = vadd.f32 %v2180_v59, %v1940_v63  ;;  %v2437_v18 = vsel %vm8249_vm10, %v2411_v30, 0.0 }
 0x4cd   : > { %v2452_v19 = vadd.f32 %v2436_v40, %v2196_v35 }
 0x4d0   : > { %v2403_v45 = vpop.permute.xlu1 %2402 }
 0x4d1   : > { %v2435_v20 = vsel %vm8236_vm12, %v2403_v45, 0.0 }
 0x4d2   : > { %v2451_v29 = vadd.f32 %v2435_v20, %v2195_v12 }
 0x4d3   : > { %v1911_v59 = vpop.permute.xlu2 %1910 }
 0x4d4   : > { %v2470_v11 = vpack.c.bf16 %v2452_v19, %v2451_v29  ;;  %v2439_v29 = vsel %vm2263_vm9, %v2419_v16, 0.0  ;;  %v1928_v39 = vsel %vm1752_vm8, %v1911_v59, 0.0 }
 0x4d6   : > { %3821 = vmatmul.msk.bf16.gmra.mxu3 %vm2489_vm13, %v2470_v11 }
 0x4d9   : > { %v1899_v2 = vpop.permute.xlu1 %1898 }
 0x4da   : > { %v1925_v41 = vsel %vm1749_vm15, %v1899_v2, 0.0  ;;  %vm8245_vm15 = vcmp.eq.s32.totalorder %v8244_v31, %v4681_v57 }
 0x4db   : > { %v1941_v46 = vadd.f32 %v1925_v41, %v8237_v52  ;;  %v1944_v52 = vadd.f32 %v1928_v39, %v8251_v49 }
 0x4dc   : > { %v2167_v19 = vpop.permute.xlu2 %2166 }
 0x4dd   : > { %v2197_v23 = vadd.f32 %v2181_v3, %v1941_v46  ;;  %v2184_v7 = vsel %vm2008_vm3, %v2167_v19, 0.0 }
 0x4de   : > { %v6856_v47 = vpop.f32.mrf.mxu0  ;;  %v2200_v3 = vadd.f32 %v2184_v7, %v1944_v52 }
 0x4df   : > { %v2453_v0 = vadd.f32 %v2437_v18, %v2197_v23 }
 0x4e2   : > { %v2159_v26 = vpop.permute.xlu1 %2158 }
 0x4e3   : > { %v2182_v21 = vsel %vm8245_vm15, %v2159_v26, 0.0 }
 0x4e4   : > { %v2198_v28 = vadd.f32 %v2182_v21, %v1942_v37 }
 0x4e6   : > { %v2454_v61 = vadd.f32 %v2438_v54, %v2198_v28  ;;  %v6871_v15 = vpop.f32.mrf.mxu0  ;;  %v3876_v28 = vld [vmem:[%s7422_s4] sm:$0xff] }
 0x4e7   : > { %3091 = vmatpush.bf16.msra.mxu1 %v3876_v28  ;;  %3882 = vmatpush.bf16.msrb.mxu3 %v3876_v28 }
 0x4e8   : > { %v2471_v32 = vpack.c.bf16 %v2454_v61, %v2453_v0 }
 0x4ea   : > { %3822 = vmatmul.msk.bf16.gmra.mxu3 %vm2489_vm13, %v2471_v32 }
 0x4eb   : > { %v1907_v63 = vpop.permute.xlu1 %1906 }
 0x4ec   : > { %v1927_v5 = vsel %vm1751_vm14, %v1907_v63, 0.0 }
 0x4ed   : > { %v1943_v12 = vadd.f32 %v1927_v5, %v8250_v60 }
 0x4f0   : > { %v2587_v35 = vpop.f32.mrf.mxu0 }
 0x4f1   : > { %vm2883_vm11 = vcmp.ne.f32.partialorder %v2587_v35, 0.0  ;;  %v2627_v31 = vmax.f32 %v2587_v35, 1e-30 }
 0x4f2   : > { %v3824_v2 = vsel %vm2883_vm11, 1.0, %v4202_v25 }
 0x4f3   : > { %4051 = vrcp.f32 %v2627_v31  ;;  %vm2648_vm2 = vweird.f32 %v2627_v31  ;;  %v2652_v39 = vand.u32 2147483647, %v2627_v31 }
 0x4f4   : > { %v2163_v45 = vpop.permute.xlu1 %2162 }
 0x4f5   : > { %v2183_v40 = vsel %vm2007_vm7, %v2163_v45, 0.0  ;;  %vm2653_vm11 = vcmp.eq.f32.partialorder %v2652_v39, 8.507059e+37 }
 0x4f6   : > { %v2199_v20 = vadd.f32 %v2183_v40, %v1943_v12 }
 0x4f8   : > { %v2455_v11 = vadd.f32 %v2439_v29, %v2199_v20  ;;  %v2589_v42 = vpop.f32.mrf.mxu0  ;;  %v2654_v20 = vand.u32 2147483648, %v2627_v31 }
 0x4f9   : > { %vm2884_vm14 = vcmp.ne.f32.partialorder %v2589_v42, 0.0  ;;  %v2628_v21 = vmax.f32 %v2589_v42, 1e-30  ;;  %v4052_v54 = vpop.eup %4051 }
 0x4fa   : > { %v3825_v41 = vsel %vm2884_vm14, 1.0, %v4202_v25  ;;  %v2644_v32 = vmul.f32 %v4052_v54, %v2627_v31  ;;  %vm2649_vm1 = vweird.f32 %v4052_v54  ;;  %v2655_v52 = vor.u32 1.1754944e-38, %v2654_v20 }
 0x4fb   : > { %v4011_v46 = vpack.i.bf16 %v3825_v41, %v3824_v2  ;;  %4053 = vrcp.f32 %v2628_v21  ;;  %v2669_v29 = vand.u32 2147483648, %v2628_v21  ;;  %vm6934_vm15 = vmor %vm2648_vm2, %vm2649_vm1  ;;  %vm2663_vm6 = vweird.f32 %v2628_v21 }
 0x4fc   : > { %v2645_v59 = vsub.f32 1.0, %v2644_v32 }
 0x4fd   : > { %v2423_v22 = vpop.permute.xlu1 %2422  ;;  %4012 = vrot.lane.b32.xlu2 %v4011_v46, %s4203_s18  ;;  %v2670_v46 = vor.u32 1.1754944e-38, %v2669_v29 }
 0x4fe   : > { %v2440_v50 = vsel %vm2264_vm0, %v2423_v22, 0.0  ;;  %v2646_v16 = vmul.f32 %v4052_v54, %v2645_v59 }
 0x4ff   : > { %v2456_v9 = vadd.f32 %v2440_v50, %v2200_v3 }
 0x500   : > { %v2647_v12 = vadd.f32 %v4052_v54, %v2646_v16 }
 0x501   : > { %v2472_v24 = vpack.c.bf16 %v2456_v9, %v2455_v11  ;;  %v4054_v58 = vpop.eup %4053  ;;  %v2667_v11 = vand.u32 2147483647, %v2628_v21 }
 0x502   : > { %v6897_v23 = vpop.f32.mrf.mxu0  ;;  %v2659_v63 = vmul.f32 %v4054_v58, %v2628_v21  ;;  %vm2664_vm5 = vweird.f32 %v4054_v58  ;;  %v2651_v41 = vsel %vm6934_vm15, %v4052_v54, %v2647_v12 }
 0x503   : > { %3823 = vmatmul.msk.bf16.gmra.mxu3 %vm2489_vm13, %v2472_v24  ;;  %vm2885_vm8 = vcmp.ne.f32.partialorder %v6897_v23, 0.0  ;;  %vm2665_vm10 = vmor %vm2663_vm6, %vm2664_vm5  ;;  %vm2668_vm14 = vcmp.eq.f32.partialorder %v2667_v11, 8.507059e+37  ;;  %v2656_v3 = vsel %vm2653_vm11, %v2655_v52, %v2651_v41  ;;  %v2629_v21 = vmax.f32 %v6897_v23, 1e-30 }
 0x504   : > { %v3826_v4 = vsel %vm2885_vm8, 1.0, %v4202_v25  ;;  %v2660_v35 = vsub.f32 1.0, %v2659_v63  ;;  %v6944_v9 = vmul.f32 %v2656_v3, %v6664_v48  ;;  %vm3035_vm8 = vcmask 130048  }
 0x505   : > { %4055 = vrcp.f32 %v2629_v21  ;;  %v2684_v11 = vand.u32 2147483648, %v2629_v21 }
 0x506   : > { %v2661_v60 = vmul.f32 %v4054_v58, %v2660_v35 }
 0x507   : > { %v2685_v41 = vor.u32 1.1754944e-38, %v2684_v11 }
 0x508   : > { %v2662_v45 = vadd.f32 %v4054_v58, %v2661_v60 }
 0x50a   : > { %v6901_v43 = vpop.f32.mrf.mxu0  ;;  %v2666_v49 = vsel %vm2665_vm10, %v4054_v58, %v2662_v45 }
 0x50b   : > { %vm2886_vm3 = vcmp.ne.f32.partialorder %v6901_v43, 0.0  ;;  %v2671_v22 = vsel %vm2668_vm14, %v2670_v46, %v2666_v49  ;;  %v2630_v48 = vmax.f32 %v6901_v43, 1e-30  ;;  %v4056_v23 = vpop.eup %4055 }
 0x50c   : > { %v3827_v17 = vsel %vm2886_vm3, 1.0, %v4202_v25 }
 0x50d   : > { %v4016_v36 = vpack.i.bf16 %v3827_v17, %v3826_v4  ;;  %v6947_v17 = vmul.f32 %v2671_v22, %v6684_v27  ;;  %4057 = vrcp.f32 %v2630_v48  ;;  %vm2693_vm2 = vweird.f32 %v2630_v48 }
 0x50f   : > { %4017 = vrot.lane.b32.xlu0 %v4016_v36, %s4203_s18 }
 0x51c   : > { %v6907_v57 = vpop.f32.mrf.mxu2 }
 0x51d   : > { %vm2887_vm7 = vcmp.ne.f32.partialorder %v6907_v57, 0.0  ;;  %v6972_v60 = vmax.f32 %v6907_v57, 1e-30  ;;  %v2697_v57 = vand.u32 2147483647, %v2630_v48 }
 0x51e   : > { %v3828_v37 = vsel %vm2887_vm7, 1.0, %v4202_v25 }
 0x51f   : > { %4059 = vrcp.f32 %v6972_v60  ;;  %vm2698_vm6 = vcmp.eq.f32.partialorder %v2697_v57, 8.507059e+37 }
 0x524   : > { %v6910_v13 = vpop.f32.mrf.mxu2 }
 0x525   : > { %vm2888_vm13 = vcmp.ne.f32.partialorder %v6910_v13, 0.0  ;;  %v6977_v29 = vmax.f32 %v6910_v13, 1e-30 }
 0x526   : > { %v3829_v30 = vsel %vm2888_vm13, 1.0, %v4202_v25 }
 0x527   : > { %v4021_v26 = vpack.i.bf16 %v3829_v30, %v3828_v37  ;;  %4061 = vrcp.f32 %v6977_v29 }
 0x529   : > { %4022 = vrot.lane.b32.xlu1 %v4021_v26, %s4203_s18 }
 0x535   : > { %v6916_v1 = vpop.f32.mrf.mxu3 }
 0x536   : > { %vm2889_vm9 = vcmp.ne.f32.partialorder %v6916_v1, 0.0 }
 0x537   : > { %v3830_v18 = vsel %vm2889_vm9, 1.0, %v4202_v25 }
 0x53d   : > { %v6922_v44 = vpop.f32.mrf.mxu3 }
 0x53e   : > { %vm2890_vm0 = vcmp.ne.f32.partialorder %v6922_v44, 0.0 }
 0x53f   : > { %v3831_v0 = vsel %vm2890_vm0, 1.0, %v4202_v25  ;;  %vm2679_vm0 = vweird.f32 %v4056_v23 }
 0x540   : > { %v4026_v61 = vpack.i.bf16 %v3831_v0, %v3830_v18  ;;  %v4058_v18 = vpop.eup %4057  ;;  %v2674_v0 = vmul.f32 %v4056_v23, %v2629_v21 }
 0x541   : > { %vm2694_vm1 = vweird.f32 %v4058_v18  ;;  %v4060_v3 = vpop.eup %4059 }
 0x542   : > { %4027 = vrot.lane.b32.xlu2 %v4026_v61, %s4203_s18  ;;  %v2689_v61 = vmul.f32 %v4058_v18, %v2630_v48  ;;  %v2675_v32 = vsub.f32 1.0, %v2674_v0  ;;  %vm2709_vm14 = vweird.f32 %v4060_v3 }
 0x544   : > { %v2690_v63 = vsub.f32 1.0, %v2689_v61  ;;  %v2676_v59 = vmul.f32 %v4056_v23, %v2675_v32 }
 0x546   : > { %v2691_v35 = vmul.f32 %v4058_v18, %v2690_v63  ;;  %v2677_v20 = vadd.f32 %v4056_v23, %v2676_v59 }
 0x547   : > { %v6928_v5 = vpop.f32.mrf.mxu3 }
 0x548   : > { %vm2891_vm12 = vcmp.ne.f32.partialorder %v6928_v5, 0.0  ;;  %v2692_v39 = vadd.f32 %v4058_v18, %v2691_v35 }
 0x549   : > { %v3832_v42 = vsel %vm2891_vm12, 1.0, %v4202_v25  ;;  %vm2678_vm12 = vweird.f32 %v2629_v21 }
 0x54a   : > { %vm2680_vm5 = vmor %vm2678_vm12, %vm2679_vm0 }
 0x54f   : > { %v6931_v40 = vpop.f32.mrf.mxu3 }
 0x550   : > { %vm2892_vm4 = vcmp.ne.f32.partialorder %v6931_v40, 0.0  ;;  %v2636_v11 = vmax.f32 %v6931_v40, 1e-30 }
 0x551   : > { %v3833_v7 = vsel %vm2892_vm4, 1.0, %v4202_v25  ;;  %vm2695_vm4 = vmor %vm2693_vm2, %vm2694_vm1 }
 0x552   : > { %v4031_v2 = vpack.i.bf16 %v3833_v7, %v3832_v42  ;;  %v2699_v42 = vand.u32 2147483648, %v2630_v48  ;;  %v2682_v7 = vand.u32 2147483647, %v2629_v21  ;;  %v2696_v13 = vsel %vm2695_vm4, %v4058_v18, %v2692_v39 }
 0x553   : > { %v2729_v39 = vand.u32 2147483648, %v6977_v29 }
 0x554   : > { %4032 = vrot.lane.b32.xlu0 %v4031_v2, %s4203_s18  ;;  %v2681_v2 = vsel %vm2680_vm5, %v4056_v23, %v2677_v20  ;;  %v2700_v49 = vor.u32 1.1754944e-38, %v2699_v42  ;;  %vm2683_vm15 = vcmp.eq.f32.partialorder %v2682_v7, 8.507059e+37  ;;  %v2727_v42 = vand.u32 2147483647, %v6977_v29 }
 0x555   : > { %v2686_v52 = vsel %vm2683_vm15, %v2685_v41, %v2681_v2 }
 0x556   : > { %v2701_v46 = vsel %vm2698_vm6, %v2700_v49, %v2696_v13  ;;  %v2730_v49 = vor.u32 1.1754944e-38, %v2729_v39  ;;  %vm2728_vm12 = vcmp.eq.f32.partialorder %v2727_v42, 8.507059e+37  ;;  %v2635_v39 = vmax.f32 %v6928_v5, 1e-30 }
 0x557   : > { %v4013_v50 = vpop.permute.xlu2 %4012 }
 0x558   : > { %v4015_v24 = vunpack.i.h.bf16 %v4013_v50  ;;  %v4014_v4 = vunpack.i.l.bf16 %v4013_v50  ;;  %v4062_v50 = vpop.eup %4061 }
 0x559   : > { %v6949_v36 = vpop.f32.mrf.mxu3 }
 0x55a   : > { %v2995_v37 = vmul.f32 %v4014_v4, %v6944_v9  ;;  %v2996_v30 = vmul.f32 %v4015_v24, %v6947_v17  ;;  %v6953_v26 = vpack.c.bf16 %v4015_v24, %v4014_v4  ;;  %vm2893_vm3 = vcmp.ne.f32.partialorder %v6949_v36, 0.0 }
 0x55b   : > { %v3834_v28 = vsel %vm2893_vm3, 1.0, %v4202_v25  ;;  %v6983_v24 = vmul.f32 %v2686_v52, %v6701_v14  ;;  %v6986_v4 = vmul.f32 %v2701_v46, %v6720_v55  ;;  %v7000_v55 = vmax.f32 %v6922_v44, 1e-30 }
 0x55c   : > { %v3011_v31 = vpack.c.bf16 %v2996_v30, %v2995_v37  ;;  %vm2724_vm3 = vweird.f32 %v4062_v50 }
 0x55d   : > { %vm2753_vm6 = vweird.f32 %v7000_v55 }
 0x55e   : > { %3844 = vmatmul.msk.bf16.vlgmr.msra.gmra.mxu1 %vm3035_vm8, %v3011_v31 }
 0x561   : > { %v6959_v27 = vpop.f32.mrf.mxu3 }
 0x562   : > { %vm2894_vm7 = vcmp.ne.f32.partialorder %v6959_v27, 0.0 }
 0x563   : > { %v3835_v54 = vsel %vm2894_vm7, 1.0, %v4202_v25  ;;  %vm2708_vm7 = vweird.f32 %v6972_v60 }
 0x564   : > { %v4036_v58 = vpack.i.bf16 %v3835_v54, %v3834_v28  ;;  %v2704_v28 = vmul.f32 %v4060_v3, %v6972_v60  ;;  %v2719_v54 = vmul.f32 %v4062_v50, %v6977_v29 }
 0x566   : > { %4037 = vrot.lane.b32.xlu1 %v4036_v58, %s4203_s18  ;;  %v6995_v58 = vmax.f32 %v6916_v1, 1e-30  ;;  %v2705_v18 = vsub.f32 1.0, %v2704_v28  ;;  %v2720_v0 = vsub.f32 1.0, %v2719_v54 }
 0x568   : > { %4063 = vrcp.f32 %v6995_v58  ;;  %v2706_v61 = vmul.f32 %v4060_v3, %v2705_v18  ;;  %v2721_v32 = vmul.f32 %v4062_v50, %v2720_v0  ;;  %vm2738_vm4 = vweird.f32 %v6995_v58 }
 0x569   : > { %4065 = vrcp.f32 %v7000_v55 }
 0x56a   : > { %v2722_v20 = vadd.f32 %v4062_v50, %v2721_v32  ;;  %4067 = vrcp.f32 %v2635_v39 }
 0x56b   : > { %4069 = vrcp.f32 %v2636_v11 }
 0x56d   : > { %v6965_v43 = vpop.f32.mrf.mxu3 }
 0x56e   : > { %vm2895_vm13 = vcmp.ne.f32.partialorder %v6965_v43, 0.0  ;;  %v7009_v63 = vpop.eup %4063 }
 0x56f   : > { %v3836_v12 = vsel %vm2895_vm13, 1.0, %v4202_v25  ;;  %v7013_v35 = vpop.eup %4065  ;;  %vm7019_vm13 = vmor %vm2708_vm7, %vm2709_vm14  ;;  %v2734_v7 = vmul.f32 %v7009_v63, %v6995_v58  ;;  %vm2739_vm5 = vweird.f32 %v7009_v63 }
 0x570   : > { %v2749_v57 = vmul.f32 %v7013_v35, %v7000_v55  ;;  %vm2754_vm2 = vweird.f32 %v7013_v35  ;;  %vm7052_vm15 = vmor %vm2738_vm4, %vm2739_vm5 }
 0x572   : > { %v2750_v52 = vsub.f32 1.0, %v2749_v57 }
 0x574   : > { %v2751_v28 = vmul.f32 %v7013_v35, %v2750_v52 }
 0x575   : > { %v6968_v16 = vpop.f32.mrf.mxu3 }
 0x576   : > { %vm2896_vm9 = vcmp.ne.f32.partialorder %v6968_v16, 0.0  ;;  %v2752_v32 = vadd.f32 %v7013_v35, %v2751_v28  ;;  %v2789_v28 = vand.u32 2147483648, %v2636_v11 }
 0x577   : > { %v3837_v45 = vsel %vm2896_vm9, 1.0, %v4202_v25  ;;  %vm2723_vm9 = vweird.f32 %v6977_v29 }
 0x578   : > { %v4041_v19 = vpack.i.bf16 %v3837_v45, %v3836_v12  ;;  %v2707_v45 = vadd.f32 %v4060_v3, %v2706_v61  ;;  %vm2725_vm0 = vmor %vm2723_vm9, %vm2724_vm3 }
 0x579   : > { %v2726_v13 = vsel %vm2725_vm0, %v4062_v50, %v2722_v20  ;;  %v2742_v20 = vand.u32 2147483647, %v6995_v58  ;;  %vm2783_vm0 = vweird.f32 %v2636_v11 }
 0x57a   : > { %4042 = vrot.lane.b32.xlu2 %v4041_v19, %s4203_s18  ;;  %v2714_v19 = vand.u32 2147483648, %v6972_v60  ;;  %v2711_v2 = vsel %vm7019_vm13, %v4060_v3, %v2707_v45  ;;  %vm2768_vm13 = vweird.f32 %v2635_v39 }
 0x57c   : > { %v2715_v41 = vor.u32 1.1754944e-38, %v2714_v19  ;;  %v2757_v19 = vand.u32 2147483647, %v7000_v55 }
 0x57e   : > { %vm2758_vm14 = vcmp.eq.f32.partialorder %v2757_v19, 8.507059e+37 }
 0x581   : > { %v4018_v22 = vpop.permute.xlu0 %4017 }
 0x582   : > { %v4020_v37 = vunpack.i.h.bf16 %v4018_v22  ;;  %v4019_v30 = vunpack.i.l.bf16 %v4018_v22  ;;  %v2731_v22 = vsel %vm2728_vm12, %v2730_v49, %v2726_v13  ;;  %v4068_v13 = vpop.eup %4067 }
 0x583   : > { %vm2769_vm3 = vweird.f32 %v4068_v13 }
 0x584   : > { %v2998_v31 = vmul.f32 %v4020_v37, %v6986_v4  ;;  %v2997_v21 = vmul.f32 %v4019_v30, %v6983_v24  ;;  %v6990_v48 = vpack.c.bf16 %v4020_v37, %v4019_v30  ;;  %v7036_v30 = vmul.f32 %v2731_v22, %v6750_v56  ;;  %vm2770_vm9 = vmor %vm2768_vm13, %vm2769_vm3 }
 0x585   : > { %v7079_v22 = vmax.f32 %v6959_v27, 1e-30  ;;  %v2787_v27 = vand.u32 2147483647, %v2636_v11 }
 0x586   : > { %v6997_v14 = vpop.f32.mrf.mxu3  ;;  %v3012_v23 = vpack.c.bf16 %v2998_v31, %v2997_v21 }
 0x587   : > { %vm2897_vm10 = vcmp.ne.f32.partialorder %v6997_v14, 0.0  ;;  %vm2788_vm5 = vcmp.eq.f32.partialorder %v2787_v27, 8.507059e+37 }
 0x588   : > { %3845 = vmatmul.msk.bf16.gmra.mxu1 %vm3035_vm8, %v3012_v23  ;;  %v3838_v44 = vsel %vm2897_vm10, 1.0, %v4202_v25  ;;  %vm2755_vm10 = vmor %vm2753_vm6, %vm2754_vm2 }
 0x589   : > { %v2756_v42 = vsel %vm2755_vm10, %v7013_v35, %v2752_v32  ;;  %v4070_v35 = vpop.eup %4069  ;;  %v2790_v32 = vor.u32 1.1754944e-38, %v2789_v28  ;;  %vm2813_vm10 = vweird.f32 %v7079_v22 }
 0x58a   : > { %vm2784_vm7 = vweird.f32 %v4070_v35 }
 0x58e   : > { %v7006_v1 = vpop.f32.mrf.mxu3 }
 0x58f   : > { %vm2898_vm11 = vcmp.ne.f32.partialorder %v7006_v1, 0.0 }
 0x590   : > { %v3839_v59 = vsel %vm2898_vm11, 1.0, %v4202_v25  ;;  %v2712_v25 = vand.u32 2147483647, %v6972_v60  ;;  %v2735_v60 = vsub.f32 1.0, %v2734_v7  ;;  %vm2743_vm11 = vcmp.eq.f32.partialorder %v2742_v20, 8.507059e+37 }
 0x591   : > { %v4046_v12 = vpack.i.bf16 %v3839_v59, %v3838_v44  ;;  %v2744_v59 = vand.u32 2147483648, %v6995_v58 }
 0x592   : > { %vm2713_vm1 = vcmp.eq.f32.partialorder %v2712_v25, 8.507059e+37  ;;  %v2736_v3 = vmul.f32 %v7009_v63, %v2735_v60  ;;  %v2779_v60 = vmul.f32 %v4070_v35, %v2636_v11 }
 0x593   : > { %4047 = vrot.lane.b32.xlu0 %v4046_v12, %s4203_s18  ;;  %v2716_v46 = vsel %vm2713_vm1, %v2715_v41, %v2711_v2  ;;  %v2759_v12 = vand.u32 2147483648, %v7000_v55  ;;  %v2745_v7 = vor.u32 1.1754944e-38, %v2744_v59  ;;  %v2764_v41 = vmul.f32 %v4068_v13, %v2635_v39  ;;  %vm2785_vm1 = vmor %vm2783_vm0, %vm2784_vm7 }
 0x594   : > { %v7033_v29 = vmul.f32 %v2716_v46, %v6734_v6  ;;  %v2737_v56 = vadd.f32 %v7009_v63, %v2736_v3  ;;  %v7076_v46 = vmax.f32 %v6949_v36, 1e-30  ;;  %v2772_v36 = vand.u32 2147483647, %v2635_v39 }
 0x595   : > { %v2760_v57 = vor.u32 1.1754944e-38, %v2759_v12  ;;  %v2765_v52 = vsub.f32 1.0, %v2764_v41  ;;  %v7092_v12 = vmax.f32 %v6968_v16, 1e-30  ;;  %v2819_v41 = vand.u32 2147483648, %v7079_v22 }
 0x596   : > { %v2741_v25 = vsel %vm7052_vm15, %v7009_v63, %v2737_v56  ;;  %4071 = vrcp.f32 %v7076_v46  ;;  %vm2773_vm12 = vcmp.eq.f32.partialorder %v2772_v36, 8.507059e+37  ;;  %vm2798_vm15 = vweird.f32 %v7076_v46 }
 0x597   : > { %v2746_v58 = vsel %vm2743_vm11, %v2745_v7, %v2741_v25  ;;  %v2761_v55 = vsel %vm2758_vm14, %v2760_v57, %v2756_v42  ;;  %4073 = vrcp.f32 %v7079_v22 }
 0x598   : > { %v7067_v2 = vmul.f32 %v2746_v58, %v6766_v34  ;;  %v7070_v5 = vmul.f32 %v2761_v55, %v6769_v51  ;;  %v2780_v34 = vsub.f32 1.0, %v2779_v60  ;;  %v2766_v51 = vmul.f32 %v4068_v13, %v2765_v52 }
 0x599   : > { %v2802_v60 = vand.u32 2147483647, %v7076_v46  ;;  %v2817_v52 = vand.u32 2147483647, %v7079_v22 }
 0x59b   : > { %v4023_v37 = vpop.permute.xlu1 %4022  ;;  %vm2803_vm14 = vcmp.eq.f32.partialorder %v2802_v60, 8.507059e+37  ;;  %vm2818_vm3 = vcmp.eq.f32.partialorder %v2817_v52, 8.507059e+37 }
 0x59c   : > { %v4025_v31 = vunpack.i.h.bf16 %v4023_v37  ;;  %v4024_v21 = vunpack.i.l.bf16 %v4023_v37  ;;  %v4028_v50 = vpop.permute.xlu2 %4027  ;;  %v2781_v37 = vmul.f32 %v4070_v35, %v2780_v34 }
 0x59d   : > { %v4030_v54 = vunpack.i.h.bf16 %v4028_v50  ;;  %v4029_v23 = vunpack.i.l.bf16 %v4028_v50  ;;  %v7083_v50 = vpop.eup %4071 }
 0x59e   : > { %v2999_v18 = vmul.f32 %v4024_v21, %v7033_v29  ;;  %v3000_v0 = vmul.f32 %v4025_v31, %v7036_v30  ;;  %v7042_v61 = vpack.c.bf16 %v4025_v31, %v4024_v21  ;;  %v2767_v31 = vadd.f32 %v4068_v13, %v2766_v51 }
 0x59f   : > { %v3022_v6 = vpack.c.bf16 %v4030_v54, %v4029_v23  ;;  %v3001_v40 = vmul.f32 %v4029_v23, %v7067_v2  ;;  %v3002_v63 = vmul.f32 %v4030_v54, %v7070_v5  ;;  %v2774_v21 = vand.u32 2147483648, %v2635_v39  ;;  %v4074_v54 = vpop.eup %4073 }
 0x5a0   : > { %v3013_v44 = vpack.c.bf16 %v3000_v0, %v2999_v18  ;;  %v2782_v3 = vadd.f32 %v4070_v35, %v2781_v37  ;;  %v2771_v23 = vsel %vm2770_vm9, %v4068_v13, %v2767_v31  ;;  %v2809_v56 = vmul.f32 %v4074_v54, %v7079_v22 }
 0x5a1   : > { %3855 = vmatmul.msk.bf16.vlgmr.msrb.gmra.mxu3 %vm3035_vm8, %v3022_v6  ;;  %v3014_v49 = vpack.c.bf16 %v3002_v63, %v3001_v40  ;;  %v2775_v18 = vor.u32 1.1754944e-38, %v2774_v21  ;;  %v2794_v6 = vmul.f32 %v7083_v50, %v7076_v46  ;;  %vm2799_vm2 = vweird.f32 %v7083_v50 }
 0x5a2   : > { %3846 = vmatmul.msk.bf16.gmra.mxu1 %vm3035_vm8, %v3013_v44  ;;  %v2786_v0 = vsel %vm2785_vm1, %v4070_v35, %v2782_v3  ;;  %v7089_v44 = vmax.f32 %v6965_v43, 1e-30  ;;  %v2810_v19 = vsub.f32 1.0, %v2809_v56  ;;  %vm2814_vm4 = vweird.f32 %v4074_v54  ;;  %vm7114_vm6 = vmor %vm2798_vm15, %vm2799_vm2 }
 0x5a3   : > { %v2776_v59 = vsel %vm2773_vm12, %v2775_v18, %v2771_v23  ;;  %v2791_v45 = vsel %vm2788_vm5, %v2790_v32, %v2786_v0  ;;  %v2795_v20 = vsub.f32 1.0, %v2794_v6  ;;  %v2804_v35 = vand.u32 2147483648, %v7076_v46  ;;  %vm2815_vm11 = vmor %vm2813_vm10, %vm2814_vm4 }
 0x5a4   : > { %v7095_v39 = vmul.f32 %v2776_v59, %v6790_v38  ;;  %4075 = vrcp.f32 %v7089_v44  ;;  %v7099_v25 = vmul.f32 %v2791_v45, %v6798_v8  ;;  %v2811_v55 = vmul.f32 %v4074_v54, %v2810_v19 }
 0x5a5   : > { %4077 = vrcp.f32 %v7092_v12  ;;  %v2796_v58 = vmul.f32 %v7083_v50, %v2795_v20  ;;  %v2805_v21 = vor.u32 1.1754944e-38, %v2804_v35  ;;  %v2820_v3 = vor.u32 1.1754944e-38, %v2819_v41 }
 0x5a6   : > { %v2812_v13 = vadd.f32 %v4074_v54, %v2811_v55  ;;  %vm2828_vm9 = vweird.f32 %v7089_v44  ;;  %v2834_v20 = vand.u32 2147483648, %v7089_v44  ;;  %v2849_v19 = vand.u32 2147483648, %v7092_v12 }
 0x5a7   : > { %v2797_v63 = vadd.f32 %v7083_v50, %v2796_v58  ;;  %vm2843_vm1 = vweird.f32 %v7092_v12 }
 0x5a8   : > { %v2816_v31 = vsel %vm2815_vm11, %v4074_v54, %v2812_v13  ;;  %v2835_v58 = vor.u32 1.1754944e-38, %v2834_v20 }
 0x5a9   : > { %v2801_v37 = vsel %vm7114_vm6, %v7083_v50, %v2797_v63  ;;  %v2821_v27 = vsel %vm2818_vm3, %v2820_v3, %v2816_v31  ;;  %v2642_v63 = vmax.f32 %v7006_v1, 1e-30 }
 0x5aa   : > { %v7106_v40 = vpop.eup %4075  ;;  %v2806_v28 = vsel %vm2803_vm14, %v2805_v21, %v2801_v37  ;;  %v7131_v18 = vmul.f32 %v2821_v27, %v6820_v10 }
 0x5ab   : > { %v4078_v8 = vpop.eup %4077  ;;  %v2824_v34 = vmul.f32 %v7106_v40, %v7089_v44  ;;  %v7128_v22 = vmul.f32 %v2806_v28, %v6804_v53  ;;  %vm2829_vm7 = vweird.f32 %v7106_v40  ;;  %v2879_v28 = vand.u32 2147483648, %v2642_v63 }
 0x5ac   : > { %v2839_v51 = vmul.f32 %v4078_v8, %v7092_v12  ;;  %vm2844_vm13 = vweird.f32 %v4078_v8  ;;  %vm7142_vm0 = vmor %vm2828_vm9, %vm2829_vm7  ;;  %vm2873_vm11 = vweird.f32 %v2642_v63 }
 0x5ad   : > { %v2825_v46 = vsub.f32 1.0, %v2824_v34  ;;  %vm2845_vm12 = vmor %vm2843_vm1, %vm2844_vm13 }
 0x5ae   : > { %v2840_v36 = vsub.f32 1.0, %v2839_v51 }
 0x5af   : > { %v2826_v0 = vmul.f32 %v7106_v40, %v2825_v46 }
 0x5b0   : > { %v2841_v6 = vmul.f32 %v4078_v8, %v2840_v36 }
 0x5b1   : > { %v2827_v45 = vadd.f32 %v7106_v40, %v2826_v0 }
 0x5b2   : > { %3847 = vmatmul.msk.bf16.gmra.mxu1 %vm3035_vm8, %v3014_v49  ;;  %v2842_v53 = vadd.f32 %v4078_v8, %v2841_v6 }
 0x5c6   : > { %v4033_v11 = vpop.permute.xlu0 %4032 }
 0x5c7   : > { %v4035_v42 = vunpack.i.h.bf16 %v4033_v11  ;;  %v4034_v43 = vunpack.i.l.bf16 %v4033_v11 }
 0x5c9   : > { %v3004_v7 = vmul.f32 %v4035_v42, %v7099_v25  ;;  %v3003_v16 = vmul.f32 %v4034_v43, %v7095_v39  ;;  %v3023_v57 = vpack.c.bf16 %v4035_v42, %v4034_v43  ;;  %v2832_v42 = vand.u32 2147483647, %v7089_v44 }
 0x5ca   : > { %v2847_v43 = vand.u32 2147483647, %v7092_v12 }
 0x5cb   : > { %3856 = vmatmul.msk.bf16.gmra.mxu3 %vm3035_vm8, %v3023_v57  ;;  %v3015_v38 = vpack.c.bf16 %v3004_v7, %v3003_v16  ;;  %v2831_v7 = vsel %vm7142_vm0, %v7106_v40, %v2827_v45  ;;  %v2846_v16 = vsel %vm2845_vm12, %v4078_v8, %v2842_v53  ;;  %v2641_v57 = vmax.f32 %v6997_v14, 1e-30 }
 0x5cc   : > { %vm2833_vm5 = vcmp.eq.f32.partialorder %v2832_v42, 8.507059e+37  ;;  %vm2848_vm2 = vcmp.eq.f32.partialorder %v2847_v43, 8.507059e+37 }
 0x5cd   : > { %3848 = vmatmul.msk.bf16.gmra.mxu1 %vm3035_vm8, %v3015_v38  ;;  %v2850_v38 = vor.u32 1.1754944e-38, %v2849_v19  ;;  %v2836_v44 = vsel %vm2833_vm5, %v2835_v58, %v2831_v7  ;;  %4079 = vrcp.f32 %v2641_v57  ;;  %vm2858_vm6 = vweird.f32 %v2641_v57 }
 0x5ce   : > { %4081 = vrcp.f32 %v2642_v63  ;;  %v7156_v41 = vmul.f32 %v2836_v44, %v6830_v62  ;;  %v2864_v36 = vand.u32 2147483648, %v2641_v57  ;;  %v2862_v27 = vand.u32 2147483647, %v2641_v57 }
 0x5cf   : > { %v2851_v13 = vsel %vm2848_vm2, %v2850_v38, %v2846_v16 }
 0x5d0   : > { %v7159_v40 = vmul.f32 %v2851_v13, %v6842_v33  ;;  %vm2863_vm3 = vcmp.eq.f32.partialorder %v2862_v27, 8.507059e+37 }
 0x5d3   : > { %v4080_v1 = vpop.eup %4079 }
 0x5d4   : > { %v4043_v55 = vpop.permute.xlu2 %4042  ;;  %v4082_v60 = vpop.eup %4081  ;;  %v2854_v34 = vmul.f32 %v4080_v1, %v2641_v57  ;;  %vm2859_vm4 = vweird.f32 %v4080_v1 }
 0x5d5   : > { %v4045_v12 = vunpack.i.h.bf16 %v4043_v55  ;;  %v4044_v35 = vunpack.i.l.bf16 %v4043_v55  ;;  %v2869_v51 = vmul.f32 %v4082_v60, %v2642_v63  ;;  %vm2874_vm15 = vweird.f32 %v4082_v60  ;;  %vm2860_vm10 = vmor %vm2858_vm6, %vm2859_vm4 }
 0x5d6   : > { %v2855_v37 = vsub.f32 1.0, %v2854_v34  ;;  %vm2875_vm14 = vmor %vm2873_vm11, %vm2874_vm15 }
 0x5d7   : > { %v3007_v14 = vmul.f32 %v4044_v35, %v7156_v41  ;;  %v3008_v8 = vmul.f32 %v4045_v12, %v7159_v40  ;;  %v3025_v49 = vpack.c.bf16 %v4045_v12, %v4044_v35  ;;  %v2870_v62 = vsub.f32 1.0, %v2869_v51 }
 0x5d8   : > { %v4038_v23 = vpop.permute.xlu1 %4037  ;;  %v2856_v31 = vmul.f32 %v4080_v1, %v2855_v37 }
 0x5d9   : > { %v4040_v50 = vunpack.i.h.bf16 %v4038_v23  ;;  %v4039_v54 = vunpack.i.l.bf16 %v4038_v23  ;;  %v3017_v52 = vpack.c.bf16 %v3008_v8, %v3007_v14  ;;  %v2871_v21 = vmul.f32 %v4082_v60, %v2870_v62 }
 0x5da   : > { %v2857_v33 = vadd.f32 %v4080_v1, %v2856_v31  ;;  %v2877_v23 = vand.u32 2147483647, %v2642_v63 }
 0x5db   : > { %v3005_v56 = vmul.f32 %v4039_v54, %v7128_v22  ;;  %v3006_v32 = vmul.f32 %v4040_v50, %v7131_v18  ;;  %v3024_v59 = vpack.c.bf16 %v4040_v50, %v4039_v54  ;;  %v2872_v3 = vadd.f32 %v4082_v60, %v2871_v21  ;;  %v7165_v46 = vpop.f32.mrf.mxu1 }
 0x5dc   : > { %v2861_v0 = vsel %vm2860_vm10, %v4080_v1, %v2857_v33  ;;  %v2865_v50 = vor.u32 1.1754944e-38, %v2864_v36  ;;  %v2880_v54 = vor.u32 1.1754944e-38, %v2879_v28  ;;  %vm2878_vm7 = vcmp.eq.f32.partialorder %v2877_v23, 8.507059e+37 }
 0x5dd   : > { %3857 = vmatmul.msk.bf16.gmra.mxu3 %vm3035_vm8, %v3024_v59  ;;  %v3016_v10 = vpack.c.bf16 %v3006_v32, %v3005_v56  ;;  %v2876_v6 = vsel %vm2875_vm14, %v4082_v60, %v2872_v3 }
 0x5de   : > { %v2866_v56 = vsel %vm2863_vm3, %v2865_v50, %v2861_v0  ;;  %v2881_v32 = vsel %vm2878_vm7, %v2880_v54, %v2876_v6 }
 0x5df   : > { %3849 = vmatmul.msk.bf16.gmra.mxu1 %vm3035_vm8, %v3016_v10  ;;  %v7168_v45 = vmul.f32 %v2866_v56, %v6856_v47  ;;  %v7171_v53 = vmul.f32 %v2881_v32, %v6871_v15 }
 0x5e3   : > { %v7173_v19 = vpop.f32.mrf.mxu1 }
 0x5ed   : > { %3858 = vmatmul.msk.bf16.gmra.mxu3 %vm3035_vm8, %v3025_v49 }
 0x5ef   : > { %3850 = vmatmul.msk.bf16.gmra.mxu1 %vm3035_vm8, %v3017_v52 }
 0x605   : > { %v4048_v59 = vpop.permute.xlu0 %4047  ;;  %v7179_v16 = vpop.f32.mrf.mxu1 }
 0x606   : > { %v4050_v10 = vunpack.i.h.bf16 %v4048_v59  ;;  %v4049_v20 = vunpack.i.l.bf16 %v4048_v59 }
 0x608   : > { %v3010_v11 = vmul.f32 %v4050_v10, %v7171_v53  ;;  %v3009_v42 = vmul.f32 %v4049_v20, %v7168_v45  ;;  %v3026_v43 = vpack.c.bf16 %v4050_v10, %v4049_v20 }
 0x60a   : > { %3859 = vmatmul.msk.bf16.gmra.mxu3 %vm3035_vm8, %v3026_v43  ;;  %v3018_v7 = vpack.c.bf16 %v3010_v11, %v3009_v42 }
 0x60c   : > { %3851 = vmatmul.msk.bf16.gmra.mxu1 %vm3035_vm8, %v3018_v7 }
 0x60d   : > { %v7181_v47 = vpop.f32.mrf.mxu1 }
 0x61c   : > { %3852 = vmatmul.msk.bf16.gmra.mxu1 %vm3035_vm8, %v6953_v26 }
 0x61f   : > { %v7185_v15 = vpop.f32.mrf.mxu1 }
 0x624   : > { %v3148_v57 = vpop.f32.mrf.mxu3 }
 0x625   : > { %v3179_v58 = vmax.f32 %v3148_v57, 1e-30 }
 0x627   : > { %4083 = vrcp.f32 %v3179_v58  ;;  %v7187_v55 = vpop.f32.mrf.mxu1  ;;  %v3290_v35 = vand.u32 2147483648, %v3179_v58  ;;  %v3288_v26 = vand.u32 2147483647, %v3179_v58  ;;  %vm3284_vm9 = vweird.f32 %v3179_v58 }
 0x629   : > { %v3291_v60 = vor.u32 1.1754944e-38, %v3290_v35  ;;  %vm3289_vm1 = vcmp.eq.f32.partialorder %v3288_v26, 8.507059e+37 }
 0x62c   : > { %3853 = vmatmul.msk.bf16.gmra.mxu1 %vm3035_vm8, %v6990_v48  ;;  %v3150_v38 = vpop.f32.mrf.mxu3 }
 0x62d   : > { %v4084_v63 = vpop.eup %4083  ;;  %v3180_v44 = vmax.f32 %v3150_v38, 1e-30 }
 0x62e   : > { %v3280_v13 = vmul.f32 %v4084_v63, %v3179_v58  ;;  %vm3285_vm13 = vweird.f32 %v4084_v63 }
 0x62f   : > { %4085 = vrcp.f32 %v3180_v44  ;;  %v3108_v1 = vpop.f32.mrf.mxu1  ;;  %vm3286_vm0 = vmor %vm3284_vm9, %vm3285_vm13  ;;  %v3305_v62 = vand.u32 2147483648, %v3180_v44  ;;  %v3303_v21 = vand.u32 2147483647, %v3180_v44  ;;  %vm3299_vm5 = vweird.f32 %v3180_v44 }
 0x630   : > { %v3281_v12 = vsub.f32 1.0, %v3280_v13 }
 0x631   : > { %v3306_v3 = vor.u32 1.1754944e-38, %v3305_v62  ;;  %vm3304_vm4 = vcmp.eq.f32.partialorder %v3303_v21, 8.507059e+37 }
 0x632   : > { %v3282_v14 = vmul.f32 %v4084_v63, %v3281_v12 }
 0x634   : > { %v3283_v8 = vadd.f32 %v4084_v63, %v3282_v14 }
 0x635   : > { %v4086_v49 = vpop.eup %4085 }
 0x636   : > { %v3287_v52 = vsel %vm3286_vm0, %v4084_v63, %v3283_v8  ;;  %v3295_v48 = vmul.f32 %v4086_v49, %v3180_v44  ;;  %vm3300_vm12 = vweird.f32 %v4086_v49 }
 0x637   : > { %v3292_v34 = vsel %vm3289_vm1, %v3291_v60, %v3287_v52  ;;  %vm3301_vm2 = vmor %vm3299_vm5, %vm3300_vm12  ;;  %v3110_v28 = vpop.f32.mrf.mxu1 }
 0x638   : > { %v3293_v51 = vmul.f32 %v3292_v34, %v3108_v1  ;;  %v3296_v37 = vsub.f32 1.0, %v3295_v48 }
 0x63a   : > { %3616 = vst.msk [vmem:[%s7195_s23 + $0x30] sm:$0xff] %vm3035_vm8, %v3293_v51  ;;  %v3297_v31 = vmul.f32 %v4086_v49, %v3296_v37  ;;  %v7205_v0 = vsel %vm3035_vm8, %v3293_v51, %v7067_v2 }
 0x63c   : > { %v3298_v33 = vadd.f32 %v4086_v49, %v3297_v31  ;;  %3854 = vmatmul.msk.bf16.gmra.mxu1 %vm3035_vm8, %v7042_v61 }
 0x63e   : > { %v3302_v36 = vsel %vm3301_vm2, %v4086_v49, %v3298_v33 }
 0x63f   : > { %v3307_v27 = vsel %vm3304_vm4, %v3306_v3, %v3302_v36 }
 0x640   : > { %v3308_v23 = vmul.f32 %v3307_v27, %v3110_v28 }
 0x642   : > { %3617 = vst.msk [vmem:[%s7195_s23 + $0x38] sm:$0xff] %vm3035_vm8, %v3308_v23  ;;  %v7209_v6 = vsel %vm3035_vm8, %v3308_v23, %v7070_v5 }
 0x643   : > { %v3448_v61 = vpack.c.bf16 %v7209_v6, %v7205_v0 }
 0x64a   : > { %v3113_v56 = vpop.f32.mrf.mxu1 }
 0x64e   : > { %v3153_v50 = vpop.f32.mrf.mxu3 }
 0x64f   : > { %v3181_v54 = vmax.f32 %v3153_v50, 1e-30 }
 0x651   : > { %4087 = vrcp.f32 %v3181_v54  ;;  %v3320_v42 = vand.u32 2147483648, %v3181_v54  ;;  %v3318_v7 = vand.u32 2147483647, %v3181_v54  ;;  %vm3314_vm6 = vweird.f32 %v3181_v54 }
 0x652   : > { %v3115_v2 = vpop.f32.mrf.mxu1 }
 0x653   : > { %v3321_v58 = vor.u32 1.1754944e-38, %v3320_v42  ;;  %vm3319_vm11 = vcmp.eq.f32.partialorder %v3318_v7, 8.507059e+37 }
 0x656   : > { %v3155_v32 = vpop.f32.mrf.mxu3 }
 0x657   : > { %v4088_v59 = vpop.eup %4087  ;;  %v3182_v10 = vmax.f32 %v3155_v32, 1e-30 }
 0x658   : > { %v3310_v20 = vmul.f32 %v4088_v59, %v3181_v54  ;;  %vm3315_vm15 = vweird.f32 %v4088_v59 }
 0x659   : > { %4089 = vrcp.f32 %v3182_v10  ;;  %vm3316_vm10 = vmor %vm3314_vm6, %vm3315_vm15  ;;  %v3335_v26 = vand.u32 2147483648, %v3182_v10  ;;  %v3333_v1 = vand.u32 2147483647, %v3182_v10  ;;  %vm3329_vm3 = vweird.f32 %v3182_v10 }
 0x65a   : > { %v3311_v11 = vsub.f32 1.0, %v3310_v20 }
 0x65b   : > { %v3336_v52 = vor.u32 1.1754944e-38, %v3335_v26  ;;  %vm3334_vm13 = vcmp.eq.f32.partialorder %v3333_v1, 8.507059e+37 }
 0x65c   : > { %v3312_v43 = vmul.f32 %v4088_v59, %v3311_v11  ;;  %v3118_v8 = vpop.f32.mrf.mxu1 }
 0x65e   : > { %v3313_v5 = vadd.f32 %v4088_v59, %v3312_v43 }
 0x65f   : > { %v4090_v57 = vpop.eup %4089 }
 0x660   : > { %v3325_v38 = vmul.f32 %v4090_v57, %v3182_v10  ;;  %v3158_v63 = vpop.f32.mrf.mxu3  ;;  %v3317_v44 = vsel %vm3316_vm10, %v4088_v59, %v3313_v5  ;;  %vm3330_vm14 = vweird.f32 %v4090_v57 }
 0x661   : > { %v3183_v13 = vmax.f32 %v3158_v63, 1e-30  ;;  %v3322_v12 = vsel %vm3319_vm11, %v3321_v58, %v3317_v44  ;;  %vm3331_vm7 = vmor %vm3329_vm3, %vm3330_vm14 }
 0x662   : > { %v3326_v35 = vsub.f32 1.0, %v3325_v38  ;;  %v3323_v14 = vmul.f32 %v3322_v12, %v3113_v56 }
 0x663   : > { %4091 = vrcp.f32 %v3183_v13  ;;  %v3350_v50 = vand.u32 2147483648, %v3183_v13  ;;  %v3348_v54 = vand.u32 2147483647, %v3183_v13  ;;  %vm3344_vm0 = vweird.f32 %v3183_v13 }
 0x664   : > { %v3327_v49 = vmul.f32 %v4090_v57, %v3326_v35  ;;  %3618 = vst.msk [vmem:[%s7195_s23 + $0x40] sm:$0xff] %vm3035_vm8, %v3323_v14  ;;  %v7217_v3 = vsel %vm3035_vm8, %v3323_v14, %v7095_v39  ;;  %v3120_v28 = vpop.f32.mrf.mxu1 }
 0x665   : > { %v3351_v10 = vor.u32 1.1754944e-38, %v3350_v50  ;;  %vm3349_vm12 = vcmp.eq.f32.partialorder %v3348_v54, 8.507059e+37 }
 0x666   : > { %v3328_v60 = vadd.f32 %v4090_v57, %v3327_v49 }
 0x668   : > { %v3160_v48 = vpop.f32.mrf.mxu3  ;;  %v3332_v34 = vsel %vm3331_vm7, %v4090_v57, %v3328_v60 }
 0x669   : > { %v4092_v51 = vpop.eup %4091  ;;  %v3184_v37 = vmax.f32 %v3160_v48, 1e-30  ;;  %v3337_v62 = vsel %vm3334_vm13, %v3336_v52, %v3332_v34 }
 0x66a   : > { %v3340_v31 = vmul.f32 %v4092_v51, %v3183_v13  ;;  %v3338_v21 = vmul.f32 %v3337_v62, %v3115_v2  ;;  %vm3345_vm9 = vweird.f32 %v4092_v51 }
 0x66b   : > { %4093 = vrcp.f32 %v3184_v37  ;;  %vm3346_vm1 = vmor %vm3344_vm0, %vm3345_vm9  ;;  %v3365_v7 = vand.u32 2147483648, %v3184_v37  ;;  %v3363_v5 = vand.u32 2147483647, %v3184_v37  ;;  %vm3359_vm2 = vweird.f32 %v3184_v37 }
 0x66c   : > { %v3341_v33 = vsub.f32 1.0, %v3340_v31  ;;  %v7221_v36 = vsel %vm3035_vm8, %v3338_v21, %v7099_v25  ;;  %3619 = vst.msk [vmem:[%s7195_s23 + $0x48] sm:$0xff] %vm3035_vm8, %v3338_v21  ;;  %v3123_v57 = vpop.f32.mrf.mxu1  ;;  %vm3490_vm0 = vcmask 1043456  }
 0x66d   : > { %v3449_v27 = vpack.c.bf16 %v7221_v36, %v7217_v3  ;;  %v3366_v13 = vor.u32 1.1754944e-38, %v3365_v7  ;;  %vm3364_vm15 = vcmp.eq.f32.partialorder %v3363_v5, 8.507059e+37 }
 0x66e   : > { %v3342_v23 = vmul.f32 %v4092_v51, %v3341_v33 }
 0x670   : > { %v3163_v56 = vpop.f32.mrf.mxu3  ;;  %v3343_v32 = vadd.f32 %v4092_v51, %v3342_v23 }
 0x671   : > { %v4094_v59 = vpop.eup %4093  ;;  %v3185_v39 = vmax.f32 %v3163_v56, 1e-30 }
 0x672   : > { %v3355_v25 = vmul.f32 %v4094_v59, %v3184_v37  ;;  %v3347_v20 = vsel %vm3346_vm1, %v4092_v51, %v3343_v32  ;;  %vm3360_vm5 = vweird.f32 %v4094_v59 }
 0x673   : > { %4095 = vrcp.f32 %v3185_v39  ;;  %v3352_v42 = vsel %vm3349_vm12, %v3351_v10, %v3347_v20  ;;  %vm3361_vm4 = vmor %vm3359_vm2, %vm3360_vm5  ;;  %v3378_v60 = vand.u32 2147483647, %v3185_v39  ;;  %vm3374_vm10 = vweird.f32 %v3185_v39 }
 0x674   : > { %v3356_v11 = vsub.f32 1.0, %v3355_v25  ;;  %v3353_v2 = vmul.f32 %v3352_v42, %v3118_v8  ;;  %v3380_v8 = vand.u32 2147483648, %v3185_v39  ;;  %v3125_v31 = vpop.f32.mrf.mxu1  ;;  %v3455_v42 = vld [vmem:[%s7423_s5 + $0x8] sm:$0xf] }
 0x675   : > { %vm3379_vm14 = vcmp.eq.f32.partialorder %v3378_v60, 8.507059e+37  ;;  %v3461_v7 = vunpack.c.l.b16 %v3455_v42 }
 0x676   : > { %v3357_v43 = vmul.f32 %v4094_v59, %v3356_v11  ;;  %3620 = vst.msk [vmem:[%s7195_s23 + $0x50] sm:$0xff] %vm3035_vm8, %v3353_v2  ;;  %v7231_v52 = vsel %vm3035_vm8, %v3353_v2, %v7128_v22  ;;  %v3381_v62 = vor.u32 1.1754944e-38, %v3380_v8 }
 0x678   : > { %v3165_v58 = vpop.f32.mrf.mxu3  ;;  %v3358_v38 = vadd.f32 %v4094_v59, %v3357_v43 }
 0x679   : > { %v4096_v63 = vpop.eup %4095  ;;  %v3186_v44 = vmax.f32 %v3165_v58, 1e-30  ;;  %v3463_v58 = vpack.c.b16 %v3461_v7, %v3461_v7 }
 0x67a   : > { %v3370_v12 = vmul.f32 %v4096_v63, %v3185_v39  ;;  %v3362_v35 = vsel %vm3361_vm4, %v4094_v59, %v3358_v38  ;;  %vm3375_vm6 = vweird.f32 %v4096_v63 }
 0x67b   : > { %4097 = vrcp.f32 %v3186_v44  ;;  %v3367_v26 = vsel %vm3364_vm15, %v3366_v13, %v3362_v35  ;;  %vm3376_vm11 = vmor %vm3374_vm10, %vm3375_vm6  ;;  %v3393_v54 = vand.u32 2147483647, %v3186_v44  ;;  %vm3389_vm7 = vweird.f32 %v3186_v44 }
 0x67c   : > { %v3371_v14 = vsub.f32 1.0, %v3370_v12  ;;  %v3368_v49 = vmul.f32 %v3367_v26, %v3120_v28  ;;  %v3492_v38 = vsel %vm3490_vm0, %v3463_v58, 0 }
 0x67d   : > { %vm3394_vm9 = vcmp.eq.f32.partialorder %v3393_v54, 8.507059e+37  ;;  %3500 = vmatpush.bf16.msrb.mxu2 %v3492_v38 }
 0x67e   : > { %v3372_v1 = vmul.f32 %v4096_v63, %v3371_v14  ;;  %v7235_v48 = vsel %vm3035_vm8, %v3368_v49, %v7131_v18  ;;  %3621 = vst.msk [vmem:[%s7195_s23 + $0x58] sm:$0xff] %vm3035_vm8, %v3368_v49  ;;  %v3395_v18 = vand.u32 2147483648, %v3186_v44 }
 0x67f   : > { %v3450_v34 = vpack.c.bf16 %v7235_v48, %v7231_v52 }
 0x680   : > { %v3373_v51 = vadd.f32 %v4096_v63, %v3372_v1  ;;  %v3396_v32 = vor.u32 1.1754944e-38, %v3395_v18 }
 0x681   : > { %v4098_v37 = vpop.eup %4097 }
 0x682   : > { %v3385_v21 = vmul.f32 %v4098_v37, %v3186_v44  ;;  %v3377_v33 = vsel %vm3376_vm11, %v4096_v63, %v3373_v51  ;;  %vm3390_vm3 = vweird.f32 %v4098_v37 }
 0x683   : > { %v3382_v22 = vsel %vm3379_vm14, %v3381_v62, %v3377_v33  ;;  %vm3391_vm13 = vmor %vm3389_vm7, %vm3390_vm3 }
 0x684   : > { %v3386_v28 = vsub.f32 1.0, %v3385_v21  ;;  %v3383_v23 = vmul.f32 %v3382_v22, %v3123_v57 }
 0x686   : > { %v3387_v50 = vmul.f32 %v4098_v37, %v3386_v28  ;;  %3622 = vst.msk [vmem:[%s7195_s23 + $0x60] sm:$0xff] %vm3035_vm8, %v3383_v23  ;;  %v7248_v2 = vsel %vm3035_vm8, %v3383_v23, %v7156_v41 }
 0x688   : > { %v3388_v56 = vadd.f32 %v4098_v37, %v3387_v50 }
 0x689   : > { %v3128_v59 = vpop.f32.mrf.mxu1 }
 0x68a   : > { %v3392_v39 = vsel %vm3391_vm13, %v4098_v37, %v3388_v56 }
 0x68b   : > { %v3397_v10 = vsel %vm3394_vm9, %v3396_v32, %v3392_v39 }
 0x68c   : > { %v3398_v25 = vmul.f32 %v3397_v10, %v3125_v31 }
 0x68d   : > { %v3168_v20 = vpop.f32.mrf.mxu3 }
 0x68e   : > { %v3187_v11 = vmax.f32 %v3168_v20, 1e-30  ;;  %v7252_v43 = vsel %vm3035_vm8, %v3398_v25, %v7159_v40  ;;  %3623 = vst.msk [vmem:[%s7195_s23 + $0x68] sm:$0xff] %vm3035_vm8, %v3398_v25  ;;  %v3877_v40 = vld [vmem:[%s7423_s5] sm:$0xff] }
 0x68f   : > { %v3451_v5 = vpack.c.bf16 %v7252_v43, %v7248_v2  ;;  %3501 = vmatpush.bf16.msrb.mxu2 %v3877_v40 }
 0x690   : > { %4099 = vrcp.f32 %v3187_v11  ;;  %v3410_v14 = vand.u32 2147483648, %v3187_v11  ;;  %v3408_v49 = vand.u32 2147483647, %v3187_v11  ;;  %vm3404_vm12 = vweird.f32 %v3187_v11 }
 0x691   : > { %v3130_v57 = vpop.f32.mrf.mxu1 }
 0x692   : > { %v3411_v51 = vor.u32 1.1754944e-38, %v3410_v14  ;;  %vm3409_vm2 = vcmp.eq.f32.partialorder %v3408_v49, 8.507059e+37 }
 0x695   : > { %v3170_v63 = vpop.f32.mrf.mxu3 }
 0x696   : > { %v4100_v44 = vpop.eup %4099  ;;  %v3188_v41 = vmax.f32 %v3170_v63, 1e-30 }
 0x697   : > { %v3400_v13 = vmul.f32 %v4100_v44, %v3187_v11  ;;  %vm3405_vm1 = vweird.f32 %v4100_v44 }
 0x698   : > { %4101 = vrcp.f32 %v3188_v41  ;;  %vm3406_vm5 = vmor %vm3404_vm12, %vm3405_vm1  ;;  %v3423_v23 = vand.u32 2147483647, %v3188_v41  ;;  %v3425_v18 = vand.u32 2147483648, %v3188_v41  ;;  %vm3419_vm15 = vweird.f32 %v3188_v41 }
 0x699   : > { %v3401_v12 = vsub.f32 1.0, %v3400_v13  ;;  %v3133_v35 = vpop.f32.mrf.mxu1 }
 0x69a   : > { %v3173_v26 = vmax.f32 %v3133_v35, 1e-30  ;;  %v3426_v10 = vor.u32 1.1754944e-38, %v3425_v18  ;;  %vm3424_vm10 = vcmp.eq.f32.partialorder %v3423_v23, 8.507059e+37 }
 0x69b   : > { %v3402_v8 = vmul.f32 %v4100_v44, %v3401_v12 }
 0x69c   : > { %4103 = vrcp.f32 %v3173_v26  ;;  %v3198_v11 = vand.u32 2147483647, %v3173_v26  ;;  %vm3194_vm14 = vweird.f32 %v3173_v26 }
 0x69d   : > { %v3403_v1 = vadd.f32 %v4100_v44, %v3402_v8 }
 0x69e   : > { %v4102_v60 = vpop.eup %4101  ;;  %vm3199_vm7 = vcmp.eq.f32.partialorder %v3198_v11, 8.507059e+37 }
 0x69f   : > { %v3415_v37 = vmul.f32 %v4102_v60, %v3188_v41  ;;  %v3407_v62 = vsel %vm3406_vm5, %v4100_v44, %v3403_v1  ;;  %vm3420_vm4 = vweird.f32 %v4102_v60  ;;  %vm3465_vm5 = vcmask 195584  }
 0x6a0   : > { %v3412_v31 = vsel %vm3409_vm2, %v3411_v51, %v3407_v62  ;;  %vm3421_vm6 = vmor %vm3419_vm15, %vm3420_vm4 }
 0x6a1   : > { %v3416_v21 = vsub.f32 1.0, %v3415_v37  ;;  %v3135_v33 = vpop.f32.mrf.mxu1  ;;  %v3413_v22 = vmul.f32 %v3412_v31, %v3128_v59  ;;  %v3200_v59 = vand.u32 2147483648, %v3173_v26 }
 0x6a2   : > { %v4104_v28 = vpop.eup %4103  ;;  %v3174_v50 = vmax.f32 %v3135_v33, 1e-30 }
 0x6a3   : > { %v3417_v54 = vmul.f32 %v4102_v60, %v3416_v21  ;;  %v3190_v56 = vmul.f32 %v4104_v28, %v3173_v26  ;;  %3624 = vst.msk [vmem:[%s7195_s23 + $0x70] sm:$0xff] %vm3035_vm8, %v3413_v22  ;;  %vm3195_vm11 = vweird.f32 %v4104_v28  ;;  %v3201_v40 = vor.u32 1.1754944e-38, %v3200_v59 }
 0x6a4   : > { %4105 = vrcp.f32 %v3174_v50  ;;  %vm3196_vm3 = vmor %vm3194_vm14, %vm3195_vm11  ;;  %v7271_v35 = vsel %vm3035_vm8, %v3413_v22, %v7168_v45  ;;  %v3215_v1 = vand.u32 2147483648, %v3174_v50  ;;  %vm3209_vm9 = vweird.f32 %v3174_v50 }
 0x6a5   : > { %v3418_v32 = vadd.f32 %v4102_v60, %v3417_v54  ;;  %v3191_v39 = vsub.f32 1.0, %v3190_v56 }
 0x6a6   : > { %v3216_v62 = vor.u32 1.1754944e-38, %v3215_v1 }
 0x6a7   : > { %v3192_v25 = vmul.f32 %v4104_v28, %v3191_v39  ;;  %v3422_v20 = vsel %vm3421_vm6, %v4102_v60, %v3418_v32 }
 0x6a8   : > { %v3427_v42 = vsel %vm3424_vm10, %v3426_v10, %v3422_v20 }
 0x6a9   : > { %v3193_v7 = vadd.f32 %v4104_v28, %v3192_v25  ;;  %v3138_v58 = vpop.f32.mrf.mxu1  ;;  %v3428_v38 = vmul.f32 %v3427_v42, %v3130_v57 }
 0x6aa   : > { %v4106_v63 = vpop.eup %4105  ;;  %v3175_v44 = vmax.f32 %v3138_v58, 1e-30 }
 0x6ab   : > { %v3205_v41 = vmul.f32 %v4106_v63, %v3174_v50  ;;  %v3197_v13 = vsel %vm3196_vm3, %v4104_v28, %v3193_v7  ;;  %v7265_v12 = vsel %vm3035_vm8, %v3428_v38, %v7171_v53  ;;  %3625 = vst.msk [vmem:[%s7195_s23 + $0x78] sm:$0xff] %vm3035_vm8, %v3428_v38  ;;  %vm3210_vm13 = vweird.f32 %v4106_v63 }
 0x6ac   : > { %4107 = vrcp.f32 %v3175_v44  ;;  %v3202_v14 = vsel %vm3199_vm7, %v3201_v40, %v3197_v13  ;;  %v3452_v26 = vpack.c.bf16 %v7265_v12, %v7271_v35  ;;  %v3213_v53 = vand.u32 2147483647, %v3174_v50  ;;  %vm3211_vm0 = vmor %vm3209_vm9, %vm3210_vm13 }
 0x6ad   : > { %v3206_v57 = vsub.f32 1.0, %v3205_v41  ;;  %v3203_v8 = vmul.f32 %v3202_v14, %v7165_v46  ;;  %v3230_v23 = vand.u32 2147483648, %v3175_v44  ;;  %v3228_v18 = vand.u32 2147483647, %v3175_v44 }
 0x6ae   : > { %vm3214_vm1 = vcmp.eq.f32.partialorder %v3213_v53, 8.507059e+37  ;;  %vm3224_vm2 = vweird.f32 %v3175_v44 }
 0x6af   : > { %v3207_v49 = vmul.f32 %v4106_v63, %v3206_v57  ;;  %3610 = vst.msk [vmem:[%s7195_s23] sm:$0xff] %vm3035_vm8, %v3203_v8  ;;  %v3429_v50 = vsel %vm3035_vm8, %v3203_v8, %v6944_v9  ;;  %v3231_v25 = vor.u32 1.1754944e-38, %v3230_v23  ;;  %vm3229_vm15 = vcmp.eq.f32.partialorder %v3228_v18, 8.507059e+37 }
 0x6b1   : > { %v3208_v60 = vadd.f32 %v4106_v63, %v3207_v49  ;;  %v3140_v51 = vpop.f32.mrf.mxu1 }
 0x6b2   : > { %v4108_v37 = vpop.eup %4107  ;;  %v3176_v45 = vmax.f32 %v3140_v51, 1e-30 }
 0x6b3   : > { %v3220_v31 = vmul.f32 %v4108_v37, %v3175_v44  ;;  %v3212_v21 = vsel %vm3211_vm0, %v4106_v63, %v3208_v60  ;;  %vm3225_vm12 = vweird.f32 %v4108_v37 }
 0x6b4   : > { %4109 = vrcp.f32 %v3176_v45  ;;  %v3217_v46 = vsel %vm3214_vm1, %v3216_v62, %v3212_v21  ;;  %vm3226_vm4 = vmor %vm3224_vm2, %vm3225_vm12  ;;  %v3245_v7 = vand.u32 2147483648, %v3176_v45  ;;  %v3243_v58 = vand.u32 2147483647, %v3176_v45 }
 0x6b5   : > { %v3221_v33 = vsub.f32 1.0, %v3220_v31  ;;  %v3218_v22 = vmul.f32 %v3217_v46, %v7173_v19  ;;  %vm3239_vm10 = vweird.f32 %v3176_v45 }
 0x6b6   : > { %v3246_v41 = vor.u32 1.1754944e-38, %v3245_v7  ;;  %vm3244_vm14 = vcmp.eq.f32.partialorder %v3243_v58, 8.507059e+37 }
 0x6b7   : > { %v3222_v28 = vmul.f32 %v4108_v37, %v3221_v33  ;;  %v3430_v54 = vsel %vm3035_vm8, %v3218_v22, %v6947_v17  ;;  %3611 = vst.msk [vmem:[%s7195_s23 + $0x8] sm:$0xff] %vm3035_vm8, %v3218_v22 }
 0x6b8   : > { %v3445_v32 = vpack.c.bf16 %v3430_v54, %v3429_v50 }
 0x6b9   : > { %v3143_v56 = vpop.f32.mrf.mxu1  ;;  %v3223_v39 = vadd.f32 %v4108_v37, %v3222_v28 }
 0x6ba   : > { %v4110_v10 = vpop.eup %4109  ;;  %v3177_v19 = vmax.f32 %v3143_v56, 1e-30  ;;  %3864 = vmatmul.msk.bf16.vlgmr.msrb.gmra.mxu2 %vm3465_vm5, %v3445_v32 }
 0x6bb   : > { %v3235_v59 = vmul.f32 %v4110_v10, %v3176_v45  ;;  %v3227_v20 = vsel %vm3226_vm4, %v4108_v37, %v3223_v39  ;;  %vm3240_vm6 = vweird.f32 %v4110_v10 }
 0x6bc   : > { %4111 = vrcp.f32 %v3177_v19  ;;  %v3232_v17 = vsel %vm3229_vm15, %v3231_v25, %v3227_v20  ;;  %vm3241_vm11 = vmor %vm3239_vm10, %vm3240_vm6  ;;  %v3260_v8 = vand.u32 2147483648, %v3177_v19  ;;  %v3258_v53 = vand.u32 2147483647, %v3177_v19 }
 0x6bd   : > { %v3236_v9 = vsub.f32 1.0, %v3235_v59  ;;  %v3233_v11 = vmul.f32 %v3232_v17, %v7179_v16  ;;  %vm3254_vm7 = vweird.f32 %v3177_v19 }
 0x6be   : > { %v3261_v31 = vor.u32 1.1754944e-38, %v3260_v8  ;;  %vm3259_vm9 = vcmp.eq.f32.partialorder %v3258_v53, 8.507059e+37 }
 0x6bf   : > { %v3237_v42 = vmul.f32 %v4110_v10, %v3236_v9  ;;  %3612 = vst.msk [vmem:[%s7195_s23 + $0x10] sm:$0xff] %vm3035_vm8, %v3233_v11  ;;  %v3431_v60 = vsel %vm3035_vm8, %v3233_v11, %v6983_v24 }
 0x6c1   : > { %v3145_v38 = vpop.f32.mrf.mxu1  ;;  %v3238_v63 = vadd.f32 %v4110_v10, %v3237_v42 }
 0x6c2   : > { %v4112_v44 = vpop.eup %4111  ;;  %v3178_v40 = vmax.f32 %v3145_v38, 1e-30 }
 0x6c3   : > { %v3250_v13 = vmul.f32 %v4112_v44, %v3177_v19  ;;  %v3242_v57 = vsel %vm3241_vm11, %v4110_v10, %v3238_v63  ;;  %vm3255_vm3 = vweird.f32 %v4112_v44 }
 0x6c4   : > { %4113 = vrcp.f32 %v3178_v40  ;;  %v3247_v16 = vsel %vm3244_vm14, %v3246_v41, %v3242_v57  ;;  %vm3256_vm13 = vmor %vm3254_vm7, %vm3255_vm3  ;;  %v3273_v28 = vand.u32 2147483647, %v3178_v40  ;;  %vm3269_vm1 = vweird.f32 %v3178_v40 }
 0x6c5   : > { %v3251_v14 = vsub.f32 1.0, %v3250_v13  ;;  %v3248_v49 = vmul.f32 %v3247_v16, %v7181_v47 }
 0x6c6   : > { %vm3274_vm2 = vcmp.eq.f32.partialorder %v3273_v28, 8.507059e+37 }
 0x6c7   : > { %v3252_v1 = vmul.f32 %v4112_v44, %v3251_v14  ;;  %v3432_v51 = vsel %vm3035_vm8, %v3248_v49, %v6986_v4  ;;  %3613 = vst.msk [vmem:[%s7195_s23 + $0x18] sm:$0xff] %vm3035_vm8, %v3248_v49  ;;  %v3275_v4 = vand.u32 2147483648, %v3178_v40 }
 0x6c8   : > { %v3446_v37 = vpack.c.bf16 %v3432_v51, %v3431_v60 }
 0x6c9   : > { %v3253_v45 = vadd.f32 %v4112_v44, %v3252_v1  ;;  %v3276_v18 = vor.u32 1.1754944e-38, %v3275_v4 }
 0x6ca   : > { %v4114_v62 = vpop.eup %4113  ;;  %3865 = vmatmul.msk.bf16.gmra.mxu2 %vm3465_vm5, %v3446_v37 }
 0x6cb   : > { %v3265_v21 = vmul.f32 %v4114_v62, %v3178_v40  ;;  %v3257_v47 = vsel %vm3256_vm13, %v4112_v44, %v3253_v45  ;;  %vm3270_vm0 = vweird.f32 %v4114_v62 }
 0x6cc   : > { %v3262_v33 = vsel %vm3259_vm9, %v3261_v31, %v3257_v47  ;;  %vm3271_vm12 = vmor %vm3269_vm1, %vm3270_vm0 }
 0x6cd   : > { %v3266_v46 = vsub.f32 1.0, %v3265_v21  ;;  %v3263_v24 = vmul.f32 %v3262_v33, %v7185_v15 }
 0x6cf   : > { %v3267_v22 = vmul.f32 %v4114_v62, %v3266_v46  ;;  %3614 = vst.msk [vmem:[%s7195_s23 + $0x20] sm:$0xff] %vm3035_vm8, %v3263_v24  ;;  %v3433_v32 = vsel %vm3035_vm8, %v3263_v24, %v7033_v29  ;;  %v3575_v29 = vld [vmem:[%s7424_s6] sm:$0x3] }
 0x6d0   : > { %v7331_v0 = vperm.slane %v3575_v29, 1 }
 0x6d1   : > { %v3268_v23 = vadd.f32 %v4114_v62, %v3267_v22 }
 0x6d3   : > { %v3272_v50 = vsel %vm3271_vm12, %v4114_v62, %v3268_v23 }
 0x6d4   : > { %v3277_v54 = vsel %vm3274_vm2, %v3276_v18, %v3272_v50 }
 0x6d5   : > { %v3278_v56 = vmul.f32 %v3277_v54, %v7187_v55 }
 0x6d7   : > { %v3434_v15 = vsel %vm3035_vm8, %v3278_v56, %v7036_v30  ;;  %3615 = vst.msk [vmem:[%s7195_s23 + $0x28] sm:$0xff] %vm3035_vm8, %v3278_v56  ;;  %vm3690_vm8 = vcmask 392320  }
 0x6d8   : > { %v3447_v39 = vpack.c.bf16 %v3434_v15, %v3433_v32 }
 0x6da   : > { %3866 = vmatmul.msk.bf16.gmra.mxu2 %vm3465_vm5, %v3447_v39 }
 0x6ea   : > { %3867 = vmatmul.msk.bf16.gmra.mxu2 %vm3465_vm5, %v3448_v61  ;;  %v7333_v61 = vperm.slane %v3575_v29, 0 }
 0x6fa   : > { %3868 = vmatmul.msk.bf16.gmra.mxu2 %vm3465_vm5, %v3449_v27 }
 0x70a   : > { %3869 = vmatmul.msk.bf16.gmra.mxu2 %vm3465_vm5, %v3450_v34 }
 0x71a   : > { %3870 = vmatmul.msk.bf16.gmra.mxu2 %vm3465_vm5, %v3451_v5 }
 0x72a   : > { %3871 = vmatmul.msk.bf16.gmra.mxu2 %vm3465_vm5, %v3452_v26 }
 0x73d   : > { %v3503_v30 = vpop.f32.mrf.mxu2 }
 0x73e   : > { %v3543_v55 = vmax.f32 %v3503_v30, 1e-08 }
 0x740   : > { %v3559_v6 = vmin.f32 %v3543_v55, 1.0 }
 0x742   : > { %v3577_v3 = vmul.f32 %v7331_v0, %v3559_v6 }
 0x744   : > { %v3594_v36 = vadd.f32 %v7333_v61, %v3577_v3 }
 0x745   : > { %v3505_v27 = vpop.f32.mrf.mxu2 }
 0x746   : > { %v3544_v52 = vmax.f32 %v3505_v27, 1e-08  ;;  %3642 = vrot.lane.b32.xlu1 %v3594_v36, %s4204_s8 }
 0x748   : > { %v3560_v48 = vmin.f32 %v3544_v52, 1.0 }
 0x74a   : > { %v3578_v34 = vmul.f32 %v7331_v0, %v3560_v48 }
 0x74c   : > { %v3595_v2 = vadd.f32 %v7333_v61, %v3578_v34 }
 0x74d   : > { %v3508_v43 = vpop.f32.mrf.mxu2 }
 0x74e   : > { %v3545_v5 = vmax.f32 %v3508_v43, 1e-08  ;;  %3644 = vrot.lane.b32.xlu2 %v3595_v2, %s4204_s8 }
 0x750   : > { %v3561_v12 = vmin.f32 %v3545_v5, 1.0 }
 0x752   : > { %v3579_v35 = vmul.f32 %v7331_v0, %v3561_v12 }
 0x754   : > { %v3596_v26 = vadd.f32 %v7333_v61, %v3579_v35 }
 0x755   : > { %v3510_v10 = vpop.f32.mrf.mxu2 }
 0x756   : > { %v3546_v19 = vmax.f32 %v3510_v10, 1e-08  ;;  %3646 = vrot.lane.b32.xlu0 %v3596_v26, %s4204_s8 }
 0x758   : > { %v3562_v25 = vmin.f32 %v3546_v19, 1.0 }
 0x75a   : > { %v3580_v59 = vmul.f32 %v7331_v0, %v3562_v25 }
 0x75c   : > { %v3597_v20 = vadd.f32 %v7333_v61, %v3580_v59 }
 0x75d   : > { %v3513_v9 = vpop.f32.mrf.mxu2 }
 0x75e   : > { %v3547_v17 = vmax.f32 %v3513_v9, 1e-08  ;;  %3648 = vrot.lane.b32.xlu1 %v3597_v20, %s4204_s8 }
 0x760   : > { %v3563_v11 = vmin.f32 %v3547_v17, 1.0 }
 0x762   : > { %v3581_v42 = vmul.f32 %v7331_v0, %v3563_v11 }
 0x764   : > { %v3598_v7 = vadd.f32 %v7333_v61, %v3581_v42 }
 0x765   : > { %v3515_v58 = vpop.f32.mrf.mxu2 }
 0x766   : > { %v3548_v38 = vmax.f32 %v3515_v58, 1e-08  ;;  %3650 = vrot.lane.b32.xlu2 %v3598_v7, %s4204_s8 }
 0x768   : > { %v3564_v63 = vmin.f32 %v3548_v38, 1.0 }
 0x76a   : > { %v3582_v44 = vmul.f32 %v7331_v0, %v3564_v63 }
 0x76c   : > { %v3599_v40 = vadd.f32 %v7333_v61, %v3582_v44 }
 0x76d   : > { %v3518_v41 = vpop.f32.mrf.mxu2 }
 0x76e   : > { %v3549_v13 = vmax.f32 %v3518_v41, 1e-08  ;;  %3652 = vrot.lane.b32.xlu0 %v3599_v40, %s4204_s8 }
 0x770   : > { %v3565_v57 = vmin.f32 %v3549_v13, 1.0 }
 0x772   : > { %v3583_v14 = vmul.f32 %v7331_v0, %v3565_v57 }
 0x774   : > { %v3600_v16 = vadd.f32 %v7333_v61, %v3583_v14 }
 0x775   : > { %v3520_v8 = vpop.f32.mrf.mxu2 }
 0x776   : > { %v3550_v49 = vmax.f32 %v3520_v8, 1e-08  ;;  %3654 = vrot.lane.b32.xlu1 %v3600_v16, %s4204_s8 }
 0x778   : > { %v3566_v1 = vmin.f32 %v3550_v49, 1.0 }
 0x77a   : > { %v3584_v53 = vmul.f32 %v7331_v0, %v3566_v1 }
 0x77c   : > { %v3601_v60 = vadd.f32 %v7333_v61, %v3584_v53 }
 0x77d   : > { %v3523_v51 = vpop.f32.mrf.mxu2 }
 0x77e   : > { %v3551_v37 = vmax.f32 %v3523_v51, 1e-08  ;;  %3656 = vrot.lane.b32.xlu2 %v3601_v60, %s4204_s8 }
 0x780   : > { %v3567_v45 = vmin.f32 %v3551_v37, 1.0 }
 0x782   : > { %v3585_v62 = vmul.f32 %v7331_v0, %v3567_v45 }
 0x784   : > { %v3602_v31 = vadd.f32 %v7333_v61, %v3585_v62 }
 0x785   : > { %v3525_v21 = vpop.f32.mrf.mxu2 }
 0x786   : > { %v3552_v47 = vmax.f32 %v3525_v21, 1e-08  ;;  %3658 = vrot.lane.b32.xlu0 %v3602_v31, %s4204_s8 }
 0x788   : > { %v3568_v33 = vmin.f32 %v3552_v47, 1.0 }
 0x78a   : > { %v3586_v46 = vmul.f32 %v7331_v0, %v3568_v33 }
 0x78c   : > { %v3603_v24 = vadd.f32 %v7333_v61, %v3586_v46 }
 0x78d   : > { %v3528_v4 = vpop.f32.mrf.mxu2 }
 0x78e   : > { %v3553_v22 = vmax.f32 %v3528_v4, 1e-08  ;;  %3660 = vrot.lane.b32.xlu1 %v3603_v24, %s4204_s8 }
 0x790   : > { %v3569_v28 = vmin.f32 %v3553_v22, 1.0 }
 0x792   : > { %v3587_v23 = vmul.f32 %v7331_v0, %v3569_v28 }
 0x794   : > { %v3604_v18 = vadd.f32 %v7333_v61, %v3587_v23 }
 0x795   : > { %v3530_v50 = vpop.f32.mrf.mxu2 }
 0x796   : > { %v3554_v54 = vmax.f32 %v3530_v50, 1e-08  ;;  %3662 = vrot.lane.b32.xlu2 %v3604_v18, %s4204_s8 }
 0x798   : > { %v3570_v56 = vmin.f32 %v3554_v54, 1.0 }
 0x79a   : > { %v3588_v32 = vmul.f32 %v7331_v0, %v3570_v56 }
 0x79c   : > { %v3605_v15 = vadd.f32 %v7333_v61, %v3588_v32 }
 0x79d   : > { %v3533_v39 = vpop.f32.mrf.mxu2 }
 0x79e   : > { %v3555_v29 = vmax.f32 %v3533_v39, 1e-08  ;;  %3664 = vrot.lane.b32.xlu0 %v3605_v15, %s4204_s8 }
 0x7a0   : > { %v3571_v30 = vmin.f32 %v3555_v29, 1.0 }
 0x7a2   : > { %v3589_v55 = vmul.f32 %v7331_v0, %v3571_v30 }
 0x7a4   : > { %v3606_v6 = vadd.f32 %v7333_v61, %v3589_v55 }
 0x7a5   : > { %v3535_v3 = vpop.f32.mrf.mxu2 }
 0x7a6   : > { %v3556_v36 = vmax.f32 %v3535_v3, 1e-08  ;;  %3666 = vrot.lane.b32.xlu1 %v3606_v6, %s4204_s8 }
 0x7a8   : > { %v3572_v27 = vmin.f32 %v3556_v36, 1.0  ;;  %v3645_v52 = vpop.permute.xlu2 %3644 }
 0x7a9   : > { %3692 = vst.msk [vmem:[%s7195_s23 + $0x8] sm:$0xff] %vm3690_vm8, %v3645_v52 }
 0x7aa   : > { %v3590_v48 = vmul.f32 %v7331_v0, %v3572_v27 }
 0x7ac   : > { %v3607_v34 = vadd.f32 %v7333_v61, %v3590_v48 }
 0x7ad   : > { %v3538_v2 = vpop.f32.mrf.mxu2 }
 0x7ae   : > { %v3557_v43 = vmax.f32 %v3538_v2, 1e-08  ;;  %3668 = vrot.lane.b32.xlu2 %v3607_v34, %s4204_s8 }
 0x7b0   : > { %v3573_v5 = vmin.f32 %v3557_v43, 1.0 }
 0x7b2   : > { %v3591_v12 = vmul.f32 %v7331_v0, %v3573_v5 }
 0x7b4   : > { %v3608_v35 = vadd.f32 %v7333_v61, %v3591_v12 }
 0x7b5   : > { %v3540_v26 = vpop.f32.mrf.mxu2 }
 0x7b6   : > { %v3558_v10 = vmax.f32 %v3540_v26, 1e-08  ;;  %3670 = vrot.lane.b32.xlu0 %v3608_v35, %s4204_s8 }
 0x7b8   : > { %v3574_v19 = vmin.f32 %v3558_v10, 1.0  ;;  %v3643_v25 = vpop.permute.xlu1 %3642 }
 0x7b9   : > { %3691 = vst.msk [vmem:[%s7195_s23] sm:$0xff] %vm3690_vm8, %v3643_v25 }
 0x7ba   : > { %v3592_v59 = vmul.f32 %v7331_v0, %v3574_v19 }
 0x7bc   : > { %v3609_v20 = vadd.f32 %v7333_v61, %v3592_v59 }
 0x7be   : > { %3672 = vrot.lane.b32.xlu1 %v3609_v20, %s4204_s8 }
 0x7c0   : > { %v3651_v9 = vpop.permute.xlu2 %3650 }
 0x7c1   : > { %3695 = vst.msk [vmem:[%s7195_s23 + $0x20] sm:$0xff] %vm3690_vm8, %v3651_v9 }
 0x7c8   : > { %v3647_v17 = vpop.permute.xlu0 %3646 }
 0x7c9   : > { %3693 = vst.msk [vmem:[%s7195_s23 + $0x10] sm:$0xff] %vm3690_vm8, %v3647_v17 }
 0x7d0   : > { %v3649_v11 = vpop.permute.xlu1 %3648 }
 0x7d1   : > { %3694 = vst.msk [vmem:[%s7195_s23 + $0x18] sm:$0xff] %vm3690_vm8, %v3649_v11 }
 0x7d8   : > { %v3657_v42 = vpop.permute.xlu2 %3656 }
 0x7d9   : > { %3698 = vst.msk [vmem:[%s7195_s23 + $0x38] sm:$0xff] %vm3690_vm8, %v3657_v42 }
 0x7e0   : > { %v3653_v0 = vpop.permute.xlu0 %3652 }
 0x7e1   : > { %3696 = vst.msk [vmem:[%s7195_s23 + $0x28] sm:$0xff] %vm3690_vm8, %v3653_v0 }
 0x7e8   : > { %v3655_v61 = vpop.permute.xlu1 %3654 }
 0x7e9   : > { %3697 = vst.msk [vmem:[%s7195_s23 + $0x30] sm:$0xff] %vm3690_vm8, %v3655_v61 }
 0x7f0   : > { %v3663_v7 = vpop.permute.xlu2 %3662 }
 0x7f1   : > { %3701 = vst.msk [vmem:[%s7195_s23 + $0x50] sm:$0xff] %vm3690_vm8, %v3663_v7 }
 0x7f8   : > { %v3659_v58 = vpop.permute.xlu0 %3658 }
 0x7f9   : > { %3699 = vst.msk [vmem:[%s7195_s23 + $0x40] sm:$0xff] %vm3690_vm8, %v3659_v58 }
 0x800   : > { %v3661_v38 = vpop.permute.xlu1 %3660 }
 0x801   : > { %3700 = vst.msk [vmem:[%s7195_s23 + $0x48] sm:$0xff] %vm3690_vm8, %v3661_v38 }
 0x808   : > { %v3669_v63 = vpop.permute.xlu2 %3668 }
 0x809   : > { %3704 = vst.msk [vmem:[%s7195_s23 + $0x68] sm:$0xff] %vm3690_vm8, %v3669_v63 }
 0x810   : > { %v3665_v44 = vpop.permute.xlu0 %3664 }
 0x811   : > { %3702 = vst.msk [vmem:[%s7195_s23 + $0x58] sm:$0xff] %vm3690_vm8, %v3665_v44 }
 0x818   : > { %v3667_v40 = vpop.permute.xlu1 %3666 }
 0x819   : > { %3703 = vst.msk [vmem:[%s7195_s23 + $0x60] sm:$0xff] %vm3690_vm8, %v3667_v40 }
 0x828   : > { %v3671_v41 = vpop.permute.xlu0 %3670 }
 0x829   : > { %3705 = vst.msk [vmem:[%s7195_s23 + $0x70] sm:$0xff] %vm3690_vm8, %v3671_v41 }
 0x830   : > { %v3673_v13 = vpop.permute.xlu1 %3672 }
 0x831   : > { %3706 = vst.msk [vmem:[%s7195_s23 + $0x78] sm:$0xff] %vm3690_vm8, %v3673_v13 }
 0x832 PF: > { %s17_s24 = sadd.s32 1, %s4192_s24  }
 0x833   : > { %p14_p4 = scmp.ge.s32.totalorder %s17_s24, 4  }
 0x835   :  { %16 = sbr.rel (!%p14_p4) target bundleno = 1 (0x1), region = 84 }

</bundles_post_ra>
